<compile_context>
chip_gen: v6e
topology: v6e:2x2x1
jax: 0.10.0
libtpu: 0.0.40
codegen_flags: <defaults>
</compile_context>

<pallas_src>
import jax
import jax.numpy as jnp
from jax.experimental import pallas as pl
from jax.experimental.pallas import tpu as pltpu

_NORMALIZE_EPS = 1e-12  # torch.nn.functional.normalize default


def _gelu_tanh(v):
    # TODO(synk): PyTorch nn.GELU() defaults to the exact erf formulation; the
    # tanh approximation (max abs err ~3e-3) is used because an erf lowering is
    # not guaranteed in Mosaic.
    c = 0.7978845608028654  # sqrt(2/pi)
    return 0.5 * v * (1.0 + jnp.tanh(c * (v + 0.044715 * v * v * v)))


def _resident_spec(block_shape, index_map):
    """BlockSpec for a constant-index (resident) operand, single-buffered.

    The index_map is constant across the grid, so the default double buffer is
    pure VMEM waste (matters at production DINO sizes on v7x's 64 MiB VMEM).
    Falls back to a plain BlockSpec if pipeline_mode is unsupported.
    """
    if hasattr(pl, "Buffered"):
        try:
            return pl.BlockSpec(block_shape, index_map,
                                pipeline_mode=pl.Buffered(1))
        except (TypeError, ValueError):
            pass
    return pl.BlockSpec(block_shape, index_map)


def _vmem_cap_bytes(frac=0.85):
    """Generation-aware scoped-VMEM cap (85% of physical)."""
    try:
        cap = int(pltpu.get_tpu_info().vmem_capacity_bytes)
    except Exception:
        cap = 64 * 1024 * 1024  # conservative fallback: v7x physical VMEM
    return int(frac * cap)


def _mlp_norm_kernel(x_ref, w1_ref, b1_ref, w2_ref, b2_ref, w3_ref, b3_ref,
                     h_ref):
    """Fused 3-layer MLP + L2 normalize for one batch tile."""
    cdt = w1_ref.dtype  # MXU operand dtype (bf16 after param prep)
    h = jnp.dot(x_ref[...].astype(cdt), w1_ref[...],
                preferred_element_type=jnp.float32) + b1_ref[...]
    h = _gelu_tanh(h)
    h = jnp.dot(h.astype(cdt), w2_ref[...],
                preferred_element_type=jnp.float32) + b2_ref[...]
    h = _gelu_tanh(h)
    h = jnp.dot(h.astype(cdt), w3_ref[...],
                preferred_element_type=jnp.float32) + b3_ref[...]
    # F.normalize(p=2): x / max(||x||, eps) == x * rsqrt(max(||x||^2, eps^2))
    sq = jnp.sum(h * h, axis=-1, keepdims=True)
    h = h * jax.lax.rsqrt(jnp.maximum(sq, _NORMALIZE_EPS * _NORMALIZE_EPS))
    h_ref[...] = h.astype(h_ref.dtype)  # store in MXU operand dtype (bf16)


def _last_layer_kernel(h_ref, w_ref, o_ref):
    """One (batch tile x output slab) of the weight-normalized last layer.

    The g/||v|| row scale is already folded into w_ref, so the epilogue is
    just cast + store (lane-dense output slab).
    """
    o_ref[...] = jnp.dot(h_ref[...], w_ref[...],
                         preferred_element_type=jnp.float32).astype(o_ref.dtype)


def dino_projection_head(x, w1, b1, w2, b2, w3, b3, w_last_v, w_last_g, *,
                         block_b=256, block_out=2048,
                         compute_dtype=jnp.bfloat16):
    """Forward pass of DinoProjectionHead (num_layers=3, use_bn=False).

    Weights come in PyTorch layout: w* are (out_features, in_features), b* are
    (out_features,); w_last_v / w_last_g are the weight_norm parameters of the
    bias-free last layer (weight_g == 1 in DINO).

    block_b: batch tile (256 fills the v6e/v7x 256-wide MXU; use 128 on v5e).
    block_out: output-feature slab width of the streamed last-layer weight.
    compute_dtype: MXU operand dtype for weights/activations (default bf16).
    """
    B, in_dim = x.shape
    hidden = w1.shape[0]
    bottleneck = w3.shape[0]
    out_dim = w_last_v.shape[0]
    cdt = jnp.dtype(compute_dtype)
    cb = cdt.itemsize

    # ---- parameter prep (production: do this once at parameter-load time) ----
    # (in, out) layouts -> plain (1,0)-contractions, no per-tile RHS transpose.
    w1t = w1.T.astype(cdt)                       # (in_dim, hidden)
    w2t = w2.T.astype(cdt)                       # (hidden, hidden)
    w3t = w3.T.astype(cdt)                       # (hidden, bottleneck)
    b1r = b1.astype(jnp.float32).reshape(1, hidden)
    b2r = b2.astype(jnp.float32).reshape(1, hidden)
    b3r = b3.astype(jnp.float32).reshape(1, bottleneck)
    # weight_norm (dim=0): W_eff = g * v / ||v||_row; fold the per-row scale
    # into the rows and pre-transpose to (bottleneck, out_dim).
    row_norm = jnp.sqrt(jnp.sum(w_last_v.astype(jnp.float32) ** 2, axis=1,
                                keepdims=True))
    w_eff = (w_last_g.astype(jnp.float32).reshape(-1, 1)
             * w_last_v.astype(jnp.float32) / jnp.maximum(row_norm, 1e-12))
    # TODO(synk): on v7x this stream could additionally be fp8-quantized
    # (per-row scale) for another ~2x on the memory-bound last layer.
    w_eff_t = w_eff.T.astype(cdt)                # (bottleneck, out_dim)

    # ---- tiling / padding -----------------------------------------------------
    if B <= block_b:
        tb, b_pad = B, B
    else:
        tb = block_b
        b_pad = pl.cdiv(B, tb) * tb
    x_k = x if b_pad == B else jnp.pad(x, ((0, b_pad - B), (0, 0)))

    if out_dim <= block_out:
        tn, out_pad = out_dim, out_dim
    else:
        tn = block_out
        out_pad = pl.cdiv(out_dim, tn) * tn
    wv_k = w_eff_t if out_pad == out_dim else jnp.pad(
        w_eff_t, ((0, 0), (0, out_pad - out_dim)))

    n_b = b_pad // tb
    n_o = out_pad // tn
    vmem_cap = _vmem_cap_bytes()

    # ---- kernel 1: fused MLP + L2-normalize over batch tiles ------------------
    # Budget counts weights at 2x (worst case if Buffered(1) is not honored).
    vmem1 = (2 * tb * in_dim * x.dtype.itemsize
             + 2 * (in_dim * hidden + hidden * hidden + hidden * bottleneck) * cb
             + 2 * (2 * hidden + bottleneck) * 4
             + 2 * tb * bottleneck * cb
             + 4 * tb * max(in_dim, hidden, bottleneck) * 4)
    vmem1 = min(vmem_cap, max(int(1.5 * vmem1), 16 * 1024 * 1024))

    def _mlp_specs(resident):
        return [
            pl.BlockSpec((tb, in_dim), lambda i: (i, 0)),            # x tile
            resident((in_dim, hidden), lambda i: (0, 0)),            # w1.T
            resident((1, hidden), lambda i: (0, 0)),                 # b1
            resident((hidden, hidden), lambda i: (0, 0)),            # w2.T
            resident((1, hidden), lambda i: (0, 0)),                 # b2
            resident((hidden, bottleneck), lambda i: (0, 0)),        # w3.T
            resident((1, bottleneck), lambda i: (0, 0)),             # b3
        ]

    def _run_mlp(resident):
        return pl.pallas_call(
            _mlp_norm_kernel,
            out_shape=jax.ShapeDtypeStruct((b_pad, bottleneck), cdt),
            grid=(n_b,),
            in_specs=_mlp_specs(resident),
            out_specs=pl.BlockSpec((tb, bottleneck), lambda i: (i, 0)),
            compiler_params=pltpu.CompilerParams(
                dimension_semantics=("parallel",),
                vmem_limit_bytes=vmem1),
        )(x_k, w1t, b1r, w2t, b2r, w3t, b3r)

    try:
        h = _run_mlp(_resident_spec)          # single-buffered resident weights
    except Exception:
        h = _run_mlp(pl.BlockSpec)            # fallback: default double-buffering

    # ---- kernel 2: weight-normalized last layer (dominant, memory-bound) ------
    vmem2 = (2 * tb * bottleneck * cb
             + 2 * bottleneck * tn * cb
             + 2 * tb * tn * x.dtype.itemsize
             + 2 * tb * tn * 4)
    vmem2 = min(vmem_cap, max(int(1.5 * vmem2), 16 * 1024 * 1024))

    out = pl.pallas_call(
        _last_layer_kernel,
        out_shape=jax.ShapeDtypeStruct((b_pad, out_pad), x.dtype),
        grid=(n_b, n_o),
        in_specs=[
            pl.BlockSpec((tb, bottleneck), lambda i, j: (i, 0)),     # normalized h
            pl.BlockSpec((bottleneck, tn), lambda i, j: (0, j)),     # folded W_eff.T slab
        ],
        out_specs=pl.BlockSpec((tb, tn), lambda i, j: (i, j)),
        compiler_params=pltpu.CompilerParams(
            # Both axes parallel: megacores on v7x even when B fits one tile.
            dimension_semantics=("parallel", "parallel"),
            vmem_limit_bytes=vmem2),
    )(h, wv_k)

    if b_pad != B or out_pad != out_dim:
        out = out[:B, :out_dim]
    return out


def reference(x, w1, b1, w2, b2, w3, b3, w_last_v, w_last_g):
    h = _gelu_tanh(x @ w1.T + b1)
    h = _gelu_tanh(h @ w2.T + b2)
    h = h @ w3.T + b3
    n = jnp.sqrt(jnp.sum(h * h, axis=-1, keepdims=True))
    h = h / jnp.maximum(n, _NORMALIZE_EPS)
    w_eff = (w_last_g[:, None] * w_last_v
             / jnp.maximum(jnp.linalg.norm(w_last_v, axis=1, keepdims=True), 1e-12))
    return h @ w_eff.T


if __name__ == "__main__":
    # Small, lane-aligned shapes (DINO head scaled down).  B=200 with
    # block_b=128 exercises batch tiling + pad/slice; out_dim=1024 with
    # block_out=512 exercises the streamed last-layer slab path.
    B, in_dim, hidden, bottleneck, out_dim = 200, 256, 256, 128, 1024

    key = jax.random.PRNGKey(0)
    ks = jax.random.split(key, 8)
    x = jax.random.normal(ks[0], (B, in_dim), dtype=jnp.float32)
    # trunc_normal(std=0.02)-style weights; bias init is 0 in the module, small
    # random values here exercise the bias path.
    w1 = jax.random.normal(ks[1], (hidden, in_dim), dtype=jnp.float32) * 0.02
    b1 = jax.random.normal(ks[2], (hidden,), dtype=jnp.float32) * 0.01
    w2 = jax.random.normal(ks[3], (hidden, hidden), dtype=jnp.float32) * 0.02
    b2 = jax.random.normal(ks[4], (hidden,), dtype=jnp.float32) * 0.01
    w3 = jax.random.normal(ks[5], (bottleneck, hidden), dtype=jnp.float32) * 0.02
    b3 = jax.random.normal(ks[6], (bottleneck,), dtype=jnp.float32) * 0.01
    w_last_v = jax.random.normal(ks[7], (out_dim, bottleneck), dtype=jnp.float32) * 0.02
    w_last_g = jnp.ones((out_dim,), dtype=jnp.float32)   # weight_g.data.fill_(1)

    out = dino_projection_head(x, w1, b1, w2, b2, w3, b3, w_last_v, w_last_g,
                               block_b=128, block_out=512)
    out = jax.block_until_ready(out)

    ref = reference(x, w1, b1, w2, b2, w3, b3, w_last_v, w_last_g)
    assert out.shape == (B, out_dim), out.shape
    assert bool(jnp.isfinite(out).all()), "non-finite output"
    max_err = float(jnp.max(jnp.abs(out - ref)))
    # Tolerance covers bf16 weight/activation quantization vs the f32 reference.
    assert max_err < 2e-2, f"mismatch vs reference: max abs err {max_err}"
    print("KERNEL_OK")
</pallas_src>

<mosaic_0001>
module attributes {stable_mosaic.version = 11 : i64} {
  func.func @_mlp_norm_kernel(%arg0: i32, %arg1: memref<128x256xf32, #tpu.memory_space<vmem>>, %arg2: memref<256x256xbf16, #tpu.memory_space<vmem>>, %arg3: memref<1x256xf32, #tpu.memory_space<vmem>>, %arg4: memref<256x256xbf16, #tpu.memory_space<vmem>>, %arg5: memref<1x256xf32, #tpu.memory_space<vmem>>, %arg6: memref<256x128xbf16, #tpu.memory_space<vmem>>, %arg7: memref<1x128xf32, #tpu.memory_space<vmem>>, %arg8: memref<128x128xbf16, #tpu.memory_space<vmem>>) attributes {dimension_semantics = [#tpu.dimension_semantics<parallel>], iteration_bounds = array<i64: 2>, scalar_prefetch = 0 : i64, scratch_operands = 0 : i64, tpu.core_type = #tpu.core_type<tc>, window_params = [{transform_indices = @transform_0, window_bounds = array<i64: 128, 256>}, {pipeline_mode = #tpu.pipeline_mode<synchronous>, transform_indices = @transform_1, window_bounds = array<i64: 256, 256>}, {pipeline_mode = #tpu.pipeline_mode<synchronous>, transform_indices = @transform_2, window_bounds = array<i64: 1, 256>}, {pipeline_mode = #tpu.pipeline_mode<synchronous>, transform_indices = @transform_3, window_bounds = array<i64: 256, 256>}, {pipeline_mode = #tpu.pipeline_mode<synchronous>, transform_indices = @transform_4, window_bounds = array<i64: 1, 256>}, {pipeline_mode = #tpu.pipeline_mode<synchronous>, transform_indices = @transform_5, window_bounds = array<i64: 256, 128>}, {pipeline_mode = #tpu.pipeline_mode<synchronous>, transform_indices = @transform_6, window_bounds = array<i64: 1, 128>}, {transform_indices = @transform_7, window_bounds = array<i64: 128, 128>}]} {
    %c0 = arith.constant 0 : index
    %c0_0 = arith.constant 0 : index
    %0 = vector.load %arg1[%c0, %c0_0] : memref<128x256xf32, #tpu.memory_space<vmem>>, vector<128x256xf32>
    %1 = arith.truncf %0 : vector<128x256xf32> to vector<128x256xbf16>
    %c0_1 = arith.constant 0 : index
    %c0_2 = arith.constant 0 : index
    %2 = vector.load %arg2[%c0_1, %c0_2] : memref<256x256xbf16, #tpu.memory_space<vmem>>, vector<256x256xbf16>
    %cst = arith.constant dense<0.000000e+00> : vector<128x256xf32>
    %3 = tpu.matmul %1, %2, %cst {dimension_numbers = #tpu.dot_dimension_numbers<[1], [0], [0], [1], [0, 0, 1, 1], [], []>} : vector<128x256xbf16>, vector<256x256xbf16>, vector<128x256xf32> -> vector<128x256xf32>
    %c0_3 = arith.constant 0 : index
    %c0_4 = arith.constant 0 : index
    %4 = vector.load %arg3[%c0_3, %c0_4] : memref<1x256xf32, #tpu.memory_space<vmem>>, vector<1x256xf32>
    %5 = vector.broadcast %4 : vector<1x256xf32> to vector<128x256xf32>
    %6 = arith.addf %3, %5 : vector<128x256xf32>
    %cst_5 = arith.constant 5.000000e-01 : f32
    %7 = vector.broadcast %cst_5 : f32 to vector<128x256xf32>
    %8 = arith.mulf %7, %6 : vector<128x256xf32>
    %cst_6 = arith.constant 4.471500e-02 : f32
    %9 = vector.broadcast %cst_6 : f32 to vector<128x256xf32>
    %10 = arith.mulf %9, %6 : vector<128x256xf32>
    %11 = arith.mulf %10, %6 : vector<128x256xf32>
    %12 = arith.mulf %11, %6 : vector<128x256xf32>
    %13 = arith.addf %6, %12 : vector<128x256xf32>
    %cst_7 = arith.constant 0.797884583 : f32
    %14 = vector.broadcast %cst_7 : f32 to vector<128x256xf32>
    %15 = arith.mulf %14, %13 : vector<128x256xf32>
    %16 = math.tanh %15 : vector<128x256xf32>
    %cst_8 = arith.constant 1.000000e+00 : f32
    %17 = vector.broadcast %cst_8 : f32 to vector<128x256xf32>
    %18 = arith.addf %17, %16 : vector<128x256xf32>
    %19 = arith.mulf %8, %18 : vector<128x256xf32>
    %20 = arith.truncf %19 : vector<128x256xf32> to vector<128x256xbf16>
    %c0_9 = arith.constant 0 : index
    %c0_10 = arith.constant 0 : index
    %21 = vector.load %arg4[%c0_9, %c0_10] : memref<256x256xbf16, #tpu.memory_space<vmem>>, vector<256x256xbf16>
    %cst_11 = arith.constant dense<0.000000e+00> : vector<128x256xf32>
    %22 = tpu.matmul %20, %21, %cst_11 {dimension_numbers = #tpu.dot_dimension_numbers<[1], [0], [0], [1], [0, 0, 1, 1], [], []>} : vector<128x256xbf16>, vector<256x256xbf16>, vector<128x256xf32> -> vector<128x256xf32>
    %c0_12 = arith.constant 0 : index
    %c0_13 = arith.constant 0 : index
    %23 = vector.load %arg5[%c0_12, %c0_13] : memref<1x256xf32, #tpu.memory_space<vmem>>, vector<1x256xf32>
    %24 = vector.broadcast %23 : vector<1x256xf32> to vector<128x256xf32>
    %25 = arith.addf %22, %24 : vector<128x256xf32>
    %cst_14 = arith.constant 5.000000e-01 : f32
    %26 = vector.broadcast %cst_14 : f32 to vector<128x256xf32>
    %27 = arith.mulf %26, %25 : vector<128x256xf32>
    %cst_15 = arith.constant 4.471500e-02 : f32
    %28 = vector.broadcast %cst_15 : f32 to vector<128x256xf32>
    %29 = arith.mulf %28, %25 : vector<128x256xf32>
    %30 = arith.mulf %29, %25 : vector<128x256xf32>
    %31 = arith.mulf %30, %25 : vector<128x256xf32>
    %32 = arith.addf %25, %31 : vector<128x256xf32>
    %cst_16 = arith.constant 0.797884583 : f32
    %33 = vector.broadcast %cst_16 : f32 to vector<128x256xf32>
    %34 = arith.mulf %33, %32 : vector<128x256xf32>
    %35 = math.tanh %34 : vector<128x256xf32>
    %cst_17 = arith.constant 1.000000e+00 : f32
    %36 = vector.broadcast %cst_17 : f32 to vector<128x256xf32>
    %37 = arith.addf %36, %35 : vector<128x256xf32>
    %38 = arith.mulf %27, %37 : vector<128x256xf32>
    %39 = arith.truncf %38 : vector<128x256xf32> to vector<128x256xbf16>
    %c0_18 = arith.constant 0 : index
    %c0_19 = arith.constant 0 : index
    %40 = vector.load %arg6[%c0_18, %c0_19] : memref<256x128xbf16, #tpu.memory_space<vmem>>, vector<256x128xbf16>
    %cst_20 = arith.constant dense<0.000000e+00> : vector<128x128xf32>
    %41 = tpu.matmul %39, %40, %cst_20 {dimension_numbers = #tpu.dot_dimension_numbers<[1], [0], [0], [1], [0, 0, 1, 1], [], []>} : vector<128x256xbf16>, vector<256x128xbf16>, vector<128x128xf32> -> vector<128x128xf32>
    %c0_21 = arith.constant 0 : index
    %c0_22 = arith.constant 0 : index
    %42 = vector.load %arg7[%c0_21, %c0_22] : memref<1x128xf32, #tpu.memory_space<vmem>>, vector<1x128xf32>
    %43 = vector.broadcast %42 : vector<1x128xf32> to vector<128x128xf32>
    %44 = arith.addf %41, %43 : vector<128x128xf32>
    %45 = arith.mulf %44, %44 : vector<128x128xf32>
    %cst_23 = arith.constant dense<0.000000e+00> : vector<128xf32>
    %46 = vector.multi_reduction <add>, %45, %cst_23 [1] : vector<128x128xf32> to vector<128xf32>
    %47 = vector.shape_cast %46 : vector<128xf32> to vector<128x1xf32>
    %cst_24 = arith.constant 1.000000e-24 : f32
    %48 = vector.broadcast %cst_24 : f32 to vector<128x1xf32>
    %49 = arith.maximumf %47, %48 : vector<128x1xf32>
    %50 = math.rsqrt %49 : vector<128x1xf32>
    %51 = vector.broadcast %50 : vector<128x1xf32> to vector<128x128xf32>
    %52 = arith.mulf %44, %51 : vector<128x128xf32>
    %53 = arith.truncf %52 : vector<128x128xf32> to vector<128x128xbf16>
    %c0_25 = arith.constant 0 : index
    %c0_26 = arith.constant 0 : index
    %54 = vector.load %arg8[%c0_25, %c0_26] : memref<128x128xbf16, #tpu.memory_space<vmem>>, vector<128x128xbf16>
    tpu.vector_store %arg8[%c0_25, %c0_26], %53 {strides = array<i32>} : memref<128x128xbf16, #tpu.memory_space<vmem>>, vector<128x128xbf16>,
    return
  }
  func.func @transform_0(%arg0: i32) -> (i32, i32) {
    %c0_i32 = arith.constant 0 : i32
    %c0_i32_0 = arith.constant 0 : i32
    return %arg0, %c0_i32 : i32, i32
  }
  func.func @transform_1(%arg0: i32) -> (i32, i32) {
    %c0_i32 = arith.constant 0 : i32
    %c0_i32_0 = arith.constant 0 : i32
    %c0_i32_1 = arith.constant 0 : i32
    return %c0_i32, %c0_i32_0 : i32, i32
  }
  func.func @transform_2(%arg0: i32) -> (i32, i32) {
    %c0_i32 = arith.constant 0 : i32
    %c0_i32_0 = arith.constant 0 : i32
    %c0_i32_1 = arith.constant 0 : i32
    return %c0_i32, %c0_i32_0 : i32, i32
  }
  func.func @transform_3(%arg0: i32) -> (i32, i32) {
    %c0_i32 = arith.constant 0 : i32
    %c0_i32_0 = arith.constant 0 : i32
    %c0_i32_1 = arith.constant 0 : i32
    return %c0_i32, %c0_i32_0 : i32, i32
  }
  func.func @transform_4(%arg0: i32) -> (i32, i32) {
    %c0_i32 = arith.constant 0 : i32
    %c0_i32_0 = arith.constant 0 : i32
    %c0_i32_1 = arith.constant 0 : i32
    return %c0_i32, %c0_i32_0 : i32, i32
  }
  func.func @transform_5(%arg0: i32) -> (i32, i32) {
    %c0_i32 = arith.constant 0 : i32
    %c0_i32_0 = arith.constant 0 : i32
    %c0_i32_1 = arith.constant 0 : i32
    return %c0_i32, %c0_i32_0 : i32, i32
  }
  func.func @transform_6(%arg0: i32) -> (i32, i32) {
    %c0_i32 = arith.constant 0 : i32
    %c0_i32_0 = arith.constant 0 : i32
    %c0_i32_1 = arith.constant 0 : i32
    return %c0_i32, %c0_i32_0 : i32, i32
  }
  func.func @transform_7(%arg0: i32) -> (i32, i32) {
    %c0_i32 = arith.constant 0 : i32
    %c0_i32_0 = arith.constant 0 : i32
    return %arg0, %c0_i32 : i32, i32
  }
}

module attributes {stable_mosaic.version = 11 : i64} {
  func.func @_mlp_norm_kernel(%arg0: i32, %arg1: memref<128x256xf32, #tpu.memory_space<vmem>>, %arg2: memref<256x256xbf16, #tpu.memory_space<vmem>>, %arg3: memref<1x256xf32, #tpu.memory_space<vmem>>, %arg4: memref<256x256xbf16, #tpu.memory_space<vmem>>, %arg5: memref<1x256xf32, #tpu.memory_space<vmem>>, %arg6: memref<256x128xbf16, #tpu.memory_space<vmem>>, %arg7: memref<1x128xf32, #tpu.memory_space<vmem>>, %arg8: memref<128x128xbf16, #tpu.memory_space<vmem>>) attributes {dimension_semantics = [#tpu.dimension_semantics<parallel>], iteration_bounds = array<i64: 2>, scalar_prefetch = 0 : i64, scratch_operands = 0 : i64, tpu.core_type = #tpu.core_type<tc>, window_params = [{transform_indices = @transform_0, window_bounds = array<i64: 128, 256>}, {pipeline_mode = #tpu.pipeline_mode<synchronous>, transform_indices = @transform_1, window_bounds = array<i64: 256, 256>}, {pipeline_mode = #tpu.pipeline_mode<synchronous>, transform_indices = @transform_2, window_bounds = array<i64: 1, 256>}, {pipeline_mode = #tpu.pipeline_mode<synchronous>, transform_indices = @transform_3, window_bounds = array<i64: 256, 256>}, {pipeline_mode = #tpu.pipeline_mode<synchronous>, transform_indices = @transform_4, window_bounds = array<i64: 1, 256>}, {pipeline_mode = #tpu.pipeline_mode<synchronous>, transform_indices = @transform_5, window_bounds = array<i64: 256, 128>}, {pipeline_mode = #tpu.pipeline_mode<synchronous>, transform_indices = @transform_6, window_bounds = array<i64: 1, 128>}, {transform_indices = @transform_7, window_bounds = array<i64: 128, 128>}]} {
    %c0 = arith.constant 0 : index
    %c0_0 = arith.constant 0 : index
    %0 = vector.load %arg1[%c0, %c0_0] : memref<128x256xf32, #tpu.memory_space<vmem>>, vector<128x256xf32>
    %1 = arith.truncf %0 : vector<128x256xf32> to vector<128x256xbf16>
    %c0_1 = arith.constant 0 : index
    %c0_2 = arith.constant 0 : index
    %2 = vector.load %arg2[%c0_1, %c0_2] : memref<256x256xbf16, #tpu.memory_space<vmem>>, vector<256x256xbf16>
    %cst = arith.constant dense<0.000000e+00> : vector<128x256xf32>
    %3 = tpu.matmul %1, %2, %cst {dimension_numbers = #tpu.dot_dimension_numbers<[1], [0], [0], [1], [0, 0, 1, 1], [], []>} : vector<128x256xbf16>, vector<256x256xbf16>, vector<128x256xf32> -> vector<128x256xf32>
    %c0_3 = arith.constant 0 : index
    %c0_4 = arith.constant 0 : index
    %4 = vector.load %arg3[%c0_3, %c0_4] : memref<1x256xf32, #tpu.memory_space<vmem>>, vector<1x256xf32>
    %5 = vector.broadcast %4 : vector<1x256xf32> to vector<128x256xf32>
    %6 = arith.addf %3, %5 : vector<128x256xf32>
    %cst_5 = arith.constant 5.000000e-01 : f32
    %7 = vector.broadcast %cst_5 : f32 to vector<128x256xf32>
    %8 = arith.mulf %7, %6 : vector<128x256xf32>
    %cst_6 = arith.constant 4.471500e-02 : f32
    %9 = vector.broadcast %cst_6 : f32 to vector<128x256xf32>
    %10 = arith.mulf %9, %6 : vector<128x256xf32>
    %11 = arith.mulf %10, %6 : vector<128x256xf32>
    %12 = arith.mulf %11, %6 : vector<128x256xf32>
    %13 = arith.addf %6, %12 : vector<128x256xf32>
    %cst_7 = arith.constant 0.797884583 : f32
    %14 = vector.broadcast %cst_7 : f32 to vector<128x256xf32>
    %15 = arith.mulf %14, %13 : vector<128x256xf32>
    %16 = math.tanh %15 : vector<128x256xf32>
    %cst_8 = arith.constant 1.000000e+00 : f32
    %17 = vector.broadcast %cst_8 : f32 to vector<128x256xf32>
    %18 = arith.addf %17, %16 : vector<128x256xf32>
    %19 = arith.mulf %8, %18 : vector<128x256xf32>
    %20 = arith.truncf %19 : vector<128x256xf32> to vector<128x256xbf16>
    %c0_9 = arith.constant 0 : index
    %c0_10 = arith.constant 0 : index
    %21 = vector.load %arg4[%c0_9, %c0_10] : memref<256x256xbf16, #tpu.memory_space<vmem>>, vector<256x256xbf16>
    %cst_11 = arith.constant dense<0.000000e+00> : vector<128x256xf32>
    %22 = tpu.matmul %20, %21, %cst_11 {dimension_numbers = #tpu.dot_dimension_numbers<[1], [0], [0], [1], [0, 0, 1, 1], [], []>} : vector<128x256xbf16>, vector<256x256xbf16>, vector<128x256xf32> -> vector<128x256xf32>
    %c0_12 = arith.constant 0 : index
    %c0_13 = arith.constant 0 : index
    %23 = vector.load %arg5[%c0_12, %c0_13] : memref<1x256xf32, #tpu.memory_space<vmem>>, vector<1x256xf32>
    %24 = vector.broadcast %23 : vector<1x256xf32> to vector<128x256xf32>
    %25 = arith.addf %22, %24 : vector<128x256xf32>
    %cst_14 = arith.constant 5.000000e-01 : f32
    %26 = vector.broadcast %cst_14 : f32 to vector<128x256xf32>
    %27 = arith.mulf %26, %25 : vector<128x256xf32>
    %cst_15 = arith.constant 4.471500e-02 : f32
    %28 = vector.broadcast %cst_15 : f32 to vector<128x256xf32>
    %29 = arith.mulf %28, %25 : vector<128x256xf32>
    %30 = arith.mulf %29, %25 : vector<128x256xf32>
    %31 = arith.mulf %30, %25 : vector<128x256xf32>
    %32 = arith.addf %25, %31 : vector<128x256xf32>
    %cst_16 = arith.constant 0.797884583 : f32
    %33 = vector.broadcast %cst_16 : f32 to vector<128x256xf32>
    %34 = arith.mulf %33, %32 : vector<128x256xf32>
    %35 = math.tanh %34 : vector<128x256xf32>
    %cst_17 = arith.constant 1.000000e+00 : f32
    %36 = vector.broadcast %cst_17 : f32 to vector<128x256xf32>
    %37 = arith.addf %36, %35 : vector<128x256xf32>
    %38 = arith.mulf %27, %37 : vector<128x256xf32>
    %39 = arith.truncf %38 : vector<128x256xf32> to vector<128x256xbf16>
    %c0_18 = arith.constant 0 : index
    %c0_19 = arith.constant 0 : index
    %40 = vector.load %arg6[%c0_18, %c0_19] : memref<256x128xbf16, #tpu.memory_space<vmem>>, vector<256x128xbf16>
    %cst_20 = arith.constant dense<0.000000e+00> : vector<128x128xf32>
    %41 = tpu.matmul %39, %40, %cst_20 {dimension_numbers = #tpu.dot_dimension_numbers<[1], [0], [0], [1], [0, 0, 1, 1], [], []>} : vector<128x256xbf16>, vector<256x128xbf16>, vector<128x128xf32> -> vector<128x128xf32>
    %c0_21 = arith.constant 0 : index
    %c0_22 = arith.constant 0 : index
    %42 = vector.load %arg7[%c0_21, %c0_22] : memref<1x128xf32, #tpu.memory_space<vmem>>, vector<1x128xf32>
    %43 = vector.broadcast %42 : vector<1x128xf32> to vector<128x128xf32>
    %44 = arith.addf %41, %43 : vector<128x128xf32>
    %45 = arith.mulf %44, %44 : vector<128x128xf32>
    %cst_23 = arith.constant dense<0.000000e+00> : vector<128xf32>
    %46 = vector.multi_reduction <add>, %45, %cst_23 [1] : vector<128x128xf32> to vector<128xf32>
    %47 = vector.shape_cast %46 : vector<128xf32> to vector<128x1xf32>
    %cst_24 = arith.constant 1.000000e-24 : f32
    %48 = vector.broadcast %cst_24 : f32 to vector<128x1xf32>
    %49 = arith.maximumf %47, %48 : vector<128x1xf32>
    %50 = math.rsqrt %49 : vector<128x1xf32>
    %51 = vector.broadcast %50 : vector<128x1xf32> to vector<128x128xf32>
    %52 = arith.mulf %44, %51 : vector<128x128xf32>
    %53 = arith.truncf %52 : vector<128x128xf32> to vector<128x128xbf16>
    %c0_25 = arith.constant 0 : index
    %c0_26 = arith.constant 0 : index
    %54 = vector.load %arg8[%c0_25, %c0_26] : memref<128x128xbf16, #tpu.memory_space<vmem>>, vector<128x128xbf16>
    tpu.vector_store %arg8[%c0_25, %c0_26], %53 {strides = array<i32>} : memref<128x128xbf16, #tpu.memory_space<vmem>>, vector<128x128xbf16>,
    return
  }
  func.func @transform_0(%arg0: i32) -> (i32, i32) {
    %c0_i32 = arith.constant 0 : i32
    %c0_i32_0 = arith.constant 0 : i32
    return %arg0, %c0_i32 : i32, i32
  }
  func.func @transform_1(%arg0: i32) -> (i32, i32) {
    %c0_i32 = arith.constant 0 : i32
    %c0_i32_0 = arith.constant 0 : i32
    %c0_i32_1 = arith.constant 0 : i32
    return %c0_i32, %c0_i32_0 : i32, i32
  }
  func.func @transform_2(%arg0: i32) -> (i32, i32) {
    %c0_i32 = arith.constant 0 : i32
    %c0_i32_0 = arith.constant 0 : i32
    %c0_i32_1 = arith.constant 0 : i32
    return %c0_i32, %c0_i32_0 : i32, i32
  }
  func.func @transform_3(%arg0: i32) -> (i32, i32) {
    %c0_i32 = arith.constant 0 : i32
    %c0_i32_0 = arith.constant 0 : i32
    %c0_i32_1 = arith.constant 0 : i32
    return %c0_i32, %c0_i32_0 : i32, i32
  }
  func.func @transform_4(%arg0: i32) -> (i32, i32) {
    %c0_i32 = arith.constant 0 : i32
    %c0_i32_0 = arith.constant 0 : i32
    %c0_i32_1 = arith.constant 0 : i32
    return %c0_i32, %c0_i32_0 : i32, i32
  }
  func.func @transform_5(%arg0: i32) -> (i32, i32) {
    %c0_i32 = arith.constant 0 : i32
    %c0_i32_0 = arith.constant 0 : i32
    %c0_i32_1 = arith.constant 0 : i32
    return %c0_i32, %c0_i32_0 : i32, i32
  }
  func.func @transform_6(%arg0: i32) -> (i32, i32) {
    %c0_i32 = arith.constant 0 : i32
    %c0_i32_0 = arith.constant 0 : i32
    %c0_i32_1 = arith.constant 0 : i32
    return %c0_i32, %c0_i32_0 : i32, i32
  }
  func.func @transform_7(%arg0: i32) -> (i32, i32) {
    %c0_i32 = arith.constant 0 : i32
    %c0_i32_0 = arith.constant 0 : i32
    return %arg0, %c0_i32 : i32, i32
  }
}

</mosaic_0001>

<bundles_post_ra>
// kernel: tpu_custom_call.1
= control target key start
LH: loop header
LB: loop body
LE: loop exit
PB: predicated region body
PF: predicated region fallthrough
CT: control target
= control target key end

     0   :  { %s3963_s0 = inlined_call_operand.hbm [shape: f32[256,256], index: 0, kind: input, shape index: {}]   ;;  %s3964_s1 = inlined_call_operand.hbm [shape: bf16[256,256], index: 1, kind: input, shape index: {}]   ;;  %s3965_s2 = inlined_call_operand.vmem [shape: f32[1,256], index: 2, kind: input, shape index: {}]   ;;  %s3966_s3 = inlined_call_operand.hbm [shape: bf16[256,256], index: 3, kind: input, shape index: {}]   ;;  %s3967_s4 = inlined_call_operand.vmem [shape: f32[1,256], index: 4, kind: input, shape index: {}]   ;;  %s3968_s5 = inlined_call_operand.hbm [shape: bf16[256,128], index: 5, kind: input, shape index: {}]   ;;  %s3969_s6 = inlined_call_operand.vmem [shape: f32[1,128], index: 6, kind: input, shape index: {}]   ;;  %s3970_s7 = inlined_call_operand.hbm [shape: bf16[256,128], index: 7, kind: output, shape index: {}]  }
   0x1   :  { %3975 = sst [smem:[#allocation15_spill]] %s3964_s1 }
   0x2   :  { %12 = vsyncpa [#allocation3], 0 }
   0x3   :  { %14 = vsyncpa [#allocation3 + $0x1], 0 }
   0x4   :  { %15 = vsyncpa [#allocation6], 0 }
   0x5   :  { %16 = vsyncpa [#allocation9], 0 }
   0x6   :  { %17 = vsyncpa [#allocation4], 0 }
   0x7   :  { %19 = vsyncpa [#allocation4 + $0x1], 0  ;;  %s3013_s24 = smov 0   ;;  %s3015_s25 = smov 0  }
   0x8   :  { %s3017_s26 = smov 0   ;;  %s3019_s27 = smov 0  }
   0x9 LB: > { %s3034_s28 = sadd.s32 4294967295, %s2958_s27   ;;  %s2159_s29 = sadd.s32 4294967294, %s2958_s27   ;;  %s2958_s27 = sphi %s3019_s27, %s3996_s27   ;;  %s2954_s26 = sphi %s3017_s26, %s3995_s26   ;;  %s2950_s25 = sphi %s3015_s25, %s3994_s25   ;;  %s2946_s24 = sphi %s3013_s24, %s3993_s24  }
   0xa   : > { %p45_p0 = scmp.ne.s32.totalorder %s2950_s25, %s2946_s24  ;;  %p3971_p1 = scmp.eq.s32.totalorder %s3034_s28, 0 }
   0xb   : > { %p201_p3 = scmp.eq.s32.totalorder %s2159_s29, 1  ;;  %p2160_p5 = scmp.ge.s32.totalorder %s2958_s27, 1 }
   0xc   : > { %p3043_p4 = por %p3971_p1, %p45_p0  ;;  %p208_p7 = scmp.lt.s32.totalorder %s2958_s27, 3 }
   0xd   : > { %p3048_p6 = por %p201_p3, %p45_p0  ;;  %s2960_s10 = smov [#allocation5]  }
   0xe   : > { %s3976_s30 = scalar_select %p3043_p4, 1, 0 }
   0xf   : > { %s3977_s8 = scalar_select %p3048_p6, 1, 0 }
  0x10   : > { %p3053_p8 = pnand %p2160_p5, %p208_p7  ;;  %s220_s11 = sshll.u32 %s2960_s10, 4  ;;  %s221_s11 = int_to_ptr.vmem [resolvable:$true] %s220_s11 }
  0x11   : > { %s2961_s13 = smov [#allocation7]   ;;  %s2962_s15 = smov [#allocation8]  }
  0x12   : > { %s3978_s9 = scalar_select %p3053_p8, 1, 0 }
  0x13   : > { %p2439_p9 = pneg %p3053_p8  ;;  %s236_s14 = sshll.u32 %s2961_s13, 4  ;;  %s237_s14 = int_to_ptr.vmem [resolvable:$true] %s236_s14 }
  0x14   : > { %s252_s16 = sshll.u32 %s2962_s15, 4  ;;  %s2791_s17 = scalar_lea.vmem %s221_s11, 4096  ;;  %s253_s16 = int_to_ptr.vmem [resolvable:$true] %s252_s16 }
  0x15   : > { %p3062_p11 = pnand %p2439_p9, %p3971_p1  ;;  %p2792_p13 = scmp.ne.s32.totalorder %s221_s11, %s2791_s17 }
  0x16   : > { %p2799_p5 = scmp.lt.s32.totalorder %s221_s11, %s221_s11  ;;  %p2800_p7 = scmp.lt.s32.totalorder %s2791_s17, %s2791_s17 }
  0x17   : > { %p2782_p12 = pneg %p3062_p11 }
  0x18   : > { %p2801_p9 = por %p2800_p7, %p2799_p5 }
  0x19   : > { %p2794_p0 = pnand %p2792_p13, %p2782_p12 }
  0x1b   : > { %p2795_p3 = pneg %p2794_p0 }
  0x1d   : > { %p2802_p10 = pnand %p2801_p9, %p2795_p3 }
  0x1f   : > { %2805 = shalt.err (!%p2802_p10)
}
  0x20   : > { %s2963_s18 = smov 128   ;;  %s2964_s19 = smov 8  }
  0x21   : > { %s3980_s1 = sld [smem:[#allocation15_spill]]  ;;  %s2817_s22 = scalar_lea.vmem %s237_s14, 4096 }
  0x22   : > { %p2818_p1 = scmp.ne.s32.totalorder %s237_s14, %s2817_s22  ;;  %p2825_p2 = scmp.lt.s32.totalorder %s237_s14, %s237_s14 }
  0x23   : > { %p2826_p6 = scmp.lt.s32.totalorder %s2817_s22, %s2817_s22 }
  0x24   : > { %p2820_p13 = pnand %p2818_p1, %p2782_p12 }
  0x25   : > { %p2827_p5 = por %p2826_p6, %p2825_p2 }
  0x26   : > { %p2821_p0 = pneg %p2820_p13 }
  0x27   : > { %2442 = dma.hbm_to_vmem [thread:$0]  (!%p3062_p11), %s3980_s1, 4096, %s221_s11, [#allocation6], %s2963_s18, %s2963_s18, %s2964_s19  }
  0x28   : > { %p2828_p3 = pnand %p2827_p5, %p2821_p0 }
  0x2a   : > { %2831 = shalt.err (!%p2828_p3)
}
  0x2b   : > { %2445 = dma.hbm_to_vmem [thread:$0]  (!%p3062_p11), %s3966_s3, 4096, %s237_s14, [#allocation6], %s2963_s18, %s2963_s18, %s2964_s19  }
  0x2c   : > { %s2843_s10 = scalar_lea.vmem %s253_s16, 2048  ;;  %p2851_p9 = scmp.lt.s32.totalorder %s253_s16, %s253_s16 }
  0x2d   : > { %p2844_p10 = scmp.ne.s32.totalorder %s253_s16, %s2843_s10  ;;  %p2852_p13 = scmp.lt.s32.totalorder %s2843_s10, %s2843_s10 }
  0x2f   : > { %p2846_p7 = pnand %p2844_p10, %p2782_p12  ;;  %p2853_p4 = por %p2852_p13, %p2851_p9 }
  0x31   : > { %p2847_p1 = pneg %p2846_p7 }
  0x33   : > { %p2854_p2 = pnand %p2853_p4, %p2847_p1 }
  0x35   : > { %2857 = shalt.err (!%p2854_p2)
}
  0x36   : > { %s2965_s11 = smov 64   ;;  %s2966_s13 = smov 4  }
  0x37   : > { %2448 = dma.hbm_to_vmem [thread:$0]  (!%p3062_p11), %s3968_s5, 2048, %s253_s16, [#allocation9], %s2965_s11, %s2965_s11, %s2966_s13  }
  0x38   : > { %s3093_s17 = sadd.s32 1, %s2958_s27   ;;  %s32_s19 = sadd.s32 1, %s2954_s26 }
  0x39   : > { %s29_s18 = ssub.s32 %s2958_s27, %s3093_s17  ;;  %p39_p6 = scmp.ne.s32.totalorder %s2954_s26, %s2950_s25 }
  0x3a   : > { %p30_p4 = scmp.eq.s32.totalorder %s29_s18, 0  ;;  %p40_p12 = scmp.eq.s32.totalorder %s2958_s27, 0 }
  0x3b   : > { %p2460_p0 = scmp.lt.s32.totalorder %s2958_s27, 2  ;;  %p3981_p3 = scmp.eq.s32.totalorder %s3034_s28, 1 }
  0x3c   : > { %s3103_s20 = scalar_select %p30_p4, %s2954_s26, %s32_s19  }
  0x3d   : > { %p41_p5 = por %p40_p12, %p39_p6  ;;  %p3107_p10 = por %p3981_p3, %p39_p6 }
  0x3e   : > { %s269_s12 = sand.u32 1, %s2954_s26   ;;  %s2278_s22 = sshll.u32 %s2958_s27, 12 }
  0x3f   : > { %s3982_s21 = scalar_select %p3107_p10, 1, 0 }
  0x40   : > { %s2165_s16 = sshll.u32 %s269_s12, 8  ;;  %s3116_s10 = scalar_lea.hbm %s3963_s0, %s2278_s22 }
  0x41   : > { %s273_s11 = scalar_lea.vmem [#allocation2], %s2165_s16  ;;  %p3118_p11 = pnand %p2460_p0, %p41_p5 }
  0x42   : > { %s281_s13 = sshll.u32 %s273_s11, 4  ;;  %s3124_s15 = scalar_lea.sflag [#allocation3], %s269_s12  ;;  %s3122_s13 = int_to_ptr.vmem [resolvable:$true] %s281_s13 }
  0x43   : > { %s2858_s18 = scalar_lea.hbm %s3116_s10, 4096  ;;  %p2860_p1 = pneg %p3118_p11 }
  0x44   : > { %p2859_p7 = scmp.ne.s32.totalorder %s3116_s10, %s2858_s18  ;;  %s2863_s16 = scalar_lea.hbm %s3963_s0, 8192 }
  0x45   : > { %p2864_p2 = scmp.lt.s32.totalorder %s3116_s10, %s3963_s0  ;;  %p2865_p4 = scmp.lt.s32.totalorder %s2863_s16, %s2858_s18 }
  0x46   : > { %p2861_p9 = pnand %p2860_p1, %p2859_p7 }
  0x47   : > { %p2866_p6 = por %p2865_p4, %p2864_p2 }
  0x48   : > { %p2862_p13 = pneg %p2861_p9 }
  0x4a   : > { %p2867_p12 = pnand %p2866_p6, %p2862_p13 }
  0x4c   : > { %2870 = shalt.err (!%p2867_p12)
}
  0x4d   : > { %s2871_s12 = scalar_lea.vmem %s3122_s13, 4096  ;;  %s2967_s11 = smov [#allocation2]  }
  0x4e   : > { %p2872_p0 = scmp.ne.s32.totalorder %s3122_s13, %s2871_s12  ;;  %s2876_s1 = sshll.u32 %s2967_s11, 4  ;;  %s2877_s1 = int_to_ptr.vmem [resolvable:$false] %s2876_s1 }
  0x4f   : > { %s2878_s19 = scalar_lea.vmem %s2877_s1, 8192  ;;  %p2879_p7 = scmp.lt.s32.totalorder %s3122_s13, %s2877_s1 }
  0x50   : > { %p2874_p5 = pnand %p2872_p0, %p2860_p1  ;;  %p2880_p9 = scmp.lt.s32.totalorder %s2878_s19, %s2871_s12 }
  0x52   : > { %p2875_p3 = pneg %p2874_p5  ;;  %p2881_p10 = por %p2880_p9, %p2879_p7 }
  0x54   : > { %p2882_p8 = pnand %p2881_p10, %p2875_p3 }
  0x56   : > { %2885 = shalt.err (!%p2882_p8)
}
  0x57   : > { %s2968_s18 = smov 256   ;;  %s2969_s22 = smov 16  }
  0x58   : > { %2452 = dma.hbm_to_vmem [thread:$0]  (!%p3118_p11), %s3116_s10, 4096, %s3122_s13, %s3124_s15, %s2968_s18, %s2968_s18, %s2969_s22  }
  0x59   : > { %p3984_p1 = scmp.ne.s32.totalorder %s3978_s9, 0 }
  0x5a   : > { %s3148_s16 = sand.u32 (!%p3984_p1), 1, %s2950_s25   ;;  %p3985_p8 = scmp.ne.s32.totalorder (!%p3984_p1), %s3976_s30, 0 }
  0x5b   : > { %293 = sbr.rel (%p3984_p1) target bundleno = 1083 (0x43b), region = 48  ;;  %s2170_s1 = sshll.u32 (!%p3984_p1), %s3148_s16, 8 }
  0x5c   : > { %s296_s23 = scalar_lea.sflag (!%p3984_p1), [#allocation3], %s3148_s16  ;;  %s3152_s29 = scalar_lea.vmem (!%p3984_p1), [#allocation2], %s2170_s1 }
  0x60   : > { %2929 = dma.done.wait (%p3985_p8), %s296_s23, 4096  }
  0x61   : > { %2931 = vsyncadd (%p3985_p8), %s296_s23, 4294963200  ;;  %p3986_p10 = scmp.eq.s32.totalorder %s3034_s28, 0 }
  0x63   : > { %2933 = dma.done.wait (%p3986_p10), [#allocation6], 8192   ;;  %p3987_p11 = pmov %p3986_p10 }
  0x64   : > { %p3988_p13 = pmov %p3986_p10 }
  0x65   : > { %2935 = vsyncadd (%p3987_p11), [#allocation6], 4294959104 }
  0x66   : > { %2937 = dma.done.wait (%p3988_p13), [#allocation9], 2048   ;;  %p3989_p2 = pmov %p3986_p10 }
  0x67   : > { %v2508_v0 = vld [vmem:[#allocation5 + $0x74] ss:$8 sps:$4 sm:$0xff]   ;;  %v2510_v1 = vld [vmem:[#allocation5 + $0x70] ss:$8 sps:$4 sm:$0xff]   ;;  %v2511_v2 = vld [vmem:[#allocation5 + $0x64] ss:$8 sps:$4 sm:$0xff]  }
  0x68   : > { %2939 = vsyncadd (%p3989_p2), [#allocation9], 4294965248  ;;  %597 = vmatprep.subr.bf16.mxu0 %v2508_v0  ;;  %v2513_v3 = vld [vmem:[#allocation5 + $0x60] ss:$8 sps:$4 sm:$0xff]   ;;  %v2514_v4 = vld [vmem:[#allocation5 + $0x54] ss:$8 sps:$4 sm:$0xff]  }
  0x69   : > { %598 = vmatpush1.bf16.msra.mxu0 %v2510_v1  ;;  %v2516_v5 = vld [vmem:[#allocation5 + $0x50] ss:$8 sps:$4 sm:$0xff]   ;;  %v2517_v6 = vld [vmem:[#allocation5 + $0x44] ss:$8 sps:$4 sm:$0xff]   ;;  %v2519_v7 = vld [vmem:[#allocation5 + $0x40] ss:$8 sps:$4 sm:$0xff]  }
  0x6a   : > { %599 = vmatprep.subr.bf16.mxu0 %v2511_v2  ;;  %v2520_v8 = vld [vmem:[#allocation5 + $0x34] ss:$8 sps:$4 sm:$0xff]   ;;  %v2522_v9 = vld [vmem:[#allocation5 + $0x30] ss:$8 sps:$4 sm:$0xff]   ;;  %v2523_v10 = vld [vmem:[#allocation5 + $0x24] ss:$8 sps:$4 sm:$0xff]  }
  0x6b   : > { %v2525_v11 = vld [vmem:[#allocation5 + $0x20] ss:$8 sps:$4 sm:$0xff]   ;;  %v2526_v12 = vld [vmem:[#allocation5 + $0x14] ss:$8 sps:$4 sm:$0xff]   ;;  %v2528_v16 = vld [vmem:[#allocation5 + $0x10] ss:$8 sps:$4 sm:$0xff]  }
  0x6c   : > { %v346_v13 = vld [vmem:[%s3152_s29 + $0x8] sm:$0xff]  ;;  %v348_v14 = vld [vmem:[%s3152_s29 + $0x18] sm:$0xff]  ;;  %v345_v47 = vld [vmem:[%s3152_s29] sm:$0xff]  ;;  %s2174_s12 = sshll.u32 %s3148_s16, 6  ;;  %s2295_s19 = sshll.u32 %s3034_s28, 10 }
  0x6d   : > { %600 = vmatpush1.bf16.msra.mxu0 %v2513_v3  ;;  %v378_v15 = vpack.c.bf16 %v348_v14, %v346_v13  ;;  %v2529_v17 = vld [vmem:[#allocation5 + $0x4] ss:$8 sps:$4 sm:$0xff]   ;;  %v2531_v18 = vld [vmem:[#allocation5] ss:$8 sps:$4 sm:$0xff]   ;;  %v2532_v19 = vld [vmem:[#allocation5 + $0xf4] ss:$8 sps:$4 sm:$0xff]   ;;  %s3917_s23 = scalar_lea.hbm %s3970_s7, %s2295_s19 }
  0x6e   : > { %601 = vmatprep.subr.bf16.mxu0 %v2514_v4  ;;  %v2534_v20 = vld [vmem:[#allocation5 + $0xf0] ss:$8 sps:$4 sm:$0xff]   ;;  %v2535_v21 = vld [vmem:[#allocation5 + $0xe4] ss:$8 sps:$4 sm:$0xff]   ;;  %v2556_v22 = vld [vmem:[#allocation7 + $0x74] ss:$8 sps:$4 sm:$0xff]  }
  0x6f   : > { %629 = vmatprep.mubr.bf16.mxu0 %v378_v15  ;;  %v2558_v23 = vld [vmem:[#allocation7 + $0x70] ss:$8 sps:$4 sm:$0xff]   ;;  %v2537_v24 = vld [vmem:[#allocation5 + $0xe0] ss:$8 sps:$4 sm:$0xff]   ;;  %1218 = vmatprep.subr.bf16.mxu1 %v2556_v22  ;;  %v2559_v25 = vld [vmem:[#allocation7 + $0x64] ss:$8 sps:$4 sm:$0xff]  }
  0x70   : > { %v2538_v26 = vld [vmem:[#allocation5 + $0xd4] ss:$8 sps:$4 sm:$0xff]   ;;  %1219 = vmatpush1.bf16.msra.mxu1 %v2558_v23  ;;  %v2561_v27 = vld [vmem:[#allocation7 + $0x60] ss:$8 sps:$4 sm:$0xff]   ;;  %v2540_v29 = vld [vmem:[#allocation5 + $0xd0] ss:$8 sps:$4 sm:$0xff]  }
  0x71   : > { %602 = vmatpush1.bf16.msra.mxu0 %v2516_v5  ;;  %1220 = vmatprep.subr.bf16.mxu1 %v2559_v25  ;;  %v2562_v28 = vld [vmem:[#allocation7 + $0x54] ss:$8 sps:$4 sm:$0xff]   ;;  %v2541_v30 = vld [vmem:[#allocation5 + $0xc4] ss:$8 sps:$4 sm:$0xff]   ;;  %v2564_v31 = vld [vmem:[#allocation7 + $0x50] ss:$8 sps:$4 sm:$0xff]  }
  0x72   : > { %603 = vmatprep.subr.bf16.mxu0 %v2517_v6  ;;  %v2565_v32 = vld [vmem:[#allocation7 + $0x44] ss:$8 sps:$4 sm:$0xff]   ;;  %v2543_v33 = vld [vmem:[#allocation5 + $0xc0] ss:$8 sps:$4 sm:$0xff]   ;;  %v2544_v35 = vld [vmem:[#allocation5 + $0xb4] ss:$8 sps:$4 sm:$0xff]  }
  0x73   : > { %v2567_v34 = vld [vmem:[#allocation7 + $0x40] ss:$8 sps:$4 sm:$0xff]   ;;  %v2568_v36 = vld [vmem:[#allocation7 + $0x34] ss:$8 sps:$4 sm:$0xff]   ;;  %v2546_v37 = vld [vmem:[#allocation5 + $0xb0] ss:$8 sps:$4 sm:$0xff]  }
  0x74   : > { %1221 = vmatpush1.bf16.msra.mxu1 %v2561_v27  ;;  %v2570_v38 = vld [vmem:[#allocation7 + $0x30] ss:$8 sps:$4 sm:$0xff]   ;;  %v2547_v39 = vld [vmem:[#allocation5 + $0xa4] ss:$8 sps:$4 sm:$0xff]   ;;  %v2549_v41 = vld [vmem:[#allocation5 + $0xa0] ss:$8 sps:$4 sm:$0xff]  }
  0x75   : > { %604 = vmatpush1.bf16.msra.mxu0 %v2519_v7  ;;  %1222 = vmatprep.subr.bf16.mxu1 %v2562_v28  ;;  %v2571_v40 = vld [vmem:[#allocation7 + $0x24] ss:$8 sps:$4 sm:$0xff]   ;;  %v2573_v42 = vld [vmem:[#allocation7 + $0x20] ss:$8 sps:$4 sm:$0xff]   ;;  %v2550_v43 = vld [vmem:[#allocation5 + $0x94] ss:$8 sps:$4 sm:$0xff]  }
  0x76   : > { %605 = vmatprep.subr.bf16.mxu0 %v2520_v8  ;;  %v2552_v44 = vld [vmem:[#allocation5 + $0x90] ss:$8 sps:$4 sm:$0xff]   ;;  %v2553_v45 = vld [vmem:[#allocation5 + $0x84] ss:$8 sps:$4 sm:$0xff]   ;;  %v2555_v46 = vld [vmem:[#allocation5 + $0x80] ss:$8 sps:$4 sm:$0xff]  }
  0x77   : > { %v347_v48 = vld [vmem:[%s3152_s29 + $0x10] sm:$0xff]  ;;  %v350_v49 = vld [vmem:[%s3152_s29 + $0x28] sm:$0xff]  ;;  %v352_v50 = vld [vmem:[%s3152_s29 + $0x38] sm:$0xff]  ;;  %s3889_s11 = scalar_lea.vmem [#allocation10], %s2174_s12  ;;  %p3990_p6 = scmp.ne.s32.totalorder %s3982_s21, 0 }
  0x78   : > { %1223 = vmatpush1.bf16.msra.mxu1 %v2564_v31  ;;  %v377_v51 = vpack.c.bf16 %v347_v48, %v345_v47  ;;  %v380_v52 = vpack.c.bf16 %v352_v50, %v350_v49  ;;  %v349_v53 = vld [vmem:[%s3152_s29 + $0x20] sm:$0xff]  ;;  %v351_v54 = vld [vmem:[%s3152_s29 + $0x30] sm:$0xff]  ;;  %v354_v55 = vld [vmem:[%s3152_s29 + $0x48] sm:$0xff]  ;;  %s2057_s18 = sshll.u32 %s3889_s11, 4  ;;  %s2970_s30 = smov [#allocation10]   ;;  %s3919_s18 = int_to_ptr.vmem [resolvable:$true] %s2057_s18 }
  0x79   : > { %606 = vmatpush1.bf16.msra.mxu0 %v2522_v9  ;;  %1224 = vmatprep.subr.bf16.mxu1 %v2565_v32  ;;  %v356_v56 = vld [vmem:[%s3152_s29 + $0x58] sm:$0xff]  ;;  %v379_v57 = vpack.c.bf16 %v351_v54, %v349_v53  ;;  %v353_v59 = vld [vmem:[%s3152_s29 + $0x40] sm:$0xff]  ;;  %v355_v60 = vld [vmem:[%s3152_s29 + $0x50] sm:$0xff]  ;;  %s2886_s28 = scalar_lea.vmem %s3919_s18, 1024  ;;  %s2890_s9 = sshll.u32 %s2970_s30, 4  ;;  %s2891_s9 = int_to_ptr.vmem [resolvable:$false] %s2890_s9 }
  0x7a   : > { %607 = vmatprep.subr.bf16.mxu0 %v2523_v10  ;;  %v382_v58 = vpack.c.bf16 %v356_v56, %v354_v55  ;;  %v358_v61 = vld [vmem:[%s3152_s29 + $0x68] sm:$0xff]  ;;  %v360_v62 = vld [vmem:[%s3152_s29 + $0x78] sm:$0xff]  ;;  %v381_v63 = vpack.c.bf16 %v355_v60, %v353_v59  ;;  %v357_v1 = vld [vmem:[%s3152_s29 + $0x60] sm:$0xff]  ;;  %p2887_p4 = scmp.ne.s32.totalorder %s3919_s18, %s2886_s28  ;;  %s2892_s10 = scalar_lea.vmem %s2891_s9, 2048 }
  0x7b   : > { %v384_v0 = vpack.c.bf16 %v360_v62, %v358_v61  ;;  %v359_v2 = vld [vmem:[%s3152_s29 + $0x70] sm:$0xff]  ;;  %v362_v3 = vld [vmem:[%s3152_s29 + $0x88] sm:$0xff]  ;;  %v364_v4 = vld [vmem:[%s3152_s29 + $0x98] sm:$0xff]  ;;  %p2893_p5 = scmp.lt.s32.totalorder %s3919_s18, %s2891_s9  ;;  %p2894_p3 = scmp.lt.s32.totalorder %s2892_s10, %s2886_s28 }
  0x7c   : > { %1225 = vmatpush1.bf16.msra.mxu1 %v2567_v34  ;;  %v383_v5 = vpack.c.bf16 %v359_v2, %v357_v1  ;;  %v386_v6 = vpack.c.bf16 %v364_v4, %v362_v3  ;;  %v361_v7 = vld [vmem:[%s3152_s29 + $0x80] sm:$0xff]  ;;  %v363_v8 = vld [vmem:[%s3152_s29 + $0x90] sm:$0xff]  ;;  %v366_v9 = vld [vmem:[%s3152_s29 + $0xa8] sm:$0xff]  ;;  %p2888_p12 = pnand %p2887_p4, %p3990_p6 }
  0x7d   : > { %608 = vmatpush1.bf16.msra.mxu0 %v2525_v11  ;;  %1226 = vmatprep.subr.bf16.mxu1 %v2568_v36  ;;  %v368_v10 = vld [vmem:[%s3152_s29 + $0xb8] sm:$0xff]  ;;  %v385_v11 = vpack.c.bf16 %v363_v8, %v361_v7  ;;  %v365_v13 = vld [vmem:[%s3152_s29 + $0xa0] sm:$0xff]  ;;  %v367_v14 = vld [vmem:[%s3152_s29 + $0xb0] sm:$0xff]  ;;  %p2895_p7 = por %p2894_p3, %p2893_p5 }
  0x7e   : > { %609 = vmatprep.subr.bf16.mxu0 %v2526_v12  ;;  %v388_v12 = vpack.c.bf16 %v368_v10, %v366_v9  ;;  %v370_v15 = vld [vmem:[%s3152_s29 + $0xc8] sm:$0xff]  ;;  %v376_v22 = vld [vmem:[%s3152_s29 + $0xf8] sm:$0xff]  ;;  %v373_v25 = vld [vmem:[%s3152_s29 + $0xe0] sm:$0xff]  ;;  %p2889_p0 = pneg %p2888_p12 }
  0x7f   : > { %v2574_v28 = vld [vmem:[#allocation7 + $0x14] ss:$8 sps:$4 sm:$0xff]   ;;  %v2579_v31 = vld [vmem:[#allocation7] ss:$8 sps:$4 sm:$0xff]   ;;  %v2583_v34 = vld [vmem:[#allocation7 + $0xe4] ss:$8 sps:$4 sm:$0xff]  }
  0x80   : > { %1227 = vmatpush1.bf16.msra.mxu1 %v2570_v38  ;;  %v2580_v32 = vld [vmem:[#allocation7 + $0xf4] ss:$8 sps:$4 sm:$0xff]   ;;  %v2589_v38 = vld [vmem:[#allocation7 + $0xc4] ss:$8 sps:$4 sm:$0xff]   ;;  %v2603_v47 = vld [vmem:[#allocation7 + $0x80] ss:$8 sps:$4 sm:$0xff]   ;;  %p2896_p9 = pnand %p2895_p7, %p2889_p0 }
  0x81   : > { %610 = vmatpush1.bf16.msra.mxu0 %v2528_v16  ;;  %1228 = vmatprep.subr.bf16.mxu1 %v2571_v40  ;;  %v372_v16 = vld [vmem:[%s3152_s29 + $0xd8] sm:$0xff]  ;;  %v3200_v50 = vld [vmem:[#allocation8 + $0x70] sm:$0xff]   ;;  %v425_v54 = vld [vmem:[%s3965_s2] sm:$0x3] }
  0x82   : > { %611 = vmatprep.subr.bf16.mxu0 %v2529_v17  ;;  %v387_v17 = vpack.c.bf16 %v367_v14, %v365_v13  ;;  %v2586_v36 = vld [vmem:[#allocation7 + $0xd4] ss:$8 sps:$4 sm:$0xff]  }
  0x83   : > { %v2592_v40 = vld [vmem:[#allocation7 + $0xb4] ss:$8 sps:$4 sm:$0xff]  }
  0x84   : > { %1229 = vmatpush1.bf16.msra.mxu1 %v2573_v42  ;;  %v2595_v42 = vld [vmem:[#allocation7 + $0xa4] ss:$8 sps:$4 sm:$0xff]   ;;  %v2604_v48 = vld [vmem:[#allocation8 + $0x78] sm:$0xff]  }
  0x85   : > { %612 = vmatpush1.bf16.msra.mxu0 %v2531_v18  ;;  %v390_v18 = vpack.c.bf16 %v372_v16, %v370_v15  ;;  %1230 = vmatprep.subr.bf16.mxu1 %v2574_v28  ;;  %v3198_v49 = vld [vmem:[#allocation8 + $0x38] sm:$0xff]  }
  0x86   : > { %613 = vmatprep.subr.bf16.mxu0 %v2532_v19  ;;  %v369_v19 = vld [vmem:[%s3152_s29 + $0xc0] sm:$0xff] }
  0x89   : > { %614 = vmatpush2.bf16.msra.mxu0 %v2534_v20  ;;  %v371_v20 = vld [vmem:[%s3152_s29 + $0xd0] sm:$0xff] }
  0x8a   : > { %615 = vmatprep.subr.bf16.mxu0 %v2535_v21  ;;  %v374_v21 = vld [vmem:[%s3152_s29 + $0xe8] sm:$0xff]  ;;  %v389_v23 = vpack.c.bf16 %v371_v20, %v369_v19 }
  0x8d   : > { %616 = vmatpush2.bf16.msra.mxu0 %v2537_v24  ;;  %v392_v24 = vpack.c.bf16 %v376_v22, %v374_v21 }
  0x8e   : > { %617 = vmatprep.subr.bf16.mxu0 %v2538_v26  ;;  %v375_v26 = vld [vmem:[%s3152_s29 + $0xf0] sm:$0xff]  ;;  %s2044_s29 = scalar_lea.sflag [#allocation4], %s3148_s16 }
  0x8f   : > { %v391_v27 = vpack.c.bf16 %v375_v26, %v373_v25 }
  0x91   : > { %618 = vmatpush2.bf16.msra.mxu0 %v2540_v29  ;;  %v2576_v29 = vld [vmem:[#allocation7 + $0x10] ss:$8 sps:$4 sm:$0xff]  }
  0x92   : > { %619 = vmatprep.subr.bf16.mxu0 %v2541_v30  ;;  %1231 = vmatpush1.bf16.msra.mxu1 %v2576_v29  ;;  %v2577_v30 = vld [vmem:[#allocation7 + $0x4] ss:$8 sps:$4 sm:$0xff]  }
  0x93   : > { %1232 = vmatprep.subr.bf16.mxu1 %v2577_v30 }
  0x95   : > { %620 = vmatpush2.bf16.msra.mxu0 %v2543_v33  ;;  %v2582_v33 = vld [vmem:[#allocation7 + $0xf0] ss:$8 sps:$4 sm:$0xff]  }
  0x96   : > { %621 = vmatprep.subr.bf16.mxu0 %v2544_v35  ;;  %1233 = vmatpush1.bf16.msra.mxu1 %v2579_v31  ;;  %v2585_v35 = vld [vmem:[#allocation7 + $0xe0] ss:$8 sps:$4 sm:$0xff]  }
  0x97   : > { %1234 = vmatprep.subr.bf16.mxu1 %v2580_v32 }
  0x99   : > { %622 = vmatpush2.bf16.msra.mxu0 %v2546_v37  ;;  %v2588_v37 = vld [vmem:[#allocation7 + $0xd0] ss:$8 sps:$4 sm:$0xff]  }
  0x9a   : > { %623 = vmatprep.subr.bf16.mxu0 %v2547_v39  ;;  %1235 = vmatpush2.bf16.msra.mxu1 %v2582_v33  ;;  %v2591_v39 = vld [vmem:[#allocation7 + $0xc0] ss:$8 sps:$4 sm:$0xff]  }
  0x9b   : > { %1236 = vmatprep.subr.bf16.mxu1 %v2583_v34 }
  0x9d   : > { %624 = vmatpush2.bf16.msra.mxu0 %v2549_v41  ;;  %v2594_v41 = vld [vmem:[#allocation7 + $0xb0] ss:$8 sps:$4 sm:$0xff]  }
  0x9e   : > { %625 = vmatprep.subr.bf16.mxu0 %v2550_v43  ;;  %1237 = vmatpush2.bf16.msra.mxu1 %v2585_v35  ;;  %v2597_v43 = vld [vmem:[#allocation7 + $0xa0] ss:$8 sps:$4 sm:$0xff]  }
  0x9f   : > { %1238 = vmatprep.subr.bf16.mxu1 %v2586_v36 }
  0xa1   : > { %626 = vmatpush2.bf16.msra.mxu0 %v2552_v44  ;;  %v2598_v44 = vld [vmem:[#allocation7 + $0x94] ss:$8 sps:$4 sm:$0xff]  }
  0xa2   : > { %627 = vmatprep.subr.bf16.mxu0 %v2553_v45  ;;  %1239 = vmatpush2.bf16.msra.mxu1 %v2588_v37  ;;  %v2600_v45 = vld [vmem:[#allocation7 + $0x90] ss:$8 sps:$4 sm:$0xff]  }
  0xa3   : > { %1240 = vmatprep.subr.bf16.mxu1 %v2589_v38 }
  0xa5   : > { %628 = vmatpush2.bf16.msra.mxu0 %v2555_v46  ;;  %v2601_v46 = vld [vmem:[#allocation7 + $0x84] ss:$8 sps:$4 sm:$0xff]  }
  0xa6   : > { %1241 = vmatpush2.bf16.msra.mxu1 %v2591_v39  ;;  %2343 = vmatprep.subr.bf16.mxu0 %v2604_v48 }
  0xa7   : > { %1242 = vmatprep.subr.bf16.mxu1 %v2592_v40 }
  0xa8   : > { %630 = vmatmul.mubr.bf16.vlgmr.msra.gmra.mxu0 %v377_v51  ;;  %v427_v51 = vlaneseq }
  0xa9   : > { %639 = vmatprep.mubr.bf16.mxu0 %v380_v52  ;;  %2344 = vmatpush3.bf16.msra.mxu0 %v3198_v49 }
  0xaa   : > { %1243 = vmatpush2.bf16.msra.mxu1 %v2594_v41  ;;  %2345 = vmatprep.subr.bf16.mxu0 %v3200_v50  ;;  %v3204_v52 = vshrl.u32 %v427_v51, 7 }
  0xab   : > { %1244 = vmatprep.subr.bf16.mxu1 %v2595_v42 }
  0xac   : > { %v429_v53 = vsub.s32 0, %v3204_v52  ;;  %v433_v55 = vsub.s32 1, %v3204_v52 }
  0xae   : > { %1245 = vmatpush2.bf16.msra.mxu1 %v2597_v43  ;;  %v3213_v56 = vrot.slane %v425_v54, %v429_v53 }
  0xaf   : > { %1246 = vmatprep.subr.bf16.mxu1 %v2598_v44 }
  0xb0   : > { %640 = vmatmul.mubr.bf16.gmra.mxu0 %v379_v57  ;;  %v3217_v57 = vrot.slane %v425_v54, %v433_v55 }
  0xb1   : > { %649 = vmatprep.mubr.bf16.mxu0 %v382_v58 }
  0xb2   : > { %1247 = vmatpush2.bf16.msra.mxu1 %v2600_v45 }
  0xb3   : > { %1248 = vmatprep.subr.bf16.mxu1 %v2601_v46 }
  0xb6   : > { %1249 = vmatpush2.bf16.msra.mxu1 %v2603_v47 }
  0xb7   : > { %2407 = vmatprep.subr.bf16.mxu1 %v2604_v48 }
  0xb8   : > { %650 = vmatmul.mubr.bf16.gmra.mxu0 %v381_v63 }
  0xb9   : > { %659 = vmatprep.mubr.bf16.mxu0 %v384_v0 }
  0xc0   : > { %660 = vmatmul.mubr.bf16.gmra.mxu0 %v383_v5 }
  0xc1   : > { %669 = vmatprep.mubr.bf16.mxu0 %v386_v6 }
  0xc8   : > { %670 = vmatmul.mubr.bf16.gmra.mxu0 %v385_v11 }
  0xc9   : > { %679 = vmatprep.mubr.bf16.mxu0 %v388_v12 }
  0xd0   : > { %680 = vmatmul.mubr.bf16.gmra.mxu0 %v387_v17 }
  0xd1   : > { %689 = vmatprep.mubr.bf16.mxu0 %v390_v18 }
  0xd8   : > { %690 = vmatmul.mubr.bf16.gmra.mxu0 %v389_v23 }
  0xd9   : > { %699 = vmatprep.mubr.bf16.mxu0 %v392_v24 }
  0xe0   : > { %700 = vmatmul.mubr.bf16.gmra.mxu0 %v391_v27 }
 0x168   : > { %v631_v58 = vpop.f32.mrf.mxu0 }
 0x169   : > { %v3220_v59 = vadd.f32 %v631_v58, %v3213_v56 }
 0x16a   : > { %v633_v60 = vpop.f32.mrf.mxu0 }
 0x16b   : > { %v742_v61 = vmul.f32 0.044715, %v3220_v59  ;;  %v3224_v62 = vadd.f32 %v633_v60, %v3217_v57 }
 0x16c   : > { %v635_v63 = vpop.f32.mrf.mxu0 }
 0x16d   : > { %v774_v0 = vmul.f32 %v742_v61, %v3220_v59  ;;  %v743_v1 = vmul.f32 0.044715, %v3224_v62  ;;  %v3229_v2 = vadd.f32 %v635_v63, %v3213_v56 }
 0x16e   : > { %v637_v3 = vpop.f32.mrf.mxu0 }
 0x16f   : > { %v806_v4 = vmul.f32 %v774_v0, %v3220_v59  ;;  %v744_v5 = vmul.f32 0.044715, %v3229_v2  ;;  %v3234_v6 = vadd.f32 %v637_v3, %v3217_v57  ;;  %v775_v7 = vmul.f32 %v743_v1, %v3224_v62 }
 0x170   : > { %v641_v8 = vpop.f32.mrf.mxu0 }
 0x171   : > { %v776_v9 = vmul.f32 %v744_v5, %v3229_v2  ;;  %v745_v10 = vmul.f32 0.044715, %v3234_v6  ;;  %v3240_v11 = vadd.f32 %v641_v8, %v3213_v56  ;;  %v807_v13 = vmul.f32 %v775_v7, %v3224_v62 }
 0x172   : > { %v643_v12 = vpop.f32.mrf.mxu0  ;;  %v838_v14 = vadd.f32 %v806_v4, %v3220_v59 }
 0x173   : > { %v808_v15 = vmul.f32 %v776_v9, %v3229_v2  ;;  %v746_v16 = vmul.f32 0.044715, %v3240_v11  ;;  %v3247_v17 = vadd.f32 %v643_v12, %v3217_v57  ;;  %v777_v18 = vmul.f32 %v745_v10, %v3234_v6 }
 0x174   : > { %v645_v19 = vpop.f32.mrf.mxu0  ;;  %v839_v20 = vadd.f32 %v807_v13, %v3224_v62  ;;  %v870_v21 = vmul.f32 0.7978846, %v838_v14 }
 0x175   : > { %v778_v22 = vmul.f32 %v746_v16, %v3240_v11  ;;  %v747_v23 = vmul.f32 0.044715, %v3247_v17  ;;  %v3254_v24 = vadd.f32 %v645_v19, %v3213_v56  ;;  %v809_v25 = vmul.f32 %v777_v18, %v3234_v6 }
 0x176   : > { %v647_v26 = vpop.f32.mrf.mxu0  ;;  %v871_v27 = vmul.f32 0.7978846, %v839_v20  ;;  %v840_v28 = vadd.f32 %v808_v15, %v3229_v2  ;;  %2620 = vtanh.f32 %v870_v21  ;;  %v711_v16 = vmul.f32 0.5, %v3224_v62 }
 0x177   : > { %v810_v29 = vmul.f32 %v778_v22, %v3240_v11  ;;  %v779_v30 = vmul.f32 %v747_v23, %v3247_v17  ;;  %v748_v31 = vmul.f32 0.044715, %v3254_v24  ;;  %v3262_v32 = vadd.f32 %v647_v26, %v3217_v57 }
 0x178   : > { %v651_v33 = vpop.f32.mrf.mxu0  ;;  %v841_v34 = vadd.f32 %v809_v25, %v3234_v6  ;;  %2622 = vtanh.f32 %v871_v27  ;;  %v872_v35 = vmul.f32 0.7978846, %v840_v28  ;;  %v710_v18 = vmul.f32 0.5, %v3220_v59 }
 0x179   : > { %v811_v36 = vmul.f32 %v779_v30, %v3247_v17  ;;  %v780_v37 = vmul.f32 %v748_v31, %v3254_v24  ;;  %v749_v38 = vmul.f32 0.044715, %v3262_v32  ;;  %v3269_v39 = vadd.f32 %v651_v33, %v3213_v56 }
 0x17a   : > { %v653_v40 = vpop.f32.mrf.mxu0  ;;  %v873_v41 = vmul.f32 0.7978846, %v841_v34  ;;  %2624 = vtanh.f32 %v872_v35  ;;  %v842_v42 = vadd.f32 %v810_v29, %v3240_v11  ;;  %v712_v25 = vmul.f32 0.5, %v3229_v2 }
 0x17b   : > { %v812_v43 = vmul.f32 %v780_v37, %v3254_v24  ;;  %v781_v44 = vmul.f32 %v749_v38, %v3262_v32  ;;  %v750_v45 = vmul.f32 0.044715, %v3269_v39  ;;  %v3276_v46 = vadd.f32 %v653_v40, %v3217_v57 }
 0x17c   : > { %v655_v47 = vpop.f32.mrf.mxu0  ;;  %2626 = vtanh.f32 %v873_v41  ;;  %v843_v48 = vadd.f32 %v811_v36, %v3247_v17  ;;  %v874_v51 = vmul.f32 0.7978846, %v842_v42  ;;  %v713_v62 = vmul.f32 0.5, %v3234_v6 }
 0x17d   : > { %v813_v54 = vmul.f32 %v781_v44, %v3262_v32  ;;  %v782_v58 = vmul.f32 %v750_v45, %v3269_v39  ;;  %v751_v60 = vmul.f32 0.044715, %v3276_v46  ;;  %v3283_v61 = vadd.f32 %v655_v47, %v3213_v56 }
 0x17e   : > { %v657_v63 = vpop.f32.mrf.mxu0  ;;  %v875_v0 = vmul.f32 0.7978846, %v843_v48  ;;  %v844_v1 = vadd.f32 %v812_v43, %v3254_v24  ;;  %2628 = vtanh.f32 %v874_v51  ;;  %v3311_v30 = vmul.f32 0.5, %v3247_v17 }
 0x17f   : > { %v783_v3 = vmul.f32 %v751_v60, %v3276_v46  ;;  %v752_v4 = vmul.f32 0.044715, %v3283_v61  ;;  %v3289_v5 = vadd.f32 %v657_v63, %v3217_v57  ;;  %v845_v8 = vadd.f32 %v813_v54, %v3262_v32 }
 0x180   : > { %v661_v7 = vpop.f32.mrf.mxu0  ;;  %2630 = vtanh.f32 %v875_v0  ;;  %v876_v9 = vmul.f32 0.7978846, %v844_v1  ;;  %v814_v10 = vmul.f32 %v782_v58, %v3269_v39  ;;  %v3314_v31 = vmul.f32 0.5, %v3240_v11 }
 0x181   : > { %v815_v12 = vmul.f32 %v783_v3, %v3276_v46  ;;  %v784_v13 = vmul.f32 %v752_v4, %v3283_v61  ;;  %v753_v14 = vmul.f32 0.044715, %v3289_v5  ;;  %v877_v19 = vmul.f32 0.7978846, %v845_v8 }
 0x182   : > { %v663_v15 = vpop.f32.mrf.mxu0  ;;  %2632 = vtanh.f32 %v876_v9  ;;  %v3300_v22 = vadd.f32 %v661_v7, %v3213_v56  ;;  %v846_v33 = vadd.f32 %v814_v10, %v3269_v39  ;;  %v3322_v35 = vmul.f32 0.5, %v3254_v24 }
 0x183   : > { %v2621_v20 = vpop.eup %2620  ;;  %v785_v21 = vmul.f32 %v753_v14, %v3289_v5  ;;  %v3303_v23 = vadd.f32 %v663_v15, %v3217_v57  ;;  %v816_v26 = vmul.f32 %v784_v13, %v3283_v61  ;;  %2634 = vtanh.f32 %v877_v19 }
 0x184   : > { %v665_v27 = vpop.f32.mrf.mxu0  ;;  %v847_v59 = vadd.f32 %v815_v12, %v3276_v46  ;;  %v754_v38 = vmul.f32 0.044715, %v3300_v22  ;;  %v3329_v40 = vmul.f32 0.5, %v3262_v32  ;;  %v934_v47 = vadd.f32 1.0, %v2621_v20 }
 0x185   : > { %v2623_v28 = vpop.eup %2622  ;;  %v817_v29 = vmul.f32 %v785_v21, %v3289_v5  ;;  %v755_v2 = vmul.f32 0.044715, %v3303_v23  ;;  %v3319_v34 = vadd.f32 %v665_v27, %v3213_v56  ;;  %v848_v44 = vadd.f32 %v816_v26, %v3283_v61 }
 0x186   : > { %v667_v6 = vpop.f32.mrf.mxu0  ;;  %v879_v36 = vmul.f32 0.7978846, %v847_v59  ;;  %v935_v11 = vadd.f32 1.0, %v2623_v28  ;;  %v3335_v48 = vmul.f32 0.5, %v3269_v39  ;;  %v878_v51 = vmul.f32 0.7978846, %v846_v33 }
 0x187   : > { %v2625_v37 = vpop.eup %2624  ;;  %v3326_v17 = vadd.f32 %v667_v6, %v3217_v57  ;;  %v849_v43 = vadd.f32 %v817_v29, %v3289_v5  ;;  %v787_v54 = vmul.f32 %v755_v2, %v3303_v23  ;;  %v756_v32 = vmul.f32 0.044715, %v3319_v34 }
 0x188   : > { %v671_v41 = vpop.f32.mrf.mxu0  ;;  %v936_v42 = vadd.f32 1.0, %v2625_v37  ;;  %2636 = vtanh.f32 %v879_v36  ;;  %v967_v1 = vmul.f32 %v935_v11, %v711_v16  ;;  %v3343_v4 = vmul.f32 0.5, %v3276_v46 }
 0x189   : > { %v2627_v24 = vpop.eup %2626  ;;  %v757_v45 = vmul.f32 0.044715, %v3326_v17  ;;  %v881_v63 = vmul.f32 0.7978846, %v849_v43  ;;  %v3340_v0 = vadd.f32 %v671_v41, %v3213_v56  ;;  %v880_v10 = vmul.f32 0.7978846, %v848_v44 }
 0x18a   : > { %v673_v58 = vpop.f32.mrf.mxu0  ;;  %v937_v60 = vadd.f32 1.0, %v2627_v24  ;;  %v968_v3 = vmul.f32 %v936_v42, %v712_v25  ;;  %v786_v13 = vmul.f32 %v754_v38, %v3300_v22  ;;  %v966_v16 = vmul.f32 %v934_v47, %v710_v18 }
 0x18b   : > { %v2629_v7 = vpop.eup %2628  ;;  %v789_v39 = vmul.f32 %v757_v45, %v3326_v17  ;;  %2638 = vtanh.f32 %v881_v63  ;;  %v3348_v14 = vadd.f32 %v673_v58, %v3217_v57  ;;  %v819_v46 = vmul.f32 %v787_v54, %v3303_v23 }
 0x18c   : > { %v675_v8 = vpop.f32.mrf.mxu0  ;;  %v969_v9 = vmul.f32 %v937_v60, %v713_v62  ;;  %v788_v19 = vmul.f32 %v756_v32, %v3319_v34  ;;  %2640 = vtanh.f32 %v878_v51  ;;  %v758_v26 = vmul.f32 0.044715, %v3340_v0 }
 0x18d   : > { %v2631_v12 = vpop.eup %2630  ;;  %v3351_v15 = vadd.f32 %v675_v8, %v3213_v56  ;;  %v998_v62 = vpack.c.bf16 %v968_v3, %v966_v16  ;;  %v938_v59 = vadd.f32 1.0, %v2629_v7  ;;  %v821_v28 = vmul.f32 %v789_v39, %v3326_v17 }
 0x18e   : > { %v677_v20 = vpop.f32.mrf.mxu0  ;;  %v999_v21 = vpack.c.bf16 %v969_v9, %v967_v1  ;;  %v939_v18 = vadd.f32 1.0, %v2631_v12  ;;  %2642 = vtanh.f32 %v880_v10  ;;  %v759_v6 = vmul.f32 0.044715, %v3348_v14 }
 0x18f   : > { %v2633_v25 = vpop.eup %2632  ;;  %v3357_v27 = vadd.f32 %v677_v20, %v3217_v57  ;;  %v760_v36 = vmul.f32 0.044715, %v3351_v15  ;;  %v3366_v38 = vmul.f32 0.5, %v3283_v61  ;;  %v818_v11 = vmul.f32 %v786_v13, %v3300_v22 }
 0x190   : > { %1250 = vmatprep.mubr.bf16.mxu1 %v999_v21  ;;  %v681_v29 = vpop.f32.mrf.mxu0  ;;  %v940_v33 = vadd.f32 1.0, %v2633_v25  ;;  %v2635_v2 = vpop.eup %2634  ;;  %v851_v44 = vadd.f32 %v819_v46, %v3303_v23  ;;  %v820_v24 = vmul.f32 %v788_v19, %v3319_v34  ;;  %v790_v45 = vmul.f32 %v758_v26, %v3340_v0 }
 0x191   : > { %v3363_v37 = vadd.f32 %v681_v29, %v3213_v56  ;;  %1251 = vmatmul.mubr.bf16.vlgmr.msra.gmra.mxu1 %v998_v62  ;;  %v761_v41 = vmul.f32 0.044715, %v3357_v27  ;;  %v941_v43 = vadd.f32 1.0, %v2635_v2  ;;  %v970_v47 = vmul.f32 %v938_v59, %v3314_v31 }
 0x192   : > { %v683_v42 = vpop.f32.mrf.mxu0  ;;  %2415 = vmatpush3.bf16.msra.mxu1 %v3198_v49  ;;  %v972_v51 = vmul.f32 %v940_v33, %v3322_v35  ;;  %v971_v54 = vmul.f32 %v939_v18, %v3311_v30  ;;  %v853_v58 = vadd.f32 %v821_v28, %v3326_v17  ;;  %v883_v60 = vmul.f32 0.7978846, %v851_v44 }
 0x193   : > { %2408 = vmatprep.subr.bf16.mxu1 %v3200_v50  ;;  %v973_v32 = vmul.f32 %v941_v43, %v3329_v40  ;;  %v791_v49 = vmul.f32 %v759_v6, %v3348_v14  ;;  %v792_v1 = vmul.f32 %v760_v36, %v3351_v15  ;;  %v762_v3 = vmul.f32 0.044715, %v3363_v37 }
 0x194   : > { %v685_v61 = vpop.f32.mrf.mxu0  ;;  %v3384_v31 = vadd.f32 %v683_v42, %v3217_v57  ;;  %v793_v50 = vmul.f32 %v761_v41, %v3357_v27  ;;  %v885_v30 = vmul.f32 0.7978846, %v853_v58  ;;  %2644 = vtanh.f32 %v883_v60 }
 0x195   : > { %v2637_v63 = vpop.eup %2636  ;;  %v1001_v7 = vpack.c.bf16 %v973_v32, %v971_v54  ;;  %v3388_v40 = vadd.f32 %v685_v61, %v3213_v56  ;;  %v1000_v8 = vpack.c.bf16 %v972_v51, %v970_v47  ;;  %v3394_v10 = vmul.f32 %v790_v45, %v3340_v0 }
 0x196   : > { %v687_v35 = vpop.f32.mrf.mxu0  ;;  %v943_v9 = vadd.f32 1.0, %v2637_v63  ;;  %v721_v13 = vmul.f32 0.5, %v3289_v5  ;;  %v3398_v16 = vmul.f32 0.5, %v3303_v23  ;;  %2646 = vtanh.f32 %v885_v30 }
 0x197   : > { %v3391_v39 = vadd.f32 %v687_v35, %v3217_v57  ;;  %1260 = vmatprep.mubr.bf16.mxu1 %v1001_v7  ;;  %v823_v19 = vmul.f32 %v791_v49, %v3348_v14  ;;  %v794_v20 = vmul.f32 %v762_v3, %v3363_v37  ;;  %v763_v21 = vmul.f32 0.044715, %v3384_v31 }
 0x198   : > { %v691_v12 = vpop.f32.mrf.mxu0  ;;  %v2639_v46 = vpop.eup %2638  ;;  %v3404_v25 = vmul.f32 0.5, %v3326_v17  ;;  %v3407_v26 = vmul.f32 %v792_v1, %v3351_v15  ;;  %v850_v23 = vadd.f32 %v818_v11, %v3300_v22  ;;  %v852_v59 = vadd.f32 %v820_v24, %v3319_v34 }
 0x199   : > { %1261 = vmatmul.mubr.bf16.gmra.mxu1 %v1000_v8  ;;  %v945_v5 = vadd.f32 1.0, %v2639_v46  ;;  %v2641_v28 = vpop.eup %2640  ;;  %v825_v29 = vmul.f32 %v793_v50, %v3357_v27  ;;  %v764_v18 = vmul.f32 0.044715, %v3388_v40  ;;  %v765_v33 = vmul.f32 0.044715, %v3391_v39 }
 0x19a   : > { %v693_v62 = vpop.f32.mrf.mxu0  ;;  %v975_v2 = vmul.f32 %v943_v9, %v3343_v4  ;;  %v942_v36 = vadd.f32 1.0, %v2641_v28  ;;  %v882_v41 = vmul.f32 0.7978846, %v850_v23  ;;  %v884_v42 = vmul.f32 0.7978846, %v852_v59 }
 0x19b   : > { %v977_v6 = vmul.f32 %v945_v5, %v721_v13  ;;  %v2643_v43 = vpop.eup %2642  ;;  %v3416_v44 = vmul.f32 %v794_v20, %v3363_v37  ;;  %v795_v11 = vmul.f32 %v763_v21, %v3384_v31  ;;  %v3420_v24 = vadd.f32 %v691_v12, %v3213_v56 }
 0x19c   : > { %v695_v17 = vpop.f32.mrf.mxu0  ;;  %v3423_v45 = vmul.f32 0.5, %v3300_v22  ;;  %v3426_v47 = vadd.f32 %v693_v62, %v3217_v57  ;;  %v944_v61 = vadd.f32 1.0, %v2643_v43  ;;  %2648 = vtanh.f32 %v882_v41 }
 0x19d   : > { %v1003_v51 = vpack.c.bf16 %v977_v6, %v975_v2  ;;  %v796_v54 = vmul.f32 %v764_v18, %v3388_v40  ;;  %v797_v32 = vmul.f32 %v765_v33, %v3391_v39  ;;  %v3431_v58 = vadd.f32 %v695_v17, %v3213_v56 }
 0x19e   : > { %v697_v4 = vpop.f32.mrf.mxu0  ;;  %v974_v63 = vmul.f32 %v942_v36, %v3335_v48  ;;  %v976_v49 = vmul.f32 %v944_v61, %v3366_v38  ;;  %2650 = vtanh.f32 %v884_v42  ;;  %v855_v1 = vadd.f32 %v823_v19, %v3348_v14 }
 0x19f   : > { %v3434_v60 = vadd.f32 %v697_v4, %v3217_v57  ;;  %1270 = vmatprep.mubr.bf16.mxu1 %v1003_v51  ;;  %v827_v3 = vmul.f32 %v795_v11, %v3384_v31  ;;  %v766_v50 = vmul.f32 0.044715, %v3420_v24  ;;  %v3442_v35 = vmul.f32 0.5, %v3319_v34 }
 0x1a0   : > { %v701_v22 = vpop.f32.mrf.mxu0  ;;  %v3445_v7 = vmul.f32 0.5, %v3348_v14  ;;  %v767_v30 = vmul.f32 0.044715, %v3426_v47  ;;  %v1002_v8 = vpack.c.bf16 %v976_v49, %v974_v63  ;;  %v857_v48 = vadd.f32 %v825_v29, %v3357_v27 }
 0x1a1   : > { %v887_v38 = vmul.f32 0.7978846, %v855_v1  ;;  %v2645_v12 = vpop.eup %2644  ;;  %v828_v13 = vmul.f32 %v796_v54, %v3388_v40  ;;  %v768_v46 = vmul.f32 0.044715, %v3431_v58  ;;  %v769_v19 = vmul.f32 0.044715, %v3434_v60 }
 0x1a2   : > { %v703_v9 = vpop.f32.mrf.mxu0  ;;  %v829_v14 = vmul.f32 %v797_v32, %v3391_v39  ;;  %1271 = vmatmul.mubr.bf16.gmra.mxu1 %v1002_v8  ;;  %v947_v21 = vadd.f32 1.0, %v2645_v12  ;;  %v889_v62 = vmul.f32 0.7978846, %v857_v48  ;;  %v798_v23 = vmul.f32 %v766_v50, %v3420_v24 }
 0x1a3   : > { %v3453_v34 = vadd.f32 %v703_v9, %v3217_v57  ;;  %2652 = vtanh.f32 %v887_v38  ;;  %v2647_v5 = vpop.eup %2646  ;;  %v3458_v59 = vadd.f32 %v701_v22, %v3213_v56  ;;  %v799_v18 = vmul.f32 %v767_v30, %v3426_v47 }
 0x1a4   : > { %v705_v20 = vpop.f32.mrf.mxu0  ;;  %v949_v2 = vadd.f32 1.0, %v2647_v5  ;;  %2654 = vtanh.f32 %v889_v62  ;;  %v854_v17 = vadd.f32 %v3394_v10, %v3340_v0  ;;  %v800_v6 = vmul.f32 %v768_v46, %v3431_v58 }
 0x1a5   : > { %v771_v28 = vmul.f32 0.044715, %v3453_v34  ;;  %v3462_v29 = vadd.f32 %v705_v20, %v3213_v56  ;;  %v801_v36 = vmul.f32 %v769_v19, %v3434_v60  ;;  %v979_v56 = vmul.f32 %v947_v21, %v3398_v16 }
 0x1a6   : > { %v707_v33 = vpop.f32.mrf.mxu0  ;;  %v981_v43 = vmul.f32 %v949_v2, %v3404_v25  ;;  %v856_v11 = vadd.f32 %v3407_v26, %v3351_v15  ;;  %v886_v4 = vmul.f32 0.7978846, %v854_v17  ;;  %v830_v51 = vmul.f32 %v798_v23, %v3420_v24 }
 0x1a7   : > { %v772_v41 = vmul.f32 0.044715, %v3462_v29  ;;  %v3471_v42 = vadd.f32 %v707_v33, %v3217_v57  ;;  %v770_v10 = vmul.f32 0.044715, %v3458_v59  ;;  %v803_v61 = vmul.f32 %v771_v28, %v3453_v34 }
 0x1a8   : > { %v1005_v32 = vpack.c.bf16 %v981_v43, %v979_v56  ;;  %v888_v22 = vmul.f32 0.7978846, %v856_v11  ;;  %2656 = vtanh.f32 %v886_v4  ;;  %v859_v57 = vadd.f32 %v827_v3, %v3384_v31 }
 0x1a9   : > { %v773_v54 = vmul.f32 0.044715, %v3471_v42  ;;  %v2649_v16 = vpop.eup %2648  ;;  %v831_v25 = vmul.f32 %v799_v18, %v3426_v47  ;;  %v832_v63 = vmul.f32 %v800_v6, %v3431_v58  ;;  %v804_v26 = vmul.f32 %v772_v41, %v3462_v29 }
 0x1aa   : > { %v861_v49 = vadd.f32 %v829_v14, %v3391_v39  ;;  %v833_v1 = vmul.f32 %v801_v36, %v3434_v60  ;;  %1280 = vmatprep.mubr.bf16.mxu1 %v1005_v32  ;;  %v946_v50 = vadd.f32 1.0, %v2649_v16  ;;  %2658 = vtanh.f32 %v888_v22 }
 0x1ab   : > { %v891_v30 = vmul.f32 0.7978846, %v859_v57  ;;  %v2651_v8 = vpop.eup %2650  ;;  %v805_v9 = vmul.f32 %v773_v54, %v3471_v42  ;;  %v858_v3 = vadd.f32 %v3416_v44, %v3363_v37  ;;  %v860_v38 = vadd.f32 %v828_v13, %v3388_v40 }
 0x1ac   : > { %v893_v48 = vmul.f32 0.7978846, %v861_v49  ;;  %v802_v12 = vmul.f32 %v770_v10, %v3458_v59  ;;  %v835_v46 = vmul.f32 %v803_v61, %v3453_v34  ;;  %v948_v19 = vadd.f32 1.0, %v2651_v8 }
 0x1ad   : > { %2660 = vtanh.f32 %v891_v30  ;;  %v836_v14 = vmul.f32 %v804_v26, %v3462_v29  ;;  %v890_v20 = vmul.f32 0.7978846, %v858_v3  ;;  %v892_v21 = vmul.f32 0.7978846, %v860_v38 }
 0x1ae   : > { %2662 = vtanh.f32 %v893_v48  ;;  %v978_v62 = vmul.f32 %v946_v50, %v3423_v45  ;;  %v980_v5 = vmul.f32 %v948_v19, %v3442_v35  ;;  %v863_v23 = vadd.f32 %v831_v25, %v3426_v47 }
 0x1af   : > { %v865_v44 = vadd.f32 %v833_v1, %v3434_v60  ;;  %v837_v28 = vmul.f32 %v805_v9, %v3471_v42  ;;  %2664 = vtanh.f32 %v890_v20  ;;  %v862_v18 = vadd.f32 %v830_v51, %v3420_v24 }
 0x1b0   : > { %v2653_v13 = vpop.eup %2652  ;;  %v864_v33 = vadd.f32 %v832_v63, %v3431_v58  ;;  %v1004_v2 = vpack.c.bf16 %v980_v5, %v978_v62  ;;  %2666 = vtanh.f32 %v892_v21  ;;  %v895_v6 = vmul.f32 0.7978846, %v863_v23 }
 0x1b1   : > { %v951_v17 = vadd.f32 1.0, %v2653_v13  ;;  %v2655_v36 = vpop.eup %2654  ;;  %v897_v45 = vmul.f32 0.7978846, %v865_v44  ;;  %v894_v41 = vmul.f32 0.7978846, %v862_v18  ;;  %v867_v56 = vadd.f32 %v835_v46, %v3453_v34 }
 0x1b2   : > { %v896_v35 = vmul.f32 0.7978846, %v864_v33  ;;  %v834_v43 = vmul.f32 %v802_v12, %v3458_v59  ;;  %1281 = vmatmul.mubr.bf16.gmra.mxu1 %v1004_v2  ;;  %v729_v11 = vmul.f32 0.5, %v3357_v27  ;;  %v953_v4 = vadd.f32 1.0, %v2655_v36 }
 0x1b3   : > { %2668 = vtanh.f32 %v895_v6  ;;  %v869_v51 = vadd.f32 %v837_v28, %v3471_v42  ;;  %v899_v10 = vmul.f32 0.7978846, %v867_v56  ;;  %v983_v61 = vmul.f32 %v951_v17, %v3445_v7 }
 0x1b4   : > { %2670 = vtanh.f32 %v897_v45  ;;  %v985_v54 = vmul.f32 %v953_v4, %v729_v11  ;;  %v868_v57 = vadd.f32 %v836_v14, %v3462_v29  ;;  %v866_v27 = vadd.f32 %v834_v43, %v3458_v59 }
 0x1b5   : > { %2672 = vtanh.f32 %v894_v41  ;;  %v2657_v32 = vpop.eup %2656  ;;  %v901_v22 = vmul.f32 0.7978846, %v869_v51  ;;  %v726_v26 = vmul.f32 0.5, %v3340_v0  ;;  %v728_v49 = vmul.f32 0.5, %v3351_v15 }
 0x1b6   : > { %2674 = vtanh.f32 %v896_v35  ;;  %v1007_v16 = vpack.c.bf16 %v985_v54, %v983_v61  ;;  %v950_v25 = vadd.f32 1.0, %v2657_v32  ;;  %v900_v1 = vmul.f32 0.7978846, %v868_v57 }
 0x1b7   : > { %2676 = vtanh.f32 %v899_v10  ;;  %v2659_v63 = vpop.eup %2658  ;;  %v898_v3 = vmul.f32 0.7978846, %v866_v27  ;;  %v731_v38 = vmul.f32 0.5, %v3384_v31  ;;  %v733_v12 = vmul.f32 0.5, %v3391_v39 }
 0x1b8   : > { %2678 = vtanh.f32 %v901_v22  ;;  %1290 = vmatprep.mubr.bf16.mxu1 %v1007_v16  ;;  %v952_v7 = vadd.f32 1.0, %v2659_v63  ;;  %v982_v8 = vmul.f32 %v950_v25, %v726_v26  ;;  %v732_v15 = vmul.f32 0.5, %v3388_v40 }
 0x1b9   : > { %2680 = vtanh.f32 %v900_v1  ;;  %v730_v31 = vmul.f32 0.5, %v3363_v37  ;;  %v735_v33 = vmul.f32 0.5, %v3426_v47  ;;  %v737_v2 = vmul.f32 0.5, %v3434_v60 }
 0x1ba   : > { %v2661_v50 = vpop.eup %2660  ;;  %v984_v9 = vmul.f32 %v952_v7, %v728_v49  ;;  %2682 = vtanh.f32 %v898_v3  ;;  %v741_v37 = vmul.f32 0.5, %v3471_v42  ;;  %v736_v10 = vmul.f32 0.5, %v3431_v58  ;;  %v2615_v3 = vld [vmem:[#allocation8 + $0x10] sm:$0xff]  }
 0x1bb   : > { %v2663_v30 = vpop.eup %2662  ;;  %v955_v48 = vadd.f32 1.0, %v2661_v50  ;;  %v739_v60 = vmul.f32 0.5, %v3453_v34  ;;  %v734_v54 = vmul.f32 0.5, %v3420_v24  ;;  %v740_v26 = vmul.f32 0.5, %v3462_v29  ;;  %v2607_v24 = vld [vmem:[#allocation8 + $0x30] sm:$0xff]   ;;  %v2608_v50 = vld [vmem:[#allocation8 + $0x68] sm:$0xff]  }
 0x1bc   : > { %v957_v46 = vadd.f32 1.0, %v2663_v30  ;;  %v2665_v19 = vpop.eup %2664  ;;  %v1006_v14 = vpack.c.bf16 %v984_v9, %v982_v8  ;;  %v738_v58 = vmul.f32 0.5, %v3458_v59  ;;  %2346 = vmatpush3.bf16.msra.mxu0 %v2607_v24  ;;  %2416 = vmatpush3.bf16.msra.mxu1 %v2607_v24  ;;  %v2609_v30 = vld [vmem:[#allocation8 + $0x28] sm:$0xff]   ;;  %v2610_v8 = vld [vmem:[#allocation8 + $0x60] sm:$0xff]   ;;  %v2612_v59 = vld [vmem:[#allocation8 + $0x58] sm:$0xff]  }
 0x1bd   : > { %v2667_v20 = vpop.eup %2666  ;;  %v987_v0 = vmul.f32 %v955_v48, %v731_v38  ;;  %v954_v62 = vadd.f32 1.0, %v2665_v19  ;;  %2347 = vmatprep.subr.bf16.mxu0 %v2608_v50  ;;  %2409 = vmatprep.subr.bf16.mxu1 %v2608_v50  ;;  %v2611_v29 = vld [vmem:[#allocation8 + $0x20] sm:$0xff]   ;;  %v2613_v9 = vld [vmem:[#allocation8 + $0x18] sm:$0xff]   ;;  %v2614_v48 = vld [vmem:[#allocation8 + $0x50] sm:$0xff]  }
 0x1be   : > { %v989_v21 = vmul.f32 %v957_v46, %v733_v12  ;;  %1291 = vmatmul.mubr.bf16.gmra.mxu1 %v1006_v14  ;;  %v956_v5 = vadd.f32 1.0, %v2667_v20  ;;  %v2616_v38 = vld [vmem:[#allocation8 + $0x48] sm:$0xff]   ;;  %v2618_v46 = vld [vmem:[#allocation8 + $0x40] sm:$0xff]  }
 0x1bf   : > { %v986_v36 = vmul.f32 %v954_v62, %v730_v31  ;;  %v2617_v12 = vld [vmem:[#allocation8 + $0x8] sm:$0xff]   ;;  %v2619_v19 = vld [vmem:[#allocation8] sm:$0xff]  }
 0x1c0   : > { %v2669_v23 = vpop.eup %2668  ;;  %v1009_v44 = vpack.c.bf16 %v989_v21, %v987_v0  ;;  %v988_v28 = vmul.f32 %v956_v5, %v732_v15  ;;  %2348 = vmatpush3.bf16.msra.mxu0 %v2609_v30  ;;  %2417 = vmatpush3.bf16.msra.mxu1 %v2609_v30  ;;  %v1046_v14 = vld [vmem:[%s3967_s4] sm:$0x3] }
 0x1c1   : > { %v2671_v13 = vpop.eup %2670  ;;  %v959_v39 = vadd.f32 1.0, %v2669_v23  ;;  %2349 = vmatprep.subr.bf16.mxu0 %v2610_v8  ;;  %2410 = vmatprep.subr.bf16.mxu1 %v2610_v8  ;;  %v3527_v20 = vrot.slane %v1046_v14, %v429_v53  ;;  %v3531_v0 = vrot.slane %v1046_v14, %v433_v55 }
 0x1c2   : > { %v2673_v18 = vpop.eup %2672  ;;  %1300 = vmatprep.mubr.bf16.mxu1 %v1009_v44  ;;  %v961_v17 = vadd.f32 1.0, %v2671_v13  ;;  %v1008_v56 = vpack.c.bf16 %v988_v28, %v986_v36 }
 0x1c3   : > { %v2675_v6 = vpop.eup %2674  ;;  %v991_v45 = vmul.f32 %v959_v39, %v735_v33  ;;  %v958_v47 = vadd.f32 1.0, %v2673_v18 }
 0x1c4   : > { %v2677_v40 = vpop.eup %2676  ;;  %v993_v41 = vmul.f32 %v961_v17, %v737_v2  ;;  %v960_v43 = vadd.f32 1.0, %v2675_v6  ;;  %2350 = vmatpush3.bf16.msra.mxu0 %v2611_v29  ;;  %2418 = vmatpush3.bf16.msra.mxu1 %v2611_v29 }
 0x1c5   : > { %v2679_v35 = vpop.eup %2678  ;;  %v963_v4 = vadd.f32 1.0, %v2677_v40  ;;  %v990_v16 = vmul.f32 %v958_v47, %v734_v54  ;;  %2351 = vmatprep.subr.bf16.mxu0 %v2612_v59  ;;  %2411 = vmatprep.subr.bf16.mxu1 %v2612_v59 }
 0x1c6   : > { %v1011_v11 = vpack.c.bf16 %v993_v41, %v991_v45  ;;  %v965_v51 = vadd.f32 1.0, %v2679_v35  ;;  %1301 = vmatmul.mubr.bf16.gmra.mxu1 %v1008_v56  ;;  %v992_v32 = vmul.f32 %v960_v43, %v736_v10  ;;  %v2681_v22 = vpop.eup %2680 }
 0x1c7   : > { %v995_v57 = vmul.f32 %v963_v4, %v739_v60  ;;  %v2683_v25 = vpop.eup %2682  ;;  %v964_v42 = vadd.f32 1.0, %v2681_v22 }
 0x1c8   : > { %1310 = vmatprep.mubr.bf16.mxu1 %v1011_v11  ;;  %v997_v61 = vmul.f32 %v965_v51, %v741_v37  ;;  %v1010_v63 = vpack.c.bf16 %v992_v32, %v990_v16  ;;  %v962_v49 = vadd.f32 1.0, %v2683_v25  ;;  %2352 = vmatpush3.bf16.msra.mxu0 %v2613_v9 }
 0x1c9   : > { %v996_v7 = vmul.f32 %v964_v42, %v740_v26  ;;  %2419 = vmatpush3.bf16.msra.mxu1 %v2613_v9  ;;  %2353 = vmatprep.subr.bf16.mxu0 %v2614_v48 }
 0x1ca   : > { %v1013_v27 = vpack.c.bf16 %v997_v61, %v995_v57  ;;  %v994_v34 = vmul.f32 %v962_v49, %v738_v58  ;;  %2412 = vmatprep.subr.bf16.mxu1 %v2614_v48 }
 0x1cc   : > { %v1012_v1 = vpack.c.bf16 %v996_v7, %v994_v34  ;;  %2354 = vmatpush3.bf16.msra.mxu0 %v2615_v3 }
 0x1cd   : > { %2420 = vmatpush3.bf16.msra.mxu1 %v2615_v3  ;;  %2355 = vmatprep.subr.bf16.mxu0 %v2616_v38 }
 0x1ce   : > { %1311 = vmatmul.mubr.bf16.gmra.mxu1 %v1010_v63  ;;  %2413 = vmatprep.subr.bf16.mxu1 %v2616_v38 }
 0x1cf   : > { %1320 = vmatprep.mubr.bf16.mxu1 %v1013_v27 }
 0x1d0   : > { %2356 = vmatpush3.bf16.msra.mxu0 %v2617_v12 }
 0x1d1   : > { %2421 = vmatpush3.bf16.msra.mxu1 %v2617_v12  ;;  %2357 = vmatprep.subr.bf16.mxu0 %v2618_v46 }
 0x1d2   : > { %2414 = vmatprep.subr.bf16.mxu1 %v2618_v46 }
 0x1d4   : > { %2358 = vmatpush3.bf16.msra.mxu0 %v2619_v19 }
 0x1d5   : > { %2422 = vmatpush3.bf16.msra.mxu1 %v2619_v19 }
 0x1d6   : > { %1321 = vmatmul.mubr.bf16.gmra.mxu1 %v1012_v1 }
 0x251   : > { %v1252_v21 = vpop.f32.mrf.mxu1 }
 0x252   : > { %v3534_v15 = vadd.f32 %v1252_v21, %v3527_v20 }
 0x253   : > { %v1254_v62 = vpop.f32.mrf.mxu1 }
 0x254   : > { %v1363_v5 = vmul.f32 0.044715, %v3534_v15  ;;  %v3538_v23 = vadd.f32 %v1254_v62, %v3531_v0 }
 0x255   : > { %v1256_v44 = vpop.f32.mrf.mxu1 }
 0x256   : > { %v1395_v13 = vmul.f32 %v1363_v5, %v3534_v15  ;;  %v1364_v53 = vmul.f32 0.044715, %v3538_v23  ;;  %v3543_v31 = vadd.f32 %v1256_v44, %v3527_v20 }
 0x257   : > { %v1258_v52 = vpop.f32.mrf.mxu1 }
 0x258   : > { %v1427_v55 = vmul.f32 %v1395_v13, %v3534_v15  ;;  %v1396_v28 = vmul.f32 %v1364_v53, %v3538_v23  ;;  %v1365_v39 = vmul.f32 0.044715, %v3543_v31  ;;  %v3549_v18 = vadd.f32 %v1258_v52, %v3531_v0 }
 0x259   : > { %v1262_v33 = vpop.f32.mrf.mxu1 }
 0x25a   : > { %v1459_v2 = vadd.f32 %v1427_v55, %v3534_v15  ;;  %v1428_v17 = vmul.f32 %v1396_v28, %v3538_v23  ;;  %v1397_v6 = vmul.f32 %v1365_v39, %v3543_v31  ;;  %v3555_v36 = vadd.f32 %v1262_v33, %v3527_v20 }
 0x25b   : > { %v1366_v40 = vmul.f32 0.044715, %v3549_v18  ;;  %v1264_v45 = vpop.f32.mrf.mxu1 }
 0x25c   : > { %v1491_v41 = vmul.f32 0.7978846, %v1459_v2  ;;  %v1429_v35 = vmul.f32 %v1397_v6, %v3543_v31  ;;  %v1367_v56 = vmul.f32 0.044715, %v3555_v36  ;;  %v3561_v43 = vadd.f32 %v1264_v45, %v3531_v0 }
 0x25d   : > { %v1398_v11 = vmul.f32 %v1366_v40, %v3549_v18  ;;  %v1266_v37 = vpop.f32.mrf.mxu1  ;;  %v1460_v4 = vadd.f32 %v1428_v17, %v3538_v23 }
 0x25e   : > { %v1461_v51 = vadd.f32 %v1429_v35, %v3543_v31  ;;  %v1399_v10 = vmul.f32 %v1367_v56, %v3555_v36  ;;  %v1368_v47 = vmul.f32 0.044715, %v3561_v43  ;;  %2684 = vtanh.f32 %v1491_v41 }
 0x25f   : > { %v1430_v60 = vmul.f32 %v1398_v11, %v3549_v18  ;;  %v3570_v61 = vadd.f32 %v1266_v37, %v3527_v20  ;;  %v1268_v54 = vpop.f32.mrf.mxu1  ;;  %v1492_v32 = vmul.f32 0.7978846, %v1460_v4  ;;  %v1332_v56 = vmul.f32 0.5, %v3538_v23 }
 0x260   : > { %v1493_v22 = vmul.f32 0.7978846, %v1461_v51  ;;  %v1431_v57 = vmul.f32 %v1399_v10, %v3555_v36  ;;  %v1400_v16 = vmul.f32 %v1368_v47, %v3561_v43  ;;  %v3575_v25 = vadd.f32 %v1268_v54, %v3531_v0 }
 0x261   : > { %v1369_v27 = vmul.f32 0.044715, %v3570_v61  ;;  %v1462_v63 = vadd.f32 %v1430_v60, %v3549_v18  ;;  %2686 = vtanh.f32 %v1492_v32  ;;  %v1333_v54 = vmul.f32 0.5, %v3543_v31 }
 0x262   : > { %2688 = vtanh.f32 %v1493_v22  ;;  %v1432_v42 = vmul.f32 %v1400_v16, %v3561_v43  ;;  %v1370_v26 = vmul.f32 0.044715, %v3575_v25  ;;  %v1463_v7 = vadd.f32 %v1431_v57, %v3555_v36  ;;  %v1272_v1 = vpop.f32.mrf.mxu1 }
 0x263   : > { %v1401_v49 = vmul.f32 %v1369_v27, %v3570_v61  ;;  %v1494_v58 = vmul.f32 0.7978846, %v1462_v63  ;;  %v3587_v30 = vadd.f32 %v1272_v1, %v3527_v20  ;;  %v1334_v32 = vmul.f32 0.5, %v3549_v18 }
 0x264   : > { %v1402_v34 = vmul.f32 %v1370_v26, %v3575_v25  ;;  %v1464_v24 = vadd.f32 %v1432_v42, %v3561_v43  ;;  %v1274_v29 = vpop.f32.mrf.mxu1  ;;  %v1495_v9 = vmul.f32 0.7978846, %v1463_v7  ;;  %v1331_v27 = vmul.f32 0.5, %v3534_v15 }
 0x265   : > { %v1433_v50 = vmul.f32 %v1401_v49, %v3570_v61  ;;  %2690 = vtanh.f32 %v1494_v58  ;;  %v1371_v48 = vmul.f32 0.044715, %v3587_v30  ;;  %v3592_v3 = vadd.f32 %v1274_v29, %v3531_v0 }
 0x266   : > { %v1434_v8 = vmul.f32 %v1402_v34, %v3575_v25  ;;  %v1496_v59 = vmul.f32 0.7978846, %v1464_v24  ;;  %v1276_v12 = vpop.f32.mrf.mxu1 }
 0x267   : > { %v1465_v38 = vadd.f32 %v1433_v50, %v3570_v61  ;;  %v1403_v19 = vmul.f32 %v1371_v48, %v3587_v30  ;;  %v1372_v14 = vmul.f32 0.044715, %v3592_v3  ;;  %v3599_v21 = vadd.f32 %v1276_v12, %v3527_v20 }
 0x268   : > { %v1466_v46 = vadd.f32 %v1434_v8, %v3575_v25  ;;  %2692 = vtanh.f32 %v1496_v59  ;;  %v1278_v5 = vpop.f32.mrf.mxu1 }
 0x269   : > { %v1497_v62 = vmul.f32 0.7978846, %v1465_v38  ;;  %2694 = vtanh.f32 %v1495_v9  ;;  %v1435_v13 = vmul.f32 %v1403_v19, %v3587_v30  ;;  %v1404_v53 = vmul.f32 %v1372_v14, %v3592_v3 }
 0x26a   : > { %v1498_v44 = vmul.f32 0.7978846, %v1466_v46  ;;  %v1373_v52 = vmul.f32 0.044715, %v3599_v21  ;;  %v3605_v55 = vadd.f32 %v1278_v5, %v3531_v0  ;;  %v1335_v46 = vmul.f32 0.5, %v3555_v36 }
 0x26b   : > { %v2685_v28 = vpop.eup %2684  ;;  %v1436_v39 = vmul.f32 %v1404_v53, %v3592_v3  ;;  %v1467_v6 = vadd.f32 %v1435_v13, %v3587_v30  ;;  %v1338_v5 = vmul.f32 0.5, %v3575_v25 }
 0x26c   : > { %2696 = vtanh.f32 %v1498_v44  ;;  %v1405_v33 = vmul.f32 %v1373_v52, %v3599_v21  ;;  %v1374_v2 = vmul.f32 0.044715, %v3605_v55  ;;  %v1555_v22 = vadd.f32 1.0, %v2685_v28 }
 0x26d   : > { %2698 = vtanh.f32 %v1497_v62  ;;  %v1468_v35 = vadd.f32 %v1436_v39, %v3592_v3  ;;  %v1499_v37 = vmul.f32 0.7978846, %v1467_v6  ;;  %v1336_v62 = vmul.f32 0.5, %v3561_v43 }
 0x26e   : > { %v2687_v17 = vpop.eup %2686  ;;  %v1437_v45 = vmul.f32 %v1405_v33, %v3599_v21  ;;  %v1406_v41 = vmul.f32 %v1374_v2, %v3605_v55  ;;  %v1587_v18 = vmul.f32 %v1555_v22, %v1331_v27  ;;  %v1337_v2 = vmul.f32 0.5, %v3570_v61 }
 0x26f   : > { %v2689_v40 = vpop.eup %2688  ;;  %v1556_v51 = vadd.f32 1.0, %v2687_v17  ;;  %v1500_v10 = vmul.f32 0.7978846, %v1468_v35  ;;  %2700 = vtanh.f32 %v1499_v37 }
 0x270   : > { %v1557_v11 = vadd.f32 1.0, %v2689_v40  ;;  %v1438_v4 = vmul.f32 %v1406_v41, %v3605_v55  ;;  %v1469_v47 = vadd.f32 %v1437_v45, %v3599_v21 }
 0x271   : > { %2702 = vtanh.f32 %v1500_v10  ;;  %v1588_v58 = vmul.f32 %v1556_v51, %v1332_v56 }
 0x272   : > { %v2691_v60 = vpop.eup %2690  ;;  %v1470_v16 = vadd.f32 %v1438_v4, %v3605_v55  ;;  %v1501_v23 = vmul.f32 0.7978846, %v1469_v47  ;;  %v1282_v63 = vpop.f32.mrf.mxu1  ;;  %v1589_v42 = vmul.f32 %v1557_v11, %v1333_v54 }
 0x273   : > { %v1558_v57 = vadd.f32 1.0, %v2691_v60  ;;  %v3622_v49 = vadd.f32 %v1282_v63, %v3527_v20 }
 0x274   : > { %v1502_v31 = vmul.f32 0.7978846, %v1470_v16  ;;  %v1284_v34 = vpop.f32.mrf.mxu1  ;;  %2704 = vtanh.f32 %v1501_v23  ;;  %v1619_v29 = vpack.c.bf16 %v1589_v42, %v1587_v18  ;;  %v1340_v16 = vmul.f32 0.5, %v3592_v3 }
 0x275   : > { %v2693_v26 = vpop.eup %2692  ;;  %v1590_v7 = vmul.f32 %v1558_v57, %v1334_v32  ;;  %v1375_v24 = vmul.f32 0.044715, %v3622_v49  ;;  %v3626_v50 = vadd.f32 %v1284_v34, %v3531_v0  ;;  %v1339_v32 = vmul.f32 0.5, %v3587_v30 }
 0x276   : > { %v2695_v1 = vpop.eup %2694  ;;  %v1286_v15 = vpop.f32.mrf.mxu1  ;;  %v1560_v59 = vadd.f32 1.0, %v2693_v26  ;;  %2706 = vtanh.f32 %v1502_v31 }
 0x277   : > { %v1620_v8 = vpack.c.bf16 %v1590_v7, %v1588_v58  ;;  %v1407_v48 = vmul.f32 %v1375_v24, %v3622_v49  ;;  %v1376_v38 = vmul.f32 0.044715, %v3626_v50  ;;  %v3631_v12 = vadd.f32 %v1286_v15, %v3527_v20 }
 0x278   : > { %v1288_v14 = vpop.f32.mrf.mxu1  ;;  %v1559_v13 = vadd.f32 1.0, %v2695_v1  ;;  %v1592_v33 = vmul.f32 %v1560_v59, %v1336_v62  ;;  %v1341_v7 = vmul.f32 0.5, %v3599_v21  ;;  %v1342_v15 = vmul.f32 0.5, %v3605_v55 }
 0x279   : > { %v2697_v9 = vpop.eup %2696  ;;  %1802 = vmatprep.mubr.bf16.mxu0 %v1620_v8  ;;  %v1439_v53 = vmul.f32 %v1407_v48, %v3622_v49  ;;  %v1408_v52 = vmul.f32 %v1376_v38, %v3626_v50  ;;  %v1377_v28 = vmul.f32 0.044715, %v3631_v12  ;;  %v3640_v39 = vadd.f32 %v1288_v14, %v3531_v0 }
 0x27a   : > { %v2699_v19 = vpop.eup %2698  ;;  %1803 = vmatmul.mubr.bf16.vlgmr.msra.gmra.mxu0 %v1619_v29  ;;  %v1562_v44 = vadd.f32 1.0, %v2697_v9  ;;  %v1591_v45 = vmul.f32 %v1559_v13, %v1335_v46 }
 0x27b   : > { %v1561_v17 = vadd.f32 1.0, %v2699_v19  ;;  %v1440_v43 = vmul.f32 %v1408_v52, %v3626_v50  ;;  %v1409_v25 = vmul.f32 %v1377_v28, %v3631_v12  ;;  %v1378_v6 = vmul.f32 0.044715, %v3640_v39 }
 0x27c   : > { %v1594_v36 = vmul.f32 %v1562_v44, %v1338_v5  ;;  %v1471_v35 = vadd.f32 %v1439_v53, %v3622_v49  ;;  %v2701_v56 = vpop.eup %2700 }
 0x27d   : > { %v1593_v41 = vmul.f32 %v1561_v17, %v1337_v2  ;;  %v1441_v11 = vmul.f32 %v1409_v25, %v3631_v12  ;;  %v1410_v37 = vmul.f32 %v1378_v6, %v3640_v39  ;;  %v1472_v4 = vadd.f32 %v1440_v43, %v3626_v50 }
 0x27e   : > { %v1622_v40 = vpack.c.bf16 %v1594_v36, %v1592_v33  ;;  %v2703_v61 = vpop.eup %2702  ;;  %v1292_v51 = vpop.f32.mrf.mxu1  ;;  %v1503_v47 = vmul.f32 0.7978846, %v1471_v35  ;;  %v1563_v23 = vadd.f32 1.0, %v2701_v56 }
 0x27f   : > { %v1621_v10 = vpack.c.bf16 %v1593_v41, %v1591_v45  ;;  %v1442_v60 = vmul.f32 %v1410_v37, %v3640_v39  ;;  %v3652_v54 = vadd.f32 %v1292_v51, %v3527_v20  ;;  %v1504_v22 = vmul.f32 0.7978846, %v1472_v4 }
 0x280   : > { %1810 = vmatprep.mubr.bf16.mxu0 %v1622_v40  ;;  %v1294_v57 = vpop.f32.mrf.mxu1  ;;  %v1473_v27 = vadd.f32 %v1441_v11, %v3631_v12  ;;  %2708 = vtanh.f32 %v1503_v47  ;;  %v1564_v58 = vadd.f32 1.0, %v2703_v61  ;;  %v1595_v9 = vmul.f32 %v1563_v23, %v1339_v32 }
 0x281   : > { %v2705_v63 = vpop.eup %2704  ;;  %v1379_v42 = vmul.f32 0.044715, %v3652_v54  ;;  %v3659_v26 = vadd.f32 %v1294_v57, %v3531_v0  ;;  %v1474_v34 = vadd.f32 %v1442_v60, %v3640_v39  ;;  %2710 = vtanh.f32 %v1504_v22 }
 0x282   : > { %1811 = vmatmul.mubr.bf16.gmra.mxu0 %v1621_v10  ;;  %v1296_v31 = vpop.f32.mrf.mxu1  ;;  %v1565_v30 = vadd.f32 1.0, %v2705_v63  ;;  %v1505_v18 = vmul.f32 0.7978846, %v1473_v27  ;;  %v1596_v5 = vmul.f32 %v1564_v58, %v1340_v16  ;;  %v1343_v45 = vmul.f32 0.5, %v3622_v49 }
 0x283   : > { %v2707_v3 = vpop.eup %2706  ;;  %v1411_v1 = vmul.f32 %v1379_v42, %v3652_v54  ;;  %v1380_v24 = vmul.f32 0.044715, %v3659_v26  ;;  %v3666_v8 = vadd.f32 %v1296_v31, %v3527_v20  ;;  %v1506_v21 = vmul.f32 0.7978846, %v1474_v34 }
 0x284   : > { %v1298_v29 = vpop.f32.mrf.mxu1  ;;  %v1566_v59 = vadd.f32 1.0, %v2707_v3  ;;  %2712 = vtanh.f32 %v1505_v18  ;;  %v1597_v19 = vmul.f32 %v1565_v30, %v1341_v7  ;;  %v1344_v37 = vmul.f32 0.5, %v3626_v50 }
 0x285   : > { %v1443_v48 = vmul.f32 %v1411_v1, %v3652_v54  ;;  %v1412_v38 = vmul.f32 %v1380_v24, %v3659_v26  ;;  %v1381_v46 = vmul.f32 0.044715, %v3666_v8  ;;  %v3673_v14 = vadd.f32 %v1298_v29, %v3531_v0 }
 0x286   : > { %v1302_v62 = vpop.f32.mrf.mxu1  ;;  %v1598_v44 = vmul.f32 %v1566_v59, %v1342_v15  ;;  %2714 = vtanh.f32 %v1506_v21  ;;  %v1623_v25 = vpack.c.bf16 %v1597_v19, %v1595_v9  ;;  %v1345_v22 = vmul.f32 0.5, %v3631_v12 }
 0x287   : > { %v1475_v55 = vadd.f32 %v1443_v48, %v3652_v54  ;;  %v1444_v13 = vmul.f32 %v1412_v38, %v3659_v26  ;;  %v1413_v53 = vmul.f32 %v1381_v46, %v3666_v8  ;;  %v3679_v52 = vadd.f32 %v1302_v62, %v3527_v20 }
 0x288   : > { %v1382_v28 = vmul.f32 0.044715, %v3673_v14  ;;  %v1304_v33 = vpop.f32.mrf.mxu1  ;;  %v1624_v36 = vpack.c.bf16 %v1598_v44, %v1596_v5  ;;  %v1346_v16 = vmul.f32 0.5, %v3640_v39  ;;  %v3706_v63 = vmul.f32 0.5, %v3652_v54 }
 0x289   : > { %v1507_v2 = vmul.f32 0.7978846, %v1475_v55  ;;  %v1445_v17 = vmul.f32 %v1413_v53, %v3666_v8  ;;  %v3684_v43 = vadd.f32 %v1304_v33, %v3531_v0  ;;  %v1476_v41 = vadd.f32 %v1444_v13, %v3659_v26 }
 0x28a   : > { %v1414_v6 = vmul.f32 %v1382_v28, %v3673_v14  ;;  %v1306_v40 = vpop.f32.mrf.mxu1  ;;  %1818 = vmatprep.mubr.bf16.mxu0 %v1624_v36  ;;  %v1383_v56 = vmul.f32 0.044715, %v3679_v52  ;;  %v3710_v58 = vmul.f32 0.5, %v3659_v26  ;;  %v3723_v26 = vmul.f32 0.5, %v3666_v8 }
 0x28b   : > { %v1477_v35 = vadd.f32 %v1445_v17, %v3666_v8  ;;  %v1384_v11 = vmul.f32 0.044715, %v3684_v43  ;;  %1819 = vmatmul.mubr.bf16.gmra.mxu0 %v1623_v25  ;;  %2716 = vtanh.f32 %v1507_v2  ;;  %v3695_v61 = vadd.f32 %v1306_v40, %v3527_v20 }
 0x28c   : > { %v1446_v4 = vmul.f32 %v1414_v6, %v3673_v14  ;;  %v1308_v51 = vpop.f32.mrf.mxu1  ;;  %v1508_v10 = vmul.f32 0.7978846, %v1476_v41  ;;  %v1415_v12 = vmul.f32 %v1383_v56, %v3679_v52  ;;  %v3731_v38 = vmul.f32 0.5, %v3673_v14 }
 0x28d   : > { %v2709_v49 = vpop.eup %2708  ;;  %v1509_v47 = vmul.f32 0.7978846, %v1477_v35  ;;  %v1416_v60 = vmul.f32 %v1384_v11, %v3684_v43  ;;  %v3699_v32 = vadd.f32 %v1308_v51, %v3531_v0  ;;  %v1385_v57 = vmul.f32 0.044715, %v3695_v61 }
 0x28e   : > { %v1312_v50 = vpop.f32.mrf.mxu1  ;;  %v1478_v23 = vadd.f32 %v1446_v4, %v3673_v14  ;;  %2718 = vtanh.f32 %v1508_v10  ;;  %v2711_v27 = vpop.eup %2710  ;;  %v1567_v30 = vadd.f32 1.0, %v2709_v49  ;;  %v1447_v46 = vmul.f32 %v1415_v12, %v3679_v52 }
 0x28f   : > { %2720 = vtanh.f32 %v1509_v47  ;;  %v1386_v42 = vmul.f32 0.044715, %v3699_v32  ;;  %v1448_v7 = vmul.f32 %v1416_v60, %v3684_v43  ;;  %v1417_v18 = vmul.f32 %v1385_v57, %v3695_v61 }
 0x290   : > { %v1314_v31 = vpop.f32.mrf.mxu1  ;;  %v1510_v39 = vmul.f32 0.7978846, %v1478_v23  ;;  %v3717_v54 = vadd.f32 %v1312_v50, %v3527_v20  ;;  %v1568_v15 = vadd.f32 1.0, %v2711_v27  ;;  %v1599_v62 = vmul.f32 %v1567_v30, %v1343_v45 }
 0x291   : > { %v2713_v34 = vpop.eup %2712  ;;  %v1418_v3 = vmul.f32 %v1386_v42, %v3699_v32  ;;  %v3720_v1 = vadd.f32 %v1314_v31, %v3531_v0  ;;  %v1480_v5 = vadd.f32 %v1448_v7, %v3684_v43  ;;  %v1449_v44 = vmul.f32 %v1417_v18, %v3695_v61 }
 0x292   : > { %v1316_v24 = vpop.f32.mrf.mxu1  ;;  %v1569_v29 = vadd.f32 1.0, %v2713_v34  ;;  %2722 = vtanh.f32 %v1510_v39  ;;  %v1387_v55 = vmul.f32 0.044715, %v3717_v54  ;;  %v1600_v33 = vmul.f32 %v1568_v15, %v1344_v37 }
 0x293   : > { %v2715_v59 = vpop.eup %2714  ;;  %v1450_v9 = vmul.f32 %v1418_v3, %v3699_v32  ;;  %v1388_v21 = vmul.f32 0.044715, %v3720_v1  ;;  %v3728_v48 = vadd.f32 %v1316_v24, %v3527_v20  ;;  %v1512_v2 = vmul.f32 0.7978846, %v1480_v5 }
 0x294   : > { %v1318_v19 = vpop.f32.mrf.mxu1  ;;  %v1570_v8 = vadd.f32 1.0, %v2715_v59  ;;  %v1601_v53 = vmul.f32 %v1569_v29, %v1345_v22  ;;  %v1479_v56 = vadd.f32 %v1447_v46, %v3679_v52  ;;  %v1419_v49 = vmul.f32 %v1387_v55, %v3717_v54 }
 0x295   : > { %v3738_v13 = vadd.f32 %v1318_v19, %v3531_v0  ;;  %v1482_v14 = vadd.f32 %v1450_v9, %v3699_v32  ;;  %v1420_v17 = vmul.f32 %v1388_v21, %v3720_v1  ;;  %v1389_v25 = vmul.f32 0.044715, %v3728_v48 }
 0x296   : > { %v1322_v28 = vpop.f32.mrf.mxu1  ;;  %v1602_v36 = vmul.f32 %v1570_v8, %v1346_v16  ;;  %2724 = vtanh.f32 %v1512_v2  ;;  %v1625_v10 = vpack.c.bf16 %v1601_v53, %v1599_v62  ;;  %v1481_v60 = vadd.f32 %v1449_v44, %v3695_v61 }
 0x297   : > { %v1390_v6 = vmul.f32 0.044715, %v3738_v13  ;;  %v3745_v40 = vadd.f32 %v1322_v28, %v3527_v20  ;;  %v1514_v35 = vmul.f32 0.7978846, %v1482_v14  ;;  %v1511_v22 = vmul.f32 0.7978846, %v1479_v56 }
 0x298   : > { %v1324_v45 = vpop.f32.mrf.mxu1  ;;  %v1626_v41 = vpack.c.bf16 %v1602_v36, %v1600_v33  ;;  %v2717_v11 = vpop.eup %2716  ;;  %v1452_v50 = vmul.f32 %v1420_v17, %v3720_v1  ;;  %v1421_v16 = vmul.f32 %v1389_v25, %v3728_v48  ;;  %v1513_v30 = vmul.f32 0.7978846, %v1481_v60 }
 0x299   : > { %v1422_v37 = vmul.f32 %v1390_v6, %v3738_v13  ;;  %v1391_v4 = vmul.f32 0.044715, %v3745_v40  ;;  %v3751_v51 = vadd.f32 %v1324_v45, %v3531_v0  ;;  %2726 = vtanh.f32 %v1514_v35 }
 0x29a   : > { %v1326_v47 = vpop.f32.mrf.mxu1  ;;  %1826 = vmatprep.mubr.bf16.mxu0 %v1626_v41  ;;  %v1571_v31 = vadd.f32 1.0, %v2717_v11  ;;  %2728 = vtanh.f32 %v1511_v22  ;;  %v1453_v59 = vmul.f32 %v1421_v16, %v3728_v48 }
 0x29b   : > { %v2719_v57 = vpop.eup %2718  ;;  %v1392_v23 = vmul.f32 0.044715, %v3751_v51  ;;  %v3759_v27 = vadd.f32 %v1326_v47, %v3527_v20  ;;  %1827 = vmatmul.mubr.bf16.gmra.mxu0 %v1625_v10  ;;  %v1454_v12 = vmul.f32 %v1422_v37, %v3738_v13  ;;  %v1423_v39 = vmul.f32 %v1391_v4, %v3745_v40 }
 0x29c   : > { %v2721_v42 = vpop.eup %2720  ;;  %v1328_v7 = vpop.f32.mrf.mxu1  ;;  %v1451_v20 = vmul.f32 %v1419_v49, %v3717_v54  ;;  %v1572_v24 = vadd.f32 1.0, %v2719_v57  ;;  %2730 = vtanh.f32 %v1513_v30  ;;  %v1603_v55 = vmul.f32 %v1571_v31, %v3706_v63 }
 0x29d   : > { %v1424_v34 = vmul.f32 %v1392_v23, %v3751_v51  ;;  %v1393_v18 = vmul.f32 0.044715, %v3759_v27  ;;  %v3766_v3 = vadd.f32 %v1328_v7, %v3531_v0  ;;  %v1573_v15 = vadd.f32 1.0, %v2721_v42 }
 0x29e   : > { %v1484_v0 = vadd.f32 %v1452_v50, %v3720_v1  ;;  %v1486_v62 = vadd.f32 %v1454_v12, %v3738_v13  ;;  %v1455_v5 = vmul.f32 %v1423_v39, %v3745_v40  ;;  %v1604_v53 = vmul.f32 %v1572_v24, %v3710_v58 }
 0x29f   : > { %v2723_v29 = vpop.eup %2722  ;;  %v1456_v9 = vmul.f32 %v1424_v34, %v3751_v51  ;;  %v1425_v21 = vmul.f32 %v1393_v18, %v3759_v27  ;;  %v1394_v46 = vmul.f32 0.044715, %v3766_v3  ;;  %v1605_v8 = vmul.f32 %v1573_v15, %v3723_v26 }
 0x2a0   : > { %v1574_v19 = vadd.f32 1.0, %v2723_v29  ;;  %v1516_v33 = vmul.f32 0.7978846, %v1484_v0  ;;  %v1518_v36 = vmul.f32 0.7978846, %v1486_v62  ;;  %v1483_v2 = vadd.f32 %v1451_v20, %v3717_v54 }
 0x2a1   : > { %v1426_v44 = vmul.f32 %v1394_v46, %v3766_v3  ;;  %v1457_v14 = vmul.f32 %v1425_v21, %v3759_v27  ;;  %v1485_v17 = vadd.f32 %v1453_v59, %v3728_v48  ;;  %v1627_v6 = vpack.c.bf16 %v1605_v8, %v1603_v55 }
 0x2a2   : > { %v1606_v28 = vmul.f32 %v1574_v19, %v3731_v38  ;;  %2732 = vtanh.f32 %v1516_v33  ;;  %v1488_v45 = vadd.f32 %v1456_v9, %v3751_v51  ;;  %v1515_v58 = vmul.f32 0.7978846, %v1483_v2 }
 0x2a3   : > { %v1458_v26 = vmul.f32 %v1426_v44, %v3766_v3  ;;  %v2725_v63 = vpop.eup %2724  ;;  %2734 = vtanh.f32 %v1518_v36  ;;  %v1517_v41 = vmul.f32 0.7978846, %v1485_v17  ;;  %v1487_v4 = vadd.f32 %v1455_v5, %v3745_v40 }
 0x2a4   : > { %v1628_v25 = vpack.c.bf16 %v1606_v28, %v1604_v53  ;;  %v1576_v35 = vadd.f32 1.0, %v2725_v63  ;;  %v1520_v56 = vmul.f32 0.7978846, %v1488_v45  ;;  %2736 = vtanh.f32 %v1515_v58 }
 0x2a5   : > { %v1490_v38 = vadd.f32 %v1458_v26, %v3766_v3  ;;  %v1489_v10 = vadd.f32 %v1457_v14, %v3759_v27  ;;  %v1352_v49 = vmul.f32 0.5, %v3684_v43  ;;  %v1354_v47 = vmul.f32 0.5, %v3699_v32 }
 0x2a6   : > { %1834 = vmatprep.mubr.bf16.mxu1 %v1628_v25  ;;  %v2727_v11 = vpop.eup %2726  ;;  %2738 = vtanh.f32 %v1517_v41  ;;  %v1519_v57 = vmul.f32 0.7978846, %v1487_v4  ;;  %v1351_v7 = vmul.f32 0.5, %v3679_v52  ;;  %v1353_v30 = vmul.f32 0.5, %v3695_v61 }
 0x2a7   : > { %1835 = vmatmul.mubr.bf16.vlgmr.msra.gmra.mxu1 %v1627_v6  ;;  %v1522_v37 = vmul.f32 0.7978846, %v1490_v38  ;;  %v1578_v60 = vadd.f32 1.0, %v2727_v11  ;;  %v2729_v22 = vpop.eup %2728  ;;  %2740 = vtanh.f32 %v1520_v56  ;;  %v1521_v50 = vmul.f32 0.7978846, %v1489_v10 }
 0x2a8   : > { %v1608_v16 = vmul.f32 %v1576_v35, %v1352_v49  ;;  %v1575_v42 = vadd.f32 1.0, %v2729_v22  ;;  %v1356_v15 = vmul.f32 0.5, %v3720_v1  ;;  %v1358_v29 = vmul.f32 0.5, %v3738_v13  ;;  %v3804_v38 = vld [vmem:[%s3969_s6] ss:$0 sm:$0xff] }
 0x2a9   : > { %v1610_v23 = vmul.f32 %v1578_v60, %v1354_v47  ;;  %2742 = vtanh.f32 %v1522_v37  ;;  %v2731_v12 = vpop.eup %2730  ;;  %v1355_v8 = vmul.f32 0.5, %v3717_v54  ;;  %v1357_v0 = vmul.f32 0.5, %v3728_v48 }
 0x2aa   : > { %2744 = vtanh.f32 %v1519_v57  ;;  %v1577_v43 = vadd.f32 1.0, %v2731_v12  ;;  %v1607_v32 = vmul.f32 %v1575_v42, %v1351_v7  ;;  %v1360_v55 = vmul.f32 0.5, %v3751_v51 }
 0x2ab   : > { %v1630_v31 = vpack.c.bf16 %v1610_v23, %v1608_v16  ;;  %2746 = vtanh.f32 %v1521_v50  ;;  %v1362_v33 = vmul.f32 0.5, %v3766_v3  ;;  %v1361_v25 = vmul.f32 0.5, %v3759_v27 }
 0x2ac   : > { %v1609_v39 = vmul.f32 %v1577_v43, %v1353_v30  ;;  %v1359_v51 = vmul.f32 0.5, %v3745_v40 }
 0x2ad   : > { %1842 = vmatprep.mubr.bf16.mxu1 %v1630_v31 }
 0x2ae   : > { %v1629_v34 = vpack.c.bf16 %v1609_v39, %v1607_v32 }
 0x2af   : > { %v2733_v18 = vpop.eup %2732 }
 0x2b0   : > { %v2735_v20 = vpop.eup %2734  ;;  %1843 = vmatmul.mubr.bf16.gmra.mxu1 %v1629_v34  ;;  %v1580_v24 = vadd.f32 1.0, %v2733_v18 }
 0x2b1   : > { %v1582_v59 = vadd.f32 1.0, %v2735_v20  ;;  %v2737_v52 = vpop.eup %2736 }
 0x2b2   : > { %v1612_v21 = vmul.f32 %v1580_v24, %v1356_v15  ;;  %v1579_v61 = vadd.f32 1.0, %v2737_v52 }
 0x2b3   : > { %v2739_v9 = vpop.eup %2738  ;;  %v1614_v46 = vmul.f32 %v1582_v59, %v1358_v29 }
 0x2b4   : > { %v2741_v19 = vpop.eup %2740  ;;  %v1581_v62 = vadd.f32 1.0, %v2739_v9  ;;  %v1611_v28 = vmul.f32 %v1579_v61, %v1355_v8 }
 0x2b5   : > { %v1632_v44 = vpack.c.bf16 %v1614_v46, %v1612_v21  ;;  %v1584_v53 = vadd.f32 1.0, %v2741_v19 }
 0x2b6   : > { %v2743_v5 = vpop.eup %2742  ;;  %v1613_v13 = vmul.f32 %v1581_v62, %v1357_v0 }
 0x2b7   : > { %v2745_v1 = vpop.eup %2744  ;;  %v1586_v36 = vadd.f32 1.0, %v2743_v5  ;;  %1850 = vmatprep.mubr.bf16.mxu1 %v1632_v44  ;;  %v1616_v2 = vmul.f32 %v1584_v53, %v1360_v55 }
 0x2b8   : > { %v2747_v14 = vpop.eup %2746  ;;  %v1631_v26 = vpack.c.bf16 %v1613_v13, %v1611_v28  ;;  %v1583_v6 = vadd.f32 1.0, %v2745_v1 }
 0x2b9   : > { %v1618_v17 = vmul.f32 %v1586_v36, %v1362_v33  ;;  %v1585_v54 = vadd.f32 1.0, %v2747_v14 }
 0x2ba   : > { %1851 = vmatmul.mubr.bf16.gmra.mxu1 %v1631_v26  ;;  %v1615_v63 = vmul.f32 %v1583_v6, %v1359_v51 }
 0x2bb   : > { %v1634_v48 = vpack.c.bf16 %v1618_v17, %v1616_v2  ;;  %v1617_v45 = vmul.f32 %v1585_v54, %v1361_v25 }
 0x2bd   : > { %1858 = vmatprep.mubr.bf16.mxu1 %v1634_v48  ;;  %v1633_v58 = vpack.c.bf16 %v1617_v45, %v1615_v63 }
 0x2c2   : > { %1859 = vmatmul.mubr.bf16.gmra.mxu1 %v1633_v58 }
 0x33a   : > { %v2359_v3 = vpop.f32.mrf.mxu0 }
 0x33c   : > { %v2360_v41 = vpop.f32.mrf.mxu0 }
 0x33d   : > { %v2361_v35 = vadd.f32 %v2360_v41, %v2359_v3 }
 0x33e   : > { %v2362_v56 = vpop.f32.mrf.mxu0 }
 0x33f   : > { %v3807_v11 = vadd.f32 %v2361_v35, %v3804_v38 }
 0x340   : > { %v2363_v27 = vpop.f32.mrf.mxu0 }
 0x341   : > { %v2364_v37 = vadd.f32 %v2363_v27, %v2362_v56  ;;  %v1867_v40 = vmul.f32 %v3807_v11, %v3807_v11 }
 0x342   : > { %v2365_v4 = vpop.f32.mrf.mxu0 }
 0x343   : > { %v3812_v10 = vadd.f32 %v2364_v37, %v3804_v38  ;;  %1883 = vadd.xlane.f32.xlu0 %v1867_v40 }
 0x344   : > { %v2366_v49 = vpop.f32.mrf.mxu0 }
 0x345   : > { %v2367_v47 = vadd.f32 %v2366_v49, %v2365_v4  ;;  %v1868_v60 = vmul.f32 %v3812_v10, %v3812_v10 }
 0x346   : > { %v2368_v22 = vpop.f32.mrf.mxu0 }
 0x347   : > { %1885 = vadd.xlane.f32.xlu0 %v1868_v60  ;;  %v3817_v57 = vadd.f32 %v2367_v47, %v3804_v38 }
 0x348   : > { %v2369_v50 = vpop.f32.mrf.mxu0 }
 0x349   : > { %v2370_v16 = vadd.f32 %v2369_v50, %v2368_v22  ;;  %v1869_v23 = vmul.f32 %v3817_v57, %v3817_v57 }
 0x34b   : > { %v3822_v42 = vadd.f32 %v2370_v16, %v3804_v38  ;;  %1887 = vadd.xlane.f32.xlu1 %v1869_v23  ;;  %v2371_v12 = vpop.f32.mrf.mxu0 }
 0x34d   : > { %v1870_v7 = vmul.f32 %v3822_v42, %v3822_v42  ;;  %v2372_v31 = vpop.f32.mrf.mxu0 }
 0x34e   : > { %v2373_v30 = vadd.f32 %v2372_v31, %v2371_v12 }
 0x34f   : > { %1889 = vadd.xlane.f32.xlu1 %v1870_v7  ;;  %v2374_v43 = vpop.f32.mrf.mxu0 }
 0x350   : > { %v3827_v32 = vadd.f32 %v2373_v30, %v3804_v38 }
 0x351   : > { %v2375_v39 = vpop.f32.mrf.mxu0 }
 0x352   : > { %v2376_v34 = vadd.f32 %v2375_v39, %v2374_v43  ;;  %v1871_v18 = vmul.f32 %v3827_v32, %v3827_v32 }
 0x354   : > { %v3832_v20 = vadd.f32 %v2376_v34, %v3804_v38  ;;  %1891 = vadd.xlane.f32.xlu0 %v1871_v18 }
 0x356   : > { %v1872_v24 = vmul.f32 %v3832_v20, %v3832_v20 }
 0x358   : > { %1893 = vadd.xlane.f32.xlu1 %v1872_v24 }
 0x35b   : > { %v2377_v15 = vpop.f32.mrf.mxu0 }
 0x35d   : > { %v2378_v29 = vpop.f32.mrf.mxu0 }
 0x35e   : > { %v2379_v59 = vadd.f32 %v2378_v29, %v2377_v15 }
 0x35f   : > { %v2380_v52 = vpop.f32.mrf.mxu0 }
 0x360   : > { %v3837_v9 = vadd.f32 %v2379_v59, %v3804_v38 }
 0x361   : > { %v2381_v21 = vpop.f32.mrf.mxu0 }
 0x362   : > { %v2382_v46 = vadd.f32 %v2381_v21, %v2380_v52  ;;  %v1873_v61 = vmul.f32 %v3837_v9, %v3837_v9 }
 0x364   : > { %v3842_v19 = vadd.f32 %v2382_v46, %v3804_v38  ;;  %1895 = vadd.xlane.f32.xlu0 %v1873_v61 }
 0x366   : > { %v1874_v8 = vmul.f32 %v3842_v19, %v3842_v19 }
 0x367   : > { %v2383_v0 = vpop.f32.mrf.mxu1 }
 0x368   : > { %1897 = vadd.xlane.f32.xlu1 %v1874_v8 }
 0x369   : > { %v2384_v62 = vpop.f32.mrf.mxu1 }
 0x36a   : > { %v2385_v5 = vadd.f32 %v2384_v62, %v2383_v0 }
 0x36b   : > { %v2386_v44 = vpop.f32.mrf.mxu1 }
 0x36c   : > { %v3847_v55 = vadd.f32 %v2385_v5, %v3804_v38 }
 0x36d   : > { %v2387_v53 = vpop.f32.mrf.mxu1 }
 0x36e   : > { %v2388_v1 = vadd.f32 %v2387_v53, %v2386_v44  ;;  %v1875_v28 = vmul.f32 %v3847_v55, %v3847_v55 }
 0x370   : > { %v3852_v13 = vadd.f32 %v2388_v1, %v3804_v38  ;;  %1899 = vadd.xlane.f32.xlu0 %v1875_v28  ;;  %v2389_v33 = vpop.f32.mrf.mxu1 }
 0x372   : > { %v1876_v36 = vmul.f32 %v3852_v13, %v3852_v13  ;;  %v2390_v14 = vpop.f32.mrf.mxu1 }
 0x373   : > { %v2391_v26 = vadd.f32 %v2390_v14, %v2389_v33 }
 0x374   : > { %1901 = vadd.xlane.f32.xlu1 %v1876_v36  ;;  %v2392_v2 = vpop.f32.mrf.mxu1 }
 0x375   : > { %v3857_v17 = vadd.f32 %v2391_v26, %v3804_v38 }
 0x376   : > { %v2393_v54 = vpop.f32.mrf.mxu1 }
 0x377   : > { %v2394_v48 = vadd.f32 %v2393_v54, %v2392_v2  ;;  %v1877_v25 = vmul.f32 %v3857_v17, %v3857_v17 }
 0x379   : > { %v3862_v6 = vadd.f32 %v2394_v48, %v3804_v38  ;;  %1903 = vadd.xlane.f32.xlu0 %v1877_v25 }
 0x37a   : > { %v2395_v51 = vpop.f32.mrf.mxu1 }
 0x37b   : > { %v1878_v45 = vmul.f32 %v3862_v6, %v3862_v6 }
 0x37c   : > { %v2396_v63 = vpop.f32.mrf.mxu1 }
 0x37d   : > { %v2397_v58 = vadd.f32 %v2396_v63, %v2395_v51  ;;  %1905 = vadd.xlane.f32.xlu1 %v1878_v45 }
 0x37e   : > { %v2398_v3 = vpop.f32.mrf.mxu1 }
 0x37f   : > { %v3867_v41 = vadd.f32 %v2397_v58, %v3804_v38 }
 0x380   : > { %v2399_v35 = vpop.f32.mrf.mxu1 }
 0x381   : > { %v2400_v56 = vadd.f32 %v2399_v35, %v2398_v3  ;;  %v1879_v27 = vmul.f32 %v3867_v41, %v3867_v41 }
 0x382   : > { %v2401_v37 = vpop.f32.mrf.mxu1 }
 0x383   : > { %v3872_v40 = vadd.f32 %v2400_v56, %v3804_v38  ;;  %1907 = vadd.xlane.f32.xlu0 %v1879_v27 }
 0x384   : > { %v2402_v4 = vpop.f32.mrf.mxu1 }
 0x385   : > { %v2403_v49 = vadd.f32 %v2402_v4, %v2401_v37  ;;  %v1880_v47 = vmul.f32 %v3872_v40, %v3872_v40 }
 0x386   : > { %v2404_v60 = vpop.f32.mrf.mxu1 }
 0x387   : > { %v3877_v22 = vadd.f32 %v2403_v49, %v3804_v38  ;;  %1909 = vadd.xlane.f32.xlu1 %v1880_v47 }
 0x388   : > { %v2405_v50 = vpop.f32.mrf.mxu1 }
 0x389   : > { %v2406_v16 = vadd.f32 %v2405_v50, %v2404_v60  ;;  %v1881_v23 = vmul.f32 %v3877_v22, %v3877_v22 }
 0x38b   : > { %v3882_v12 = vadd.f32 %v2406_v16, %v3804_v38  ;;  %1911 = vadd.xlane.f32.xlu0 %v1881_v23 }
 0x38d   : > { %v1882_v7 = vmul.f32 %v3882_v12, %v3882_v12 }
 0x38f   : > { %1913 = vadd.xlane.f32.xlu1 %v1882_v7 }
 0x3cc   : > { %v1884_v31 = vpop.xlane.xlu0 %1883 }
 0x3cd   : > { %v1915_v30 = vmax.f32 %v1884_v31, 1e-24 }
 0x3cf   : > { %2748 = vrsqrt.f32 %v1915_v30 }
 0x3d0   : > { %v1886_v43 = vpop.xlane.xlu0 %1885 }
 0x3d1   : > { %v1916_v39 = vmax.f32 %v1886_v43, 1e-24 }
 0x3d3   : > { %2750 = vrsqrt.f32 %v1916_v39 }
 0x3d4   : > { %v1888_v34 = vpop.xlane.xlu1 %1887 }
 0x3d5   : > { %v1917_v18 = vmax.f32 %v1888_v34, 1e-24 }
 0x3d7   : > { %2752 = vrsqrt.f32 %v1917_v18 }
 0x3d8   : > { %v1890_v24 = vpop.xlane.xlu1 %1889 }
 0x3d9   : > { %v1918_v15 = vmax.f32 %v1890_v24, 1e-24 }
 0x3db   : > { %2754 = vrsqrt.f32 %v1918_v15 }
 0x3dc   : > { %v2749_v38 = vpop.eup %2748 }
 0x3dd   : > { %v1892_v29 = vpop.xlane.xlu0 %1891  ;;  %v1947_v21 = vmul.f32 %v2749_v38, %v3807_v11 }
 0x3de   : > { %v1919_v52 = vmax.f32 %v1892_v29, 1e-24 }
 0x3e0   : > { %v2751_v59 = vpop.eup %2750  ;;  %2756 = vrsqrt.f32 %v1919_v52 }
 0x3e1   : > { %v1948_v46 = vmul.f32 %v2751_v59, %v3812_v10  ;;  %v1894_v8 = vpop.xlane.xlu1 %1893 }
 0x3e2   : > { %v1920_v0 = vmax.f32 %v1894_v8, 1e-24 }
 0x3e3   : > { %v2299_v61 = vpack.c.bf16 %v1948_v46, %v1947_v21 }
 0x3e4   : > { %v2753_v62 = vpop.eup %2752  ;;  %2758 = vrsqrt.f32 %v1920_v0 }
 0x3e5   : > { %2300 = vst [vmem:[%s3889_s11] sm:$0xff] %v2299_v61   ;;  %v1949_v44 = vmul.f32 %v2753_v62, %v3817_v57 }
 0x3e8   : > { %v2755_v5 = vpop.eup %2754 }
 0x3e9   : > { %v1950_v53 = vmul.f32 %v2755_v5, %v3822_v42 }
 0x3eb   : > { %v2304_v11 = vpack.c.bf16 %v1950_v53, %v1949_v44 }
 0x3ed   : > { %2336 = vst [vmem:[%s3889_s11 + $0x8] sm:$0xff] %v2304_v11   ;;  %v1896_v10 = vpop.xlane.xlu0 %1895  ;;  %v2757_v28 = vpop.eup %2756 }
 0x3ee   : > { %v1921_v1 = vmax.f32 %v1896_v10, 1e-24  ;;  %v1951_v14 = vmul.f32 %v2757_v28, %v3827_v32 }
 0x3f0   : > { %2760 = vrsqrt.f32 %v1921_v1 }
 0x3f1   : > { %v2759_v33 = vpop.eup %2758  ;;  %v1898_v36 = vpop.xlane.xlu1 %1897 }
 0x3f2   : > { %v1952_v26 = vmul.f32 %v2759_v33, %v3832_v20  ;;  %v1922_v2 = vmax.f32 %v1898_v36, 1e-24 }
 0x3f4   : > { %v2309_v54 = vpack.c.bf16 %v1952_v26, %v1951_v14  ;;  %2762 = vrsqrt.f32 %v1922_v2 }
 0x3f6   : > { %2337 = vst [vmem:[%s3889_s11 + $0x10] sm:$0xff] %v2309_v54  }
 0x3f9   : > { %v1900_v57 = vpop.xlane.xlu0 %1899 }
 0x3fa   : > { %v1923_v48 = vmax.f32 %v1900_v57, 1e-24 }
 0x3fc   : > { %2764 = vrsqrt.f32 %v1923_v48 }
 0x3fd   : > { %v1902_v42 = vpop.xlane.xlu1 %1901  ;;  %v2761_v51 = vpop.eup %2760 }
 0x3fe   : > { %v1924_v25 = vmax.f32 %v1902_v42, 1e-24  ;;  %v1953_v63 = vmul.f32 %v2761_v51, %v3837_v9 }
 0x400   : > { %2766 = vrsqrt.f32 %v1924_v25 }
 0x401   : > { %v2763_v45 = vpop.eup %2762 }
 0x402   : > { %v1954_v32 = vmul.f32 %v2763_v45, %v3842_v19  ;;  %v1904_v58 = vpop.xlane.xlu0 %1903 }
 0x403   : > { %v1925_v3 = vmax.f32 %v1904_v58, 1e-24 }
 0x404   : > { %v2314_v20 = vpack.c.bf16 %v1954_v32, %v1953_v63 }
 0x405   : > { %2768 = vrsqrt.f32 %v1925_v3 }
 0x406   : > { %2338 = vst [vmem:[%s3889_s11 + $0x18] sm:$0xff] %v2314_v20   ;;  %v1906_v35 = vpop.xlane.xlu1 %1905 }
 0x407   : > { %v1926_v56 = vmax.f32 %v1906_v35, 1e-24 }
 0x409   : > { %v2765_v27 = vpop.eup %2764  ;;  %2770 = vrsqrt.f32 %v1926_v56 }
 0x40a   : > { %v1955_v4 = vmul.f32 %v2765_v27, %v3847_v55 }
 0x40c   : > { %v1908_v47 = vpop.xlane.xlu0 %1907 }
 0x40d   : > { %v2767_v37 = vpop.eup %2766  ;;  %v1927_v60 = vmax.f32 %v1908_v47, 1e-24 }
 0x40e   : > { %v1956_v49 = vmul.f32 %v2767_v37, %v3852_v13 }
 0x40f   : > { %2772 = vrsqrt.f32 %v1927_v60 }
 0x410   : > { %v2319_v9 = vpack.c.bf16 %v1956_v49, %v1955_v4  ;;  %v1910_v19 = vpop.xlane.xlu1 %1909 }
 0x411   : > { %v1928_v50 = vmax.f32 %v1910_v19, 1e-24 }
 0x412   : > { %2339 = vst [vmem:[%s3889_s11 + $0x20] sm:$0xff] %v2319_v9   ;;  %v2769_v16 = vpop.eup %2768 }
 0x413   : > { %2774 = vrsqrt.f32 %v1928_v50  ;;  %v1957_v30 = vmul.f32 %v2769_v16, %v3857_v17 }
 0x414   : > { %v1912_v23 = vpop.xlane.xlu0 %1911 }
 0x415   : > { %v1929_v7 = vmax.f32 %v1912_v23, 1e-24 }
 0x416   : > { %v2771_v31 = vpop.eup %2770 }
 0x417   : > { %v1958_v55 = vmul.f32 %v2771_v31, %v3862_v6  ;;  %2776 = vrsqrt.f32 %v1929_v7 }
 0x418   : > { %v1914_v13 = vpop.xlane.xlu1 %1913 }
 0x419   : > { %v2324_v43 = vpack.c.bf16 %v1958_v55, %v1957_v30  ;;  %v1930_v39 = vmax.f32 %v1914_v13, 1e-24 }
 0x41b   : > { %2340 = vst [vmem:[%s3889_s11 + $0x28] sm:$0xff] %v2324_v43   ;;  %2778 = vrsqrt.f32 %v1930_v39 }
 0x41c   : > { %v2773_v34 = vpop.eup %2772 }
 0x41d   : > { %v1959_v24 = vmul.f32 %v2773_v34, %v3867_v41 }
 0x420   : > { %v2775_v18 = vpop.eup %2774 }
 0x421   : > { %v1960_v15 = vmul.f32 %v2775_v18, %v3872_v40 }
 0x423   : > { %v2329_v38 = vpack.c.bf16 %v1960_v15, %v1959_v24 }
 0x424   : > { %v2777_v17 = vpop.eup %2776 }
 0x425   : > { %2341 = vst [vmem:[%s3889_s11 + $0x30] sm:$0xff] %v2329_v38   ;;  %v1961_v29 = vmul.f32 %v2777_v17, %v3877_v22 }
 0x428   : > { %v2779_v6 = vpop.eup %2778 }
 0x429   : > { %v1962_v59 = vmul.f32 %v2779_v6, %v3882_v12 }
 0x42b   : > { %v2334_v41 = vpack.c.bf16 %v1962_v59, %v1961_v29 }
 0x42d   : > { %2342 = vst [vmem:[%s3889_s11 + $0x38] sm:$0xff] %v2334_v41  }
 0x42e   : > { %2899 = shalt.err (!%p2896_p9)
}
 0x42f   : > { %s2900_s13 = scalar_lea.hbm %s3917_s23, 1024  ;;  %s2904_s12 = scalar_lea.hbm %s3970_s7, 2048 }
 0x430   : > { %p2901_p1 = scmp.ne.s32.totalorder %s3917_s23, %s2900_s13  ;;  %p2905_p11 = scmp.lt.s32.totalorder %s3917_s23, %s3970_s7 }
 0x431   : > { %p2906_p13 = scmp.lt.s32.totalorder %s2904_s12, %s2900_s13 }
 0x432   : > { %p2902_p8 = pnand %p2901_p1, %p3990_p6 }
 0x433   : > { %p2907_p2 = por %p2906_p13, %p2905_p11 }
 0x434   : > { %p2903_p10 = pneg %p2902_p8 }
 0x436   : > { %p2908_p4 = pnand %p2907_p2, %p2903_p10 }
 0x438   : > { %2911 = shalt.err (!%p2908_p4)
}
 0x439   : > { %s2971_s22 = smov 64   ;;  %s2972_s1 = smov 4  }
 0x43a   : > { %2437 = dma.vmem_to_hbm [thread:$0]  (%p3990_p6), %s3919_s18, 1024, %s3917_s23, %s2044_s29, %s2971_s22, %s2971_s22, %s2972_s1  }
 0x43b PF: > { %s2072_s28 = sand.u32 1, %s2946_s24   ;;  %p3991_p12 = scmp.ne.s32.totalorder %s3977_s8, 0 }
 0x43c   : > { %p3992_p0 = scmp.ge.s32.totalorder %s2958_s27, 2  ;;  %s2073_s30 = scalar_lea.sflag [#allocation4], %s2072_s28 }
 0x43e   : > { %p2454_p5 = pnand %p3992_p0, %p3991_p12 }
 0x440   : > { %p2455_p3 = pneg %p2454_p5 }
 0x442   : > { %2941 = dma.done.wait (%p2455_p3), %s2073_s30, 1024  }
 0x443   : > { %2943 = vsyncadd (%p2455_p3), %s2073_s30, 4294966272  ;;  %p22_p7 = scmp.ge.s32.totalorder %s3093_s17, 4   ;;  %s3993_s24 = smov %s2950_s25 }
 0x444   : > { %s3994_s25 = smov %s2954_s26  ;;  %s3995_s26 = smov %s3103_s20 }
 0x445   : > { %s3996_s27 = smov %s3093_s17  ;;  %24 = sbr.rel (!%p22_p7) target bundleno = 9 (0x9), region = 105 }
 0x44a   :  { %2078 = vsyncpa [#allocation3], 1 }
 0x44b   :  { %2080 = vsyncpa [#allocation3 + $0x1], 1 }
 0x44c   :  { %2081 = vsyncpa [#allocation6], 1 }
 0x44d   :  { %2082 = vsyncpa [#allocation9], 1 }
 0x44e   :  { %2083 = vsyncpa [#allocation4], 1 }
 0x44f   :  { %2085 = vsyncpa [#allocation4 + $0x1], 1 }

// kernel: tpu_custom_call.1
= control target key start
LH: loop header
LB: loop body
LE: loop exit
PB: predicated region body
PF: predicated region fallthrough
CT: control target
= control target key end

     0   :  { %s3963_s0 = inlined_call_operand.hbm [shape: f32[256,256], index: 0, kind: input, shape index: {}]   ;;  %s3964_s1 = inlined_call_operand.hbm [shape: bf16[256,256], index: 1, kind: input, shape index: {}]   ;;  %s3965_s2 = inlined_call_operand.vmem [shape: f32[1,256], index: 2, kind: input, shape index: {}]   ;;  %s3966_s3 = inlined_call_operand.hbm [shape: bf16[256,256], index: 3, kind: input, shape index: {}]   ;;  %s3967_s4 = inlined_call_operand.vmem [shape: f32[1,256], index: 4, kind: input, shape index: {}]   ;;  %s3968_s5 = inlined_call_operand.hbm [shape: bf16[256,128], index: 5, kind: input, shape index: {}]   ;;  %s3969_s6 = inlined_call_operand.vmem [shape: f32[1,128], index: 6, kind: input, shape index: {}]   ;;  %s3970_s7 = inlined_call_operand.hbm [shape: bf16[256,128], index: 7, kind: output, shape index: {}]  }
   0x1   :  { %3975 = sst [smem:[#allocation15_spill]] %s3964_s1 }
   0x2   :  { %12 = vsyncpa [#allocation3], 0 }
   0x3   :  { %14 = vsyncpa [#allocation3 + $0x1], 0 }
   0x4   :  { %15 = vsyncpa [#allocation6], 0 }
   0x5   :  { %16 = vsyncpa [#allocation9], 0 }
   0x6   :  { %17 = vsyncpa [#allocation4], 0 }
   0x7   :  { %19 = vsyncpa [#allocation4 + $0x1], 0  ;;  %s3013_s24 = smov 0   ;;  %s3015_s25 = smov 0  }
   0x8   :  { %s3017_s26 = smov 0   ;;  %s3019_s27 = smov 0  }
   0x9 LB: > { %s3034_s28 = sadd.s32 4294967295, %s2958_s27   ;;  %s2159_s29 = sadd.s32 4294967294, %s2958_s27   ;;  %s2958_s27 = sphi %s3019_s27, %s3996_s27   ;;  %s2954_s26 = sphi %s3017_s26, %s3995_s26   ;;  %s2950_s25 = sphi %s3015_s25, %s3994_s25   ;;  %s2946_s24 = sphi %s3013_s24, %s3993_s24  }
   0xa   : > { %p45_p0 = scmp.ne.s32.totalorder %s2950_s25, %s2946_s24  ;;  %p3971_p1 = scmp.eq.s32.totalorder %s3034_s28, 0 }
   0xb   : > { %p201_p3 = scmp.eq.s32.totalorder %s2159_s29, 1  ;;  %p2160_p5 = scmp.ge.s32.totalorder %s2958_s27, 1 }
   0xc   : > { %p3043_p4 = por %p3971_p1, %p45_p0  ;;  %p208_p7 = scmp.lt.s32.totalorder %s2958_s27, 3 }
   0xd   : > { %p3048_p6 = por %p201_p3, %p45_p0  ;;  %s2960_s10 = smov [#allocation5]  }
   0xe   : > { %s3976_s30 = scalar_select %p3043_p4, 1, 0 }
   0xf   : > { %s3977_s8 = scalar_select %p3048_p6, 1, 0 }
  0x10   : > { %p3053_p8 = pnand %p2160_p5, %p208_p7  ;;  %s220_s11 = sshll.u32 %s2960_s10, 4  ;;  %s221_s11 = int_to_ptr.vmem [resolvable:$true] %s220_s11 }
  0x11   : > { %s2961_s13 = smov [#allocation7]   ;;  %s2962_s15 = smov [#allocation8]  }
  0x12   : > { %s3978_s9 = scalar_select %p3053_p8, 1, 0 }
  0x13   : > { %p2439_p9 = pneg %p3053_p8  ;;  %s236_s14 = sshll.u32 %s2961_s13, 4  ;;  %s237_s14 = int_to_ptr.vmem [resolvable:$true] %s236_s14 }
  0x14   : > { %s252_s16 = sshll.u32 %s2962_s15, 4  ;;  %s2791_s17 = scalar_lea.vmem %s221_s11, 4096  ;;  %s253_s16 = int_to_ptr.vmem [resolvable:$true] %s252_s16 }
  0x15   : > { %p3062_p11 = pnand %p2439_p9, %p3971_p1  ;;  %p2792_p13 = scmp.ne.s32.totalorder %s221_s11, %s2791_s17 }
  0x16   : > { %p2799_p5 = scmp.lt.s32.totalorder %s221_s11, %s221_s11  ;;  %p2800_p7 = scmp.lt.s32.totalorder %s2791_s17, %s2791_s17 }
  0x17   : > { %p2782_p12 = pneg %p3062_p11 }
  0x18   : > { %p2801_p9 = por %p2800_p7, %p2799_p5 }
  0x19   : > { %p2794_p0 = pnand %p2792_p13, %p2782_p12 }
  0x1b   : > { %p2795_p3 = pneg %p2794_p0 }
  0x1d   : > { %p2802_p10 = pnand %p2801_p9, %p2795_p3 }
  0x1f   : > { %2805 = shalt.err (!%p2802_p10)
}
  0x20   : > { %s2963_s18 = smov 128   ;;  %s2964_s19 = smov 8  }
  0x21   : > { %s3980_s1 = sld [smem:[#allocation15_spill]]  ;;  %s2817_s22 = scalar_lea.vmem %s237_s14, 4096 }
  0x22   : > { %p2818_p1 = scmp.ne.s32.totalorder %s237_s14, %s2817_s22  ;;  %p2825_p2 = scmp.lt.s32.totalorder %s237_s14, %s237_s14 }
  0x23   : > { %p2826_p6 = scmp.lt.s32.totalorder %s2817_s22, %s2817_s22 }
  0x24   : > { %p2820_p13 = pnand %p2818_p1, %p2782_p12 }
  0x25   : > { %p2827_p5 = por %p2826_p6, %p2825_p2 }
  0x26   : > { %p2821_p0 = pneg %p2820_p13 }
  0x27   : > { %2442 = dma.hbm_to_vmem [thread:$0]  (!%p3062_p11), %s3980_s1, 4096, %s221_s11, [#allocation6], %s2963_s18, %s2963_s18, %s2964_s19  }
  0x28   : > { %p2828_p3 = pnand %p2827_p5, %p2821_p0 }
  0x2a   : > { %2831 = shalt.err (!%p2828_p3)
}
  0x2b   : > { %2445 = dma.hbm_to_vmem [thread:$0]  (!%p3062_p11), %s3966_s3, 4096, %s237_s14, [#allocation6], %s2963_s18, %s2963_s18, %s2964_s19  }
  0x2c   : > { %s2843_s10 = scalar_lea.vmem %s253_s16, 2048  ;;  %p2851_p9 = scmp.lt.s32.totalorder %s253_s16, %s253_s16 }
  0x2d   : > { %p2844_p10 = scmp.ne.s32.totalorder %s253_s16, %s2843_s10  ;;  %p2852_p13 = scmp.lt.s32.totalorder %s2843_s10, %s2843_s10 }
  0x2f   : > { %p2846_p7 = pnand %p2844_p10, %p2782_p12  ;;  %p2853_p4 = por %p2852_p13, %p2851_p9 }
  0x31   : > { %p2847_p1 = pneg %p2846_p7 }
  0x33   : > { %p2854_p2 = pnand %p2853_p4, %p2847_p1 }
  0x35   : > { %2857 = shalt.err (!%p2854_p2)
}
  0x36   : > { %s2965_s11 = smov 64   ;;  %s2966_s13 = smov 4  }
  0x37   : > { %2448 = dma.hbm_to_vmem [thread:$0]  (!%p3062_p11), %s3968_s5, 2048, %s253_s16, [#allocation9], %s2965_s11, %s2965_s11, %s2966_s13  }
  0x38   : > { %s3093_s17 = sadd.s32 1, %s2958_s27   ;;  %s32_s19 = sadd.s32 1, %s2954_s26 }
  0x39   : > { %s29_s18 = ssub.s32 %s2958_s27, %s3093_s17  ;;  %p39_p6 = scmp.ne.s32.totalorder %s2954_s26, %s2950_s25 }
  0x3a   : > { %p30_p4 = scmp.eq.s32.totalorder %s29_s18, 0  ;;  %p40_p12 = scmp.eq.s32.totalorder %s2958_s27, 0 }
  0x3b   : > { %p2460_p0 = scmp.lt.s32.totalorder %s2958_s27, 2  ;;  %p3981_p3 = scmp.eq.s32.totalorder %s3034_s28, 1 }
  0x3c   : > { %s3103_s20 = scalar_select %p30_p4, %s2954_s26, %s32_s19  }
  0x3d   : > { %p41_p5 = por %p40_p12, %p39_p6  ;;  %p3107_p10 = por %p3981_p3, %p39_p6 }
  0x3e   : > { %s269_s12 = sand.u32 1, %s2954_s26   ;;  %s2278_s22 = sshll.u32 %s2958_s27, 12 }
  0x3f   : > { %s3982_s21 = scalar_select %p3107_p10, 1, 0 }
  0x40   : > { %s2165_s16 = sshll.u32 %s269_s12, 8  ;;  %s3116_s10 = scalar_lea.hbm %s3963_s0, %s2278_s22 }
  0x41   : > { %s273_s11 = scalar_lea.vmem [#allocation2], %s2165_s16  ;;  %p3118_p11 = pnand %p2460_p0, %p41_p5 }
  0x42   : > { %s281_s13 = sshll.u32 %s273_s11, 4  ;;  %s3124_s15 = scalar_lea.sflag [#allocation3], %s269_s12  ;;  %s3122_s13 = int_to_ptr.vmem [resolvable:$true] %s281_s13 }
  0x43   : > { %s2858_s18 = scalar_lea.hbm %s3116_s10, 4096  ;;  %p2860_p1 = pneg %p3118_p11 }
  0x44   : > { %p2859_p7 = scmp.ne.s32.totalorder %s3116_s10, %s2858_s18  ;;  %s2863_s16 = scalar_lea.hbm %s3963_s0, 8192 }
  0x45   : > { %p2864_p2 = scmp.lt.s32.totalorder %s3116_s10, %s3963_s0  ;;  %p2865_p4 = scmp.lt.s32.totalorder %s2863_s16, %s2858_s18 }
  0x46   : > { %p2861_p9 = pnand %p2860_p1, %p2859_p7 }
  0x47   : > { %p2866_p6 = por %p2865_p4, %p2864_p2 }
  0x48   : > { %p2862_p13 = pneg %p2861_p9 }
  0x4a   : > { %p2867_p12 = pnand %p2866_p6, %p2862_p13 }
  0x4c   : > { %2870 = shalt.err (!%p2867_p12)
}
  0x4d   : > { %s2871_s12 = scalar_lea.vmem %s3122_s13, 4096  ;;  %s2967_s11 = smov [#allocation2]  }
  0x4e   : > { %p2872_p0 = scmp.ne.s32.totalorder %s3122_s13, %s2871_s12  ;;  %s2876_s1 = sshll.u32 %s2967_s11, 4  ;;  %s2877_s1 = int_to_ptr.vmem [resolvable:$false] %s2876_s1 }
  0x4f   : > { %s2878_s19 = scalar_lea.vmem %s2877_s1, 8192  ;;  %p2879_p7 = scmp.lt.s32.totalorder %s3122_s13, %s2877_s1 }
  0x50   : > { %p2874_p5 = pnand %p2872_p0, %p2860_p1  ;;  %p2880_p9 = scmp.lt.s32.totalorder %s2878_s19, %s2871_s12 }
  0x52   : > { %p2875_p3 = pneg %p2874_p5  ;;  %p2881_p10 = por %p2880_p9, %p2879_p7 }
  0x54   : > { %p2882_p8 = pnand %p2881_p10, %p2875_p3 }
  0x56   : > { %2885 = shalt.err (!%p2882_p8)
}
  0x57   : > { %s2968_s18 = smov 256   ;;  %s2969_s22 = smov 16  }
  0x58   : > { %2452 = dma.hbm_to_vmem [thread:$0]  (!%p3118_p11), %s3116_s10, 4096, %s3122_s13, %s3124_s15, %s2968_s18, %s2968_s18, %s2969_s22  }
  0x59   : > { %p3984_p1 = scmp.ne.s32.totalorder %s3978_s9, 0 }
  0x5a   : > { %s3148_s16 = sand.u32 (!%p3984_p1), 1, %s2950_s25   ;;  %p3985_p8 = scmp.ne.s32.totalorder (!%p3984_p1), %s3976_s30, 0 }
  0x5b   : > { %293 = sbr.rel (%p3984_p1) target bundleno = 1083 (0x43b), region = 48  ;;  %s2170_s1 = sshll.u32 (!%p3984_p1), %s3148_s16, 8 }
  0x5c   : > { %s296_s23 = scalar_lea.sflag (!%p3984_p1), [#allocation3], %s3148_s16  ;;  %s3152_s29 = scalar_lea.vmem (!%p3984_p1), [#allocation2], %s2170_s1 }
  0x60   : > { %2929 = dma.done.wait (%p3985_p8), %s296_s23, 4096  }
  0x61   : > { %2931 = vsyncadd (%p3985_p8), %s296_s23, 4294963200  ;;  %p3986_p10 = scmp.eq.s32.totalorder %s3034_s28, 0 }
  0x63   : > { %2933 = dma.done.wait (%p3986_p10), [#allocation6], 8192   ;;  %p3987_p11 = pmov %p3986_p10 }
  0x64   : > { %p3988_p13 = pmov %p3986_p10 }
  0x65   : > { %2935 = vsyncadd (%p3987_p11), [#allocation6], 4294959104 }
  0x66   : > { %2937 = dma.done.wait (%p3988_p13), [#allocation9], 2048   ;;  %p3989_p2 = pmov %p3986_p10 }
  0x67   : > { %v2508_v0 = vld [vmem:[#allocation5 + $0x74] ss:$8 sps:$4 sm:$0xff]   ;;  %v2510_v1 = vld [vmem:[#allocation5 + $0x70] ss:$8 sps:$4 sm:$0xff]   ;;  %v2511_v2 = vld [vmem:[#allocation5 + $0x64] ss:$8 sps:$4 sm:$0xff]  }
  0x68   : > { %2939 = vsyncadd (%p3989_p2), [#allocation9], 4294965248  ;;  %597 = vmatprep.subr.bf16.mxu0 %v2508_v0  ;;  %v2513_v3 = vld [vmem:[#allocation5 + $0x60] ss:$8 sps:$4 sm:$0xff]   ;;  %v2514_v4 = vld [vmem:[#allocation5 + $0x54] ss:$8 sps:$4 sm:$0xff]  }
  0x69   : > { %598 = vmatpush1.bf16.msra.mxu0 %v2510_v1  ;;  %v2516_v5 = vld [vmem:[#allocation5 + $0x50] ss:$8 sps:$4 sm:$0xff]   ;;  %v2517_v6 = vld [vmem:[#allocation5 + $0x44] ss:$8 sps:$4 sm:$0xff]   ;;  %v2519_v7 = vld [vmem:[#allocation5 + $0x40] ss:$8 sps:$4 sm:$0xff]  }
  0x6a   : > { %599 = vmatprep.subr.bf16.mxu0 %v2511_v2  ;;  %v2520_v8 = vld [vmem:[#allocation5 + $0x34] ss:$8 sps:$4 sm:$0xff]   ;;  %v2522_v9 = vld [vmem:[#allocation5 + $0x30] ss:$8 sps:$4 sm:$0xff]   ;;  %v2523_v10 = vld [vmem:[#allocation5 + $0x24] ss:$8 sps:$4 sm:$0xff]  }
  0x6b   : > { %v2525_v11 = vld [vmem:[#allocation5 + $0x20] ss:$8 sps:$4 sm:$0xff]   ;;  %v2526_v12 = vld [vmem:[#allocation5 + $0x14] ss:$8 sps:$4 sm:$0xff]   ;;  %v2528_v16 = vld [vmem:[#allocation5 + $0x10] ss:$8 sps:$4 sm:$0xff]  }
  0x6c   : > { %v346_v13 = vld [vmem:[%s3152_s29 + $0x8] sm:$0xff]  ;;  %v348_v14 = vld [vmem:[%s3152_s29 + $0x18] sm:$0xff]  ;;  %v345_v47 = vld [vmem:[%s3152_s29] sm:$0xff]  ;;  %s2174_s12 = sshll.u32 %s3148_s16, 6  ;;  %s2295_s19 = sshll.u32 %s3034_s28, 10 }
  0x6d   : > { %600 = vmatpush1.bf16.msra.mxu0 %v2513_v3  ;;  %v378_v15 = vpack.c.bf16 %v348_v14, %v346_v13  ;;  %v2529_v17 = vld [vmem:[#allocation5 + $0x4] ss:$8 sps:$4 sm:$0xff]   ;;  %v2531_v18 = vld [vmem:[#allocation5] ss:$8 sps:$4 sm:$0xff]   ;;  %v2532_v19 = vld [vmem:[#allocation5 + $0xf4] ss:$8 sps:$4 sm:$0xff]   ;;  %s3917_s23 = scalar_lea.hbm %s3970_s7, %s2295_s19 }
  0x6e   : > { %601 = vmatprep.subr.bf16.mxu0 %v2514_v4  ;;  %v2534_v20 = vld [vmem:[#allocation5 + $0xf0] ss:$8 sps:$4 sm:$0xff]   ;;  %v2535_v21 = vld [vmem:[#allocation5 + $0xe4] ss:$8 sps:$4 sm:$0xff]   ;;  %v2556_v22 = vld [vmem:[#allocation7 + $0x74] ss:$8 sps:$4 sm:$0xff]  }
  0x6f   : > { %629 = vmatprep.mubr.bf16.mxu0 %v378_v15  ;;  %v2558_v23 = vld [vmem:[#allocation7 + $0x70] ss:$8 sps:$4 sm:$0xff]   ;;  %v2537_v24 = vld [vmem:[#allocation5 + $0xe0] ss:$8 sps:$4 sm:$0xff]   ;;  %1218 = vmatprep.subr.bf16.mxu1 %v2556_v22  ;;  %v2559_v25 = vld [vmem:[#allocation7 + $0x64] ss:$8 sps:$4 sm:$0xff]  }
  0x70   : > { %v2538_v26 = vld [vmem:[#allocation5 + $0xd4] ss:$8 sps:$4 sm:$0xff]   ;;  %1219 = vmatpush1.bf16.msra.mxu1 %v2558_v23  ;;  %v2561_v27 = vld [vmem:[#allocation7 + $0x60] ss:$8 sps:$4 sm:$0xff]   ;;  %v2540_v29 = vld [vmem:[#allocation5 + $0xd0] ss:$8 sps:$4 sm:$0xff]  }
  0x71   : > { %602 = vmatpush1.bf16.msra.mxu0 %v2516_v5  ;;  %1220 = vmatprep.subr.bf16.mxu1 %v2559_v25  ;;  %v2562_v28 = vld [vmem:[#allocation7 + $0x54] ss:$8 sps:$4 sm:$0xff]   ;;  %v2541_v30 = vld [vmem:[#allocation5 + $0xc4] ss:$8 sps:$4 sm:$0xff]   ;;  %v2564_v31 = vld [vmem:[#allocation7 + $0x50] ss:$8 sps:$4 sm:$0xff]  }
  0x72   : > { %603 = vmatprep.subr.bf16.mxu0 %v2517_v6  ;;  %v2565_v32 = vld [vmem:[#allocation7 + $0x44] ss:$8 sps:$4 sm:$0xff]   ;;  %v2543_v33 = vld [vmem:[#allocation5 + $0xc0] ss:$8 sps:$4 sm:$0xff]   ;;  %v2544_v35 = vld [vmem:[#allocation5 + $0xb4] ss:$8 sps:$4 sm:$0xff]  }
  0x73   : > { %v2567_v34 = vld [vmem:[#allocation7 + $0x40] ss:$8 sps:$4 sm:$0xff]   ;;  %v2568_v36 = vld [vmem:[#allocation7 + $0x34] ss:$8 sps:$4 sm:$0xff]   ;;  %v2546_v37 = vld [vmem:[#allocation5 + $0xb0] ss:$8 sps:$4 sm:$0xff]  }
  0x74   : > { %1221 = vmatpush1.bf16.msra.mxu1 %v2561_v27  ;;  %v2570_v38 = vld [vmem:[#allocation7 + $0x30] ss:$8 sps:$4 sm:$0xff]   ;;  %v2547_v39 = vld [vmem:[#allocation5 + $0xa4] ss:$8 sps:$4 sm:$0xff]   ;;  %v2549_v41 = vld [vmem:[#allocation5 + $0xa0] ss:$8 sps:$4 sm:$0xff]  }
  0x75   : > { %604 = vmatpush1.bf16.msra.mxu0 %v2519_v7  ;;  %1222 = vmatprep.subr.bf16.mxu1 %v2562_v28  ;;  %v2571_v40 = vld [vmem:[#allocation7 + $0x24] ss:$8 sps:$4 sm:$0xff]   ;;  %v2573_v42 = vld [vmem:[#allocation7 + $0x20] ss:$8 sps:$4 sm:$0xff]   ;;  %v2550_v43 = vld [vmem:[#allocation5 + $0x94] ss:$8 sps:$4 sm:$0xff]  }
  0x76   : > { %605 = vmatprep.subr.bf16.mxu0 %v2520_v8  ;;  %v2552_v44 = vld [vmem:[#allocation5 + $0x90] ss:$8 sps:$4 sm:$0xff]   ;;  %v2553_v45 = vld [vmem:[#allocation5 + $0x84] ss:$8 sps:$4 sm:$0xff]   ;;  %v2555_v46 = vld [vmem:[#allocation5 + $0x80] ss:$8 sps:$4 sm:$0xff]  }
  0x77   : > { %v347_v48 = vld [vmem:[%s3152_s29 + $0x10] sm:$0xff]  ;;  %v350_v49 = vld [vmem:[%s3152_s29 + $0x28] sm:$0xff]  ;;  %v352_v50 = vld [vmem:[%s3152_s29 + $0x38] sm:$0xff]  ;;  %s3889_s11 = scalar_lea.vmem [#allocation10], %s2174_s12  ;;  %p3990_p6 = scmp.ne.s32.totalorder %s3982_s21, 0 }
  0x78   : > { %1223 = vmatpush1.bf16.msra.mxu1 %v2564_v31  ;;  %v377_v51 = vpack.c.bf16 %v347_v48, %v345_v47  ;;  %v380_v52 = vpack.c.bf16 %v352_v50, %v350_v49  ;;  %v349_v53 = vld [vmem:[%s3152_s29 + $0x20] sm:$0xff]  ;;  %v351_v54 = vld [vmem:[%s3152_s29 + $0x30] sm:$0xff]  ;;  %v354_v55 = vld [vmem:[%s3152_s29 + $0x48] sm:$0xff]  ;;  %s2057_s18 = sshll.u32 %s3889_s11, 4  ;;  %s2970_s30 = smov [#allocation10]   ;;  %s3919_s18 = int_to_ptr.vmem [resolvable:$true] %s2057_s18 }
  0x79   : > { %606 = vmatpush1.bf16.msra.mxu0 %v2522_v9  ;;  %1224 = vmatprep.subr.bf16.mxu1 %v2565_v32  ;;  %v356_v56 = vld [vmem:[%s3152_s29 + $0x58] sm:$0xff]  ;;  %v379_v57 = vpack.c.bf16 %v351_v54, %v349_v53  ;;  %v353_v59 = vld [vmem:[%s3152_s29 + $0x40] sm:$0xff]  ;;  %v355_v60 = vld [vmem:[%s3152_s29 + $0x50] sm:$0xff]  ;;  %s2886_s28 = scalar_lea.vmem %s3919_s18, 1024  ;;  %s2890_s9 = sshll.u32 %s2970_s30, 4  ;;  %s2891_s9 = int_to_ptr.vmem [resolvable:$false] %s2890_s9 }
  0x7a   : > { %607 = vmatprep.subr.bf16.mxu0 %v2523_v10  ;;  %v382_v58 = vpack.c.bf16 %v356_v56, %v354_v55  ;;  %v358_v61 = vld [vmem:[%s3152_s29 + $0x68] sm:$0xff]  ;;  %v360_v62 = vld [vmem:[%s3152_s29 + $0x78] sm:$0xff]  ;;  %v381_v63 = vpack.c.bf16 %v355_v60, %v353_v59  ;;  %v357_v1 = vld [vmem:[%s3152_s29 + $0x60] sm:$0xff]  ;;  %p2887_p4 = scmp.ne.s32.totalorder %s3919_s18, %s2886_s28  ;;  %s2892_s10 = scalar_lea.vmem %s2891_s9, 2048 }
  0x7b   : > { %v384_v0 = vpack.c.bf16 %v360_v62, %v358_v61  ;;  %v359_v2 = vld [vmem:[%s3152_s29 + $0x70] sm:$0xff]  ;;  %v362_v3 = vld [vmem:[%s3152_s29 + $0x88] sm:$0xff]  ;;  %v364_v4 = vld [vmem:[%s3152_s29 + $0x98] sm:$0xff]  ;;  %p2893_p5 = scmp.lt.s32.totalorder %s3919_s18, %s2891_s9  ;;  %p2894_p3 = scmp.lt.s32.totalorder %s2892_s10, %s2886_s28 }
  0x7c   : > { %1225 = vmatpush1.bf16.msra.mxu1 %v2567_v34  ;;  %v383_v5 = vpack.c.bf16 %v359_v2, %v357_v1  ;;  %v386_v6 = vpack.c.bf16 %v364_v4, %v362_v3  ;;  %v361_v7 = vld [vmem:[%s3152_s29 + $0x80] sm:$0xff]  ;;  %v363_v8 = vld [vmem:[%s3152_s29 + $0x90] sm:$0xff]  ;;  %v366_v9 = vld [vmem:[%s3152_s29 + $0xa8] sm:$0xff]  ;;  %p2888_p12 = pnand %p2887_p4, %p3990_p6 }
  0x7d   : > { %608 = vmatpush1.bf16.msra.mxu0 %v2525_v11  ;;  %1226 = vmatprep.subr.bf16.mxu1 %v2568_v36  ;;  %v368_v10 = vld [vmem:[%s3152_s29 + $0xb8] sm:$0xff]  ;;  %v385_v11 = vpack.c.bf16 %v363_v8, %v361_v7  ;;  %v365_v13 = vld [vmem:[%s3152_s29 + $0xa0] sm:$0xff]  ;;  %v367_v14 = vld [vmem:[%s3152_s29 + $0xb0] sm:$0xff]  ;;  %p2895_p7 = por %p2894_p3, %p2893_p5 }
  0x7e   : > { %609 = vmatprep.subr.bf16.mxu0 %v2526_v12  ;;  %v388_v12 = vpack.c.bf16 %v368_v10, %v366_v9  ;;  %v370_v15 = vld [vmem:[%s3152_s29 + $0xc8] sm:$0xff]  ;;  %v376_v22 = vld [vmem:[%s3152_s29 + $0xf8] sm:$0xff]  ;;  %v373_v25 = vld [vmem:[%s3152_s29 + $0xe0] sm:$0xff]  ;;  %p2889_p0 = pneg %p2888_p12 }
  0x7f   : > { %v2574_v28 = vld [vmem:[#allocation7 + $0x14] ss:$8 sps:$4 sm:$0xff]   ;;  %v2579_v31 = vld [vmem:[#allocation7] ss:$8 sps:$4 sm:$0xff]   ;;  %v2583_v34 = vld [vmem:[#allocation7 + $0xe4] ss:$8 sps:$4 sm:$0xff]  }
  0x80   : > { %1227 = vmatpush1.bf16.msra.mxu1 %v2570_v38  ;;  %v2580_v32 = vld [vmem:[#allocation7 + $0xf4] ss:$8 sps:$4 sm:$0xff]   ;;  %v2589_v38 = vld [vmem:[#allocation7 + $0xc4] ss:$8 sps:$4 sm:$0xff]   ;;  %v2603_v47 = vld [vmem:[#allocation7 + $0x80] ss:$8 sps:$4 sm:$0xff]   ;;  %p2896_p9 = pnand %p2895_p7, %p2889_p0 }
  0x81   : > { %610 = vmatpush1.bf16.msra.mxu0 %v2528_v16  ;;  %1228 = vmatprep.subr.bf16.mxu1 %v2571_v40  ;;  %v372_v16 = vld [vmem:[%s3152_s29 + $0xd8] sm:$0xff]  ;;  %v3200_v50 = vld [vmem:[#allocation8 + $0x70] sm:$0xff]   ;;  %v425_v54 = vld [vmem:[%s3965_s2] sm:$0x3] }
  0x82   : > { %611 = vmatprep.subr.bf16.mxu0 %v2529_v17  ;;  %v387_v17 = vpack.c.bf16 %v367_v14, %v365_v13  ;;  %v2586_v36 = vld [vmem:[#allocation7 + $0xd4] ss:$8 sps:$4 sm:$0xff]  }
  0x83   : > { %v2592_v40 = vld [vmem:[#allocation7 + $0xb4] ss:$8 sps:$4 sm:$0xff]  }
  0x84   : > { %1229 = vmatpush1.bf16.msra.mxu1 %v2573_v42  ;;  %v2595_v42 = vld [vmem:[#allocation7 + $0xa4] ss:$8 sps:$4 sm:$0xff]   ;;  %v2604_v48 = vld [vmem:[#allocation8 + $0x78] sm:$0xff]  }
  0x85   : > { %612 = vmatpush1.bf16.msra.mxu0 %v2531_v18  ;;  %v390_v18 = vpack.c.bf16 %v372_v16, %v370_v15  ;;  %1230 = vmatprep.subr.bf16.mxu1 %v2574_v28  ;;  %v3198_v49 = vld [vmem:[#allocation8 + $0x38] sm:$0xff]  }
  0x86   : > { %613 = vmatprep.subr.bf16.mxu0 %v2532_v19  ;;  %v369_v19 = vld [vmem:[%s3152_s29 + $0xc0] sm:$0xff] }
  0x89   : > { %614 = vmatpush2.bf16.msra.mxu0 %v2534_v20  ;;  %v371_v20 = vld [vmem:[%s3152_s29 + $0xd0] sm:$0xff] }
  0x8a   : > { %615 = vmatprep.subr.bf16.mxu0 %v2535_v21  ;;  %v374_v21 = vld [vmem:[%s3152_s29 + $0xe8] sm:$0xff]  ;;  %v389_v23 = vpack.c.bf16 %v371_v20, %v369_v19 }
  0x8d   : > { %616 = vmatpush2.bf16.msra.mxu0 %v2537_v24  ;;  %v392_v24 = vpack.c.bf16 %v376_v22, %v374_v21 }
  0x8e   : > { %617 = vmatprep.subr.bf16.mxu0 %v2538_v26  ;;  %v375_v26 = vld [vmem:[%s3152_s29 + $0xf0] sm:$0xff]  ;;  %s2044_s29 = scalar_lea.sflag [#allocation4], %s3148_s16 }
  0x8f   : > { %v391_v27 = vpack.c.bf16 %v375_v26, %v373_v25 }
  0x91   : > { %618 = vmatpush2.bf16.msra.mxu0 %v2540_v29  ;;  %v2576_v29 = vld [vmem:[#allocation7 + $0x10] ss:$8 sps:$4 sm:$0xff]  }
  0x92   : > { %619 = vmatprep.subr.bf16.mxu0 %v2541_v30  ;;  %1231 = vmatpush1.bf16.msra.mxu1 %v2576_v29  ;;  %v2577_v30 = vld [vmem:[#allocation7 + $0x4] ss:$8 sps:$4 sm:$0xff]  }
  0x93   : > { %1232 = vmatprep.subr.bf16.mxu1 %v2577_v30 }
  0x95   : > { %620 = vmatpush2.bf16.msra.mxu0 %v2543_v33  ;;  %v2582_v33 = vld [vmem:[#allocation7 + $0xf0] ss:$8 sps:$4 sm:$0xff]  }
  0x96   : > { %621 = vmatprep.subr.bf16.mxu0 %v2544_v35  ;;  %1233 = vmatpush1.bf16.msra.mxu1 %v2579_v31  ;;  %v2585_v35 = vld [vmem:[#allocation7 + $0xe0] ss:$8 sps:$4 sm:$0xff]  }
  0x97   : > { %1234 = vmatprep.subr.bf16.mxu1 %v2580_v32 }
  0x99   : > { %622 = vmatpush2.bf16.msra.mxu0 %v2546_v37  ;;  %v2588_v37 = vld [vmem:[#allocation7 + $0xd0] ss:$8 sps:$4 sm:$0xff]  }
  0x9a   : > { %623 = vmatprep.subr.bf16.mxu0 %v2547_v39  ;;  %1235 = vmatpush2.bf16.msra.mxu1 %v2582_v33  ;;  %v2591_v39 = vld [vmem:[#allocation7 + $0xc0] ss:$8 sps:$4 sm:$0xff]  }
  0x9b   : > { %1236 = vmatprep.subr.bf16.mxu1 %v2583_v34 }
  0x9d   : > { %624 = vmatpush2.bf16.msra.mxu0 %v2549_v41  ;;  %v2594_v41 = vld [vmem:[#allocation7 + $0xb0] ss:$8 sps:$4 sm:$0xff]  }
  0x9e   : > { %625 = vmatprep.subr.bf16.mxu0 %v2550_v43  ;;  %1237 = vmatpush2.bf16.msra.mxu1 %v2585_v35  ;;  %v2597_v43 = vld [vmem:[#allocation7 + $0xa0] ss:$8 sps:$4 sm:$0xff]  }
  0x9f   : > { %1238 = vmatprep.subr.bf16.mxu1 %v2586_v36 }
  0xa1   : > { %626 = vmatpush2.bf16.msra.mxu0 %v2552_v44  ;;  %v2598_v44 = vld [vmem:[#allocation7 + $0x94] ss:$8 sps:$4 sm:$0xff]  }
  0xa2   : > { %627 = vmatprep.subr.bf16.mxu0 %v2553_v45  ;;  %1239 = vmatpush2.bf16.msra.mxu1 %v2588_v37  ;;  %v2600_v45 = vld [vmem:[#allocation7 + $0x90] ss:$8 sps:$4 sm:$0xff]  }
  0xa3   : > { %1240 = vmatprep.subr.bf16.mxu1 %v2589_v38 }
  0xa5   : > { %628 = vmatpush2.bf16.msra.mxu0 %v2555_v46  ;;  %v2601_v46 = vld [vmem:[#allocation7 + $0x84] ss:$8 sps:$4 sm:$0xff]  }
  0xa6   : > { %1241 = vmatpush2.bf16.msra.mxu1 %v2591_v39  ;;  %2343 = vmatprep.subr.bf16.mxu0 %v2604_v48 }
  0xa7   : > { %1242 = vmatprep.subr.bf16.mxu1 %v2592_v40 }
  0xa8   : > { %630 = vmatmul.mubr.bf16.vlgmr.msra.gmra.mxu0 %v377_v51  ;;  %v427_v51 = vlaneseq }
  0xa9   : > { %639 = vmatprep.mubr.bf16.mxu0 %v380_v52  ;;  %2344 = vmatpush3.bf16.msra.mxu0 %v3198_v49 }
  0xaa   : > { %1243 = vmatpush2.bf16.msra.mxu1 %v2594_v41  ;;  %2345 = vmatprep.subr.bf16.mxu0 %v3200_v50  ;;  %v3204_v52 = vshrl.u32 %v427_v51, 7 }
  0xab   : > { %1244 = vmatprep.subr.bf16.mxu1 %v2595_v42 }
  0xac   : > { %v429_v53 = vsub.s32 0, %v3204_v52  ;;  %v433_v55 = vsub.s32 1, %v3204_v52 }
  0xae   : > { %1245 = vmatpush2.bf16.msra.mxu1 %v2597_v43  ;;  %v3213_v56 = vrot.slane %v425_v54, %v429_v53 }
  0xaf   : > { %1246 = vmatprep.subr.bf16.mxu1 %v2598_v44 }
  0xb0   : > { %640 = vmatmul.mubr.bf16.gmra.mxu0 %v379_v57  ;;  %v3217_v57 = vrot.slane %v425_v54, %v433_v55 }
  0xb1   : > { %649 = vmatprep.mubr.bf16.mxu0 %v382_v58 }
  0xb2   : > { %1247 = vmatpush2.bf16.msra.mxu1 %v2600_v45 }
  0xb3   : > { %1248 = vmatprep.subr.bf16.mxu1 %v2601_v46 }
  0xb6   : > { %1249 = vmatpush2.bf16.msra.mxu1 %v2603_v47 }
  0xb7   : > { %2407 = vmatprep.subr.bf16.mxu1 %v2604_v48 }
  0xb8   : > { %650 = vmatmul.mubr.bf16.gmra.mxu0 %v381_v63 }
  0xb9   : > { %659 = vmatprep.mubr.bf16.mxu0 %v384_v0 }
  0xc0   : > { %660 = vmatmul.mubr.bf16.gmra.mxu0 %v383_v5 }
  0xc1   : > { %669 = vmatprep.mubr.bf16.mxu0 %v386_v6 }
  0xc8   : > { %670 = vmatmul.mubr.bf16.gmra.mxu0 %v385_v11 }
  0xc9   : > { %679 = vmatprep.mubr.bf16.mxu0 %v388_v12 }
  0xd0   : > { %680 = vmatmul.mubr.bf16.gmra.mxu0 %v387_v17 }
  0xd1   : > { %689 = vmatprep.mubr.bf16.mxu0 %v390_v18 }
  0xd8   : > { %690 = vmatmul.mubr.bf16.gmra.mxu0 %v389_v23 }
  0xd9   : > { %699 = vmatprep.mubr.bf16.mxu0 %v392_v24 }
  0xe0   : > { %700 = vmatmul.mubr.bf16.gmra.mxu0 %v391_v27 }
 0x168   : > { %v631_v58 = vpop.f32.mrf.mxu0 }
 0x169   : > { %v3220_v59 = vadd.f32 %v631_v58, %v3213_v56 }
 0x16a   : > { %v633_v60 = vpop.f32.mrf.mxu0 }
 0x16b   : > { %v742_v61 = vmul.f32 0.044715, %v3220_v59  ;;  %v3224_v62 = vadd.f32 %v633_v60, %v3217_v57 }
 0x16c   : > { %v635_v63 = vpop.f32.mrf.mxu0 }
 0x16d   : > { %v774_v0 = vmul.f32 %v742_v61, %v3220_v59  ;;  %v743_v1 = vmul.f32 0.044715, %v3224_v62  ;;  %v3229_v2 = vadd.f32 %v635_v63, %v3213_v56 }
 0x16e   : > { %v637_v3 = vpop.f32.mrf.mxu0 }
 0x16f   : > { %v806_v4 = vmul.f32 %v774_v0, %v3220_v59  ;;  %v744_v5 = vmul.f32 0.044715, %v3229_v2  ;;  %v3234_v6 = vadd.f32 %v637_v3, %v3217_v57  ;;  %v775_v7 = vmul.f32 %v743_v1, %v3224_v62 }
 0x170   : > { %v641_v8 = vpop.f32.mrf.mxu0 }
 0x171   : > { %v776_v9 = vmul.f32 %v744_v5, %v3229_v2  ;;  %v745_v10 = vmul.f32 0.044715, %v3234_v6  ;;  %v3240_v11 = vadd.f32 %v641_v8, %v3213_v56  ;;  %v807_v13 = vmul.f32 %v775_v7, %v3224_v62 }
 0x172   : > { %v643_v12 = vpop.f32.mrf.mxu0  ;;  %v838_v14 = vadd.f32 %v806_v4, %v3220_v59 }
 0x173   : > { %v808_v15 = vmul.f32 %v776_v9, %v3229_v2  ;;  %v746_v16 = vmul.f32 0.044715, %v3240_v11  ;;  %v3247_v17 = vadd.f32 %v643_v12, %v3217_v57  ;;  %v777_v18 = vmul.f32 %v745_v10, %v3234_v6 }
 0x174   : > { %v645_v19 = vpop.f32.mrf.mxu0  ;;  %v839_v20 = vadd.f32 %v807_v13, %v3224_v62  ;;  %v870_v21 = vmul.f32 0.7978846, %v838_v14 }
 0x175   : > { %v778_v22 = vmul.f32 %v746_v16, %v3240_v11  ;;  %v747_v23 = vmul.f32 0.044715, %v3247_v17  ;;  %v3254_v24 = vadd.f32 %v645_v19, %v3213_v56  ;;  %v809_v25 = vmul.f32 %v777_v18, %v3234_v6 }
 0x176   : > { %v647_v26 = vpop.f32.mrf.mxu0  ;;  %v871_v27 = vmul.f32 0.7978846, %v839_v20  ;;  %v840_v28 = vadd.f32 %v808_v15, %v3229_v2  ;;  %2620 = vtanh.f32 %v870_v21  ;;  %v711_v16 = vmul.f32 0.5, %v3224_v62 }
 0x177   : > { %v810_v29 = vmul.f32 %v778_v22, %v3240_v11  ;;  %v779_v30 = vmul.f32 %v747_v23, %v3247_v17  ;;  %v748_v31 = vmul.f32 0.044715, %v3254_v24  ;;  %v3262_v32 = vadd.f32 %v647_v26, %v3217_v57 }
 0x178   : > { %v651_v33 = vpop.f32.mrf.mxu0  ;;  %v841_v34 = vadd.f32 %v809_v25, %v3234_v6  ;;  %2622 = vtanh.f32 %v871_v27  ;;  %v872_v35 = vmul.f32 0.7978846, %v840_v28  ;;  %v710_v18 = vmul.f32 0.5, %v3220_v59 }
 0x179   : > { %v811_v36 = vmul.f32 %v779_v30, %v3247_v17  ;;  %v780_v37 = vmul.f32 %v748_v31, %v3254_v24  ;;  %v749_v38 = vmul.f32 0.044715, %v3262_v32  ;;  %v3269_v39 = vadd.f32 %v651_v33, %v3213_v56 }
 0x17a   : > { %v653_v40 = vpop.f32.mrf.mxu0  ;;  %v873_v41 = vmul.f32 0.7978846, %v841_v34  ;;  %2624 = vtanh.f32 %v872_v35  ;;  %v842_v42 = vadd.f32 %v810_v29, %v3240_v11  ;;  %v712_v25 = vmul.f32 0.5, %v3229_v2 }
 0x17b   : > { %v812_v43 = vmul.f32 %v780_v37, %v3254_v24  ;;  %v781_v44 = vmul.f32 %v749_v38, %v3262_v32  ;;  %v750_v45 = vmul.f32 0.044715, %v3269_v39  ;;  %v3276_v46 = vadd.f32 %v653_v40, %v3217_v57 }
 0x17c   : > { %v655_v47 = vpop.f32.mrf.mxu0  ;;  %2626 = vtanh.f32 %v873_v41  ;;  %v843_v48 = vadd.f32 %v811_v36, %v3247_v17  ;;  %v874_v51 = vmul.f32 0.7978846, %v842_v42  ;;  %v713_v62 = vmul.f32 0.5, %v3234_v6 }
 0x17d   : > { %v813_v54 = vmul.f32 %v781_v44, %v3262_v32  ;;  %v782_v58 = vmul.f32 %v750_v45, %v3269_v39  ;;  %v751_v60 = vmul.f32 0.044715, %v3276_v46  ;;  %v3283_v61 = vadd.f32 %v655_v47, %v3213_v56 }
 0x17e   : > { %v657_v63 = vpop.f32.mrf.mxu0  ;;  %v875_v0 = vmul.f32 0.7978846, %v843_v48  ;;  %v844_v1 = vadd.f32 %v812_v43, %v3254_v24  ;;  %2628 = vtanh.f32 %v874_v51  ;;  %v3311_v30 = vmul.f32 0.5, %v3247_v17 }
 0x17f   : > { %v783_v3 = vmul.f32 %v751_v60, %v3276_v46  ;;  %v752_v4 = vmul.f32 0.044715, %v3283_v61  ;;  %v3289_v5 = vadd.f32 %v657_v63, %v3217_v57  ;;  %v845_v8 = vadd.f32 %v813_v54, %v3262_v32 }
 0x180   : > { %v661_v7 = vpop.f32.mrf.mxu0  ;;  %2630 = vtanh.f32 %v875_v0  ;;  %v876_v9 = vmul.f32 0.7978846, %v844_v1  ;;  %v814_v10 = vmul.f32 %v782_v58, %v3269_v39  ;;  %v3314_v31 = vmul.f32 0.5, %v3240_v11 }
 0x181   : > { %v815_v12 = vmul.f32 %v783_v3, %v3276_v46  ;;  %v784_v13 = vmul.f32 %v752_v4, %v3283_v61  ;;  %v753_v14 = vmul.f32 0.044715, %v3289_v5  ;;  %v877_v19 = vmul.f32 0.7978846, %v845_v8 }
 0x182   : > { %v663_v15 = vpop.f32.mrf.mxu0  ;;  %2632 = vtanh.f32 %v876_v9  ;;  %v3300_v22 = vadd.f32 %v661_v7, %v3213_v56  ;;  %v846_v33 = vadd.f32 %v814_v10, %v3269_v39  ;;  %v3322_v35 = vmul.f32 0.5, %v3254_v24 }
 0x183   : > { %v2621_v20 = vpop.eup %2620  ;;  %v785_v21 = vmul.f32 %v753_v14, %v3289_v5  ;;  %v3303_v23 = vadd.f32 %v663_v15, %v3217_v57  ;;  %v816_v26 = vmul.f32 %v784_v13, %v3283_v61  ;;  %2634 = vtanh.f32 %v877_v19 }
 0x184   : > { %v665_v27 = vpop.f32.mrf.mxu0  ;;  %v847_v59 = vadd.f32 %v815_v12, %v3276_v46  ;;  %v754_v38 = vmul.f32 0.044715, %v3300_v22  ;;  %v3329_v40 = vmul.f32 0.5, %v3262_v32  ;;  %v934_v47 = vadd.f32 1.0, %v2621_v20 }
 0x185   : > { %v2623_v28 = vpop.eup %2622  ;;  %v817_v29 = vmul.f32 %v785_v21, %v3289_v5  ;;  %v755_v2 = vmul.f32 0.044715, %v3303_v23  ;;  %v3319_v34 = vadd.f32 %v665_v27, %v3213_v56  ;;  %v848_v44 = vadd.f32 %v816_v26, %v3283_v61 }
 0x186   : > { %v667_v6 = vpop.f32.mrf.mxu0  ;;  %v879_v36 = vmul.f32 0.7978846, %v847_v59  ;;  %v935_v11 = vadd.f32 1.0, %v2623_v28  ;;  %v3335_v48 = vmul.f32 0.5, %v3269_v39  ;;  %v878_v51 = vmul.f32 0.7978846, %v846_v33 }
 0x187   : > { %v2625_v37 = vpop.eup %2624  ;;  %v3326_v17 = vadd.f32 %v667_v6, %v3217_v57  ;;  %v849_v43 = vadd.f32 %v817_v29, %v3289_v5  ;;  %v787_v54 = vmul.f32 %v755_v2, %v3303_v23  ;;  %v756_v32 = vmul.f32 0.044715, %v3319_v34 }
 0x188   : > { %v671_v41 = vpop.f32.mrf.mxu0  ;;  %v936_v42 = vadd.f32 1.0, %v2625_v37  ;;  %2636 = vtanh.f32 %v879_v36  ;;  %v967_v1 = vmul.f32 %v935_v11, %v711_v16  ;;  %v3343_v4 = vmul.f32 0.5, %v3276_v46 }
 0x189   : > { %v2627_v24 = vpop.eup %2626  ;;  %v757_v45 = vmul.f32 0.044715, %v3326_v17  ;;  %v881_v63 = vmul.f32 0.7978846, %v849_v43  ;;  %v3340_v0 = vadd.f32 %v671_v41, %v3213_v56  ;;  %v880_v10 = vmul.f32 0.7978846, %v848_v44 }
 0x18a   : > { %v673_v58 = vpop.f32.mrf.mxu0  ;;  %v937_v60 = vadd.f32 1.0, %v2627_v24  ;;  %v968_v3 = vmul.f32 %v936_v42, %v712_v25  ;;  %v786_v13 = vmul.f32 %v754_v38, %v3300_v22  ;;  %v966_v16 = vmul.f32 %v934_v47, %v710_v18 }
 0x18b   : > { %v2629_v7 = vpop.eup %2628  ;;  %v789_v39 = vmul.f32 %v757_v45, %v3326_v17  ;;  %2638 = vtanh.f32 %v881_v63  ;;  %v3348_v14 = vadd.f32 %v673_v58, %v3217_v57  ;;  %v819_v46 = vmul.f32 %v787_v54, %v3303_v23 }
 0x18c   : > { %v675_v8 = vpop.f32.mrf.mxu0  ;;  %v969_v9 = vmul.f32 %v937_v60, %v713_v62  ;;  %v788_v19 = vmul.f32 %v756_v32, %v3319_v34  ;;  %2640 = vtanh.f32 %v878_v51  ;;  %v758_v26 = vmul.f32 0.044715, %v3340_v0 }
 0x18d   : > { %v2631_v12 = vpop.eup %2630  ;;  %v3351_v15 = vadd.f32 %v675_v8, %v3213_v56  ;;  %v998_v62 = vpack.c.bf16 %v968_v3, %v966_v16  ;;  %v938_v59 = vadd.f32 1.0, %v2629_v7  ;;  %v821_v28 = vmul.f32 %v789_v39, %v3326_v17 }
 0x18e   : > { %v677_v20 = vpop.f32.mrf.mxu0  ;;  %v999_v21 = vpack.c.bf16 %v969_v9, %v967_v1  ;;  %v939_v18 = vadd.f32 1.0, %v2631_v12  ;;  %2642 = vtanh.f32 %v880_v10  ;;  %v759_v6 = vmul.f32 0.044715, %v3348_v14 }
 0x18f   : > { %v2633_v25 = vpop.eup %2632  ;;  %v3357_v27 = vadd.f32 %v677_v20, %v3217_v57  ;;  %v760_v36 = vmul.f32 0.044715, %v3351_v15  ;;  %v3366_v38 = vmul.f32 0.5, %v3283_v61  ;;  %v818_v11 = vmul.f32 %v786_v13, %v3300_v22 }
 0x190   : > { %1250 = vmatprep.mubr.bf16.mxu1 %v999_v21  ;;  %v681_v29 = vpop.f32.mrf.mxu0  ;;  %v940_v33 = vadd.f32 1.0, %v2633_v25  ;;  %v2635_v2 = vpop.eup %2634  ;;  %v851_v44 = vadd.f32 %v819_v46, %v3303_v23  ;;  %v820_v24 = vmul.f32 %v788_v19, %v3319_v34  ;;  %v790_v45 = vmul.f32 %v758_v26, %v3340_v0 }
 0x191   : > { %v3363_v37 = vadd.f32 %v681_v29, %v3213_v56  ;;  %1251 = vmatmul.mubr.bf16.vlgmr.msra.gmra.mxu1 %v998_v62  ;;  %v761_v41 = vmul.f32 0.044715, %v3357_v27  ;;  %v941_v43 = vadd.f32 1.0, %v2635_v2  ;;  %v970_v47 = vmul.f32 %v938_v59, %v3314_v31 }
 0x192   : > { %v683_v42 = vpop.f32.mrf.mxu0  ;;  %2415 = vmatpush3.bf16.msra.mxu1 %v3198_v49  ;;  %v972_v51 = vmul.f32 %v940_v33, %v3322_v35  ;;  %v971_v54 = vmul.f32 %v939_v18, %v3311_v30  ;;  %v853_v58 = vadd.f32 %v821_v28, %v3326_v17  ;;  %v883_v60 = vmul.f32 0.7978846, %v851_v44 }
 0x193   : > { %2408 = vmatprep.subr.bf16.mxu1 %v3200_v50  ;;  %v973_v32 = vmul.f32 %v941_v43, %v3329_v40  ;;  %v791_v49 = vmul.f32 %v759_v6, %v3348_v14  ;;  %v792_v1 = vmul.f32 %v760_v36, %v3351_v15  ;;  %v762_v3 = vmul.f32 0.044715, %v3363_v37 }
 0x194   : > { %v685_v61 = vpop.f32.mrf.mxu0  ;;  %v3384_v31 = vadd.f32 %v683_v42, %v3217_v57  ;;  %v793_v50 = vmul.f32 %v761_v41, %v3357_v27  ;;  %v885_v30 = vmul.f32 0.7978846, %v853_v58  ;;  %2644 = vtanh.f32 %v883_v60 }
 0x195   : > { %v2637_v63 = vpop.eup %2636  ;;  %v1001_v7 = vpack.c.bf16 %v973_v32, %v971_v54  ;;  %v3388_v40 = vadd.f32 %v685_v61, %v3213_v56  ;;  %v1000_v8 = vpack.c.bf16 %v972_v51, %v970_v47  ;;  %v3394_v10 = vmul.f32 %v790_v45, %v3340_v0 }
 0x196   : > { %v687_v35 = vpop.f32.mrf.mxu0  ;;  %v943_v9 = vadd.f32 1.0, %v2637_v63  ;;  %v721_v13 = vmul.f32 0.5, %v3289_v5  ;;  %v3398_v16 = vmul.f32 0.5, %v3303_v23  ;;  %2646 = vtanh.f32 %v885_v30 }
 0x197   : > { %v3391_v39 = vadd.f32 %v687_v35, %v3217_v57  ;;  %1260 = vmatprep.mubr.bf16.mxu1 %v1001_v7  ;;  %v823_v19 = vmul.f32 %v791_v49, %v3348_v14  ;;  %v794_v20 = vmul.f32 %v762_v3, %v3363_v37  ;;  %v763_v21 = vmul.f32 0.044715, %v3384_v31 }
 0x198   : > { %v691_v12 = vpop.f32.mrf.mxu0  ;;  %v2639_v46 = vpop.eup %2638  ;;  %v3404_v25 = vmul.f32 0.5, %v3326_v17  ;;  %v3407_v26 = vmul.f32 %v792_v1, %v3351_v15  ;;  %v850_v23 = vadd.f32 %v818_v11, %v3300_v22  ;;  %v852_v59 = vadd.f32 %v820_v24, %v3319_v34 }
 0x199   : > { %1261 = vmatmul.mubr.bf16.gmra.mxu1 %v1000_v8  ;;  %v945_v5 = vadd.f32 1.0, %v2639_v46  ;;  %v2641_v28 = vpop.eup %2640  ;;  %v825_v29 = vmul.f32 %v793_v50, %v3357_v27  ;;  %v764_v18 = vmul.f32 0.044715, %v3388_v40  ;;  %v765_v33 = vmul.f32 0.044715, %v3391_v39 }
 0x19a   : > { %v693_v62 = vpop.f32.mrf.mxu0  ;;  %v975_v2 = vmul.f32 %v943_v9, %v3343_v4  ;;  %v942_v36 = vadd.f32 1.0, %v2641_v28  ;;  %v882_v41 = vmul.f32 0.7978846, %v850_v23  ;;  %v884_v42 = vmul.f32 0.7978846, %v852_v59 }
 0x19b   : > { %v977_v6 = vmul.f32 %v945_v5, %v721_v13  ;;  %v2643_v43 = vpop.eup %2642  ;;  %v3416_v44 = vmul.f32 %v794_v20, %v3363_v37  ;;  %v795_v11 = vmul.f32 %v763_v21, %v3384_v31  ;;  %v3420_v24 = vadd.f32 %v691_v12, %v3213_v56 }
 0x19c   : > { %v695_v17 = vpop.f32.mrf.mxu0  ;;  %v3423_v45 = vmul.f32 0.5, %v3300_v22  ;;  %v3426_v47 = vadd.f32 %v693_v62, %v3217_v57  ;;  %v944_v61 = vadd.f32 1.0, %v2643_v43  ;;  %2648 = vtanh.f32 %v882_v41 }
 0x19d   : > { %v1003_v51 = vpack.c.bf16 %v977_v6, %v975_v2  ;;  %v796_v54 = vmul.f32 %v764_v18, %v3388_v40  ;;  %v797_v32 = vmul.f32 %v765_v33, %v3391_v39  ;;  %v3431_v58 = vadd.f32 %v695_v17, %v3213_v56 }
 0x19e   : > { %v697_v4 = vpop.f32.mrf.mxu0  ;;  %v974_v63 = vmul.f32 %v942_v36, %v3335_v48  ;;  %v976_v49 = vmul.f32 %v944_v61, %v3366_v38  ;;  %2650 = vtanh.f32 %v884_v42  ;;  %v855_v1 = vadd.f32 %v823_v19, %v3348_v14 }
 0x19f   : > { %v3434_v60 = vadd.f32 %v697_v4, %v3217_v57  ;;  %1270 = vmatprep.mubr.bf16.mxu1 %v1003_v51  ;;  %v827_v3 = vmul.f32 %v795_v11, %v3384_v31  ;;  %v766_v50 = vmul.f32 0.044715, %v3420_v24  ;;  %v3442_v35 = vmul.f32 0.5, %v3319_v34 }
 0x1a0   : > { %v701_v22 = vpop.f32.mrf.mxu0  ;;  %v3445_v7 = vmul.f32 0.5, %v3348_v14  ;;  %v767_v30 = vmul.f32 0.044715, %v3426_v47  ;;  %v1002_v8 = vpack.c.bf16 %v976_v49, %v974_v63  ;;  %v857_v48 = vadd.f32 %v825_v29, %v3357_v27 }
 0x1a1   : > { %v887_v38 = vmul.f32 0.7978846, %v855_v1  ;;  %v2645_v12 = vpop.eup %2644  ;;  %v828_v13 = vmul.f32 %v796_v54, %v3388_v40  ;;  %v768_v46 = vmul.f32 0.044715, %v3431_v58  ;;  %v769_v19 = vmul.f32 0.044715, %v3434_v60 }
 0x1a2   : > { %v703_v9 = vpop.f32.mrf.mxu0  ;;  %v829_v14 = vmul.f32 %v797_v32, %v3391_v39  ;;  %1271 = vmatmul.mubr.bf16.gmra.mxu1 %v1002_v8  ;;  %v947_v21 = vadd.f32 1.0, %v2645_v12  ;;  %v889_v62 = vmul.f32 0.7978846, %v857_v48  ;;  %v798_v23 = vmul.f32 %v766_v50, %v3420_v24 }
 0x1a3   : > { %v3453_v34 = vadd.f32 %v703_v9, %v3217_v57  ;;  %2652 = vtanh.f32 %v887_v38  ;;  %v2647_v5 = vpop.eup %2646  ;;  %v3458_v59 = vadd.f32 %v701_v22, %v3213_v56  ;;  %v799_v18 = vmul.f32 %v767_v30, %v3426_v47 }
 0x1a4   : > { %v705_v20 = vpop.f32.mrf.mxu0  ;;  %v949_v2 = vadd.f32 1.0, %v2647_v5  ;;  %2654 = vtanh.f32 %v889_v62  ;;  %v854_v17 = vadd.f32 %v3394_v10, %v3340_v0  ;;  %v800_v6 = vmul.f32 %v768_v46, %v3431_v58 }
 0x1a5   : > { %v771_v28 = vmul.f32 0.044715, %v3453_v34  ;;  %v3462_v29 = vadd.f32 %v705_v20, %v3213_v56  ;;  %v801_v36 = vmul.f32 %v769_v19, %v3434_v60  ;;  %v979_v56 = vmul.f32 %v947_v21, %v3398_v16 }
 0x1a6   : > { %v707_v33 = vpop.f32.mrf.mxu0  ;;  %v981_v43 = vmul.f32 %v949_v2, %v3404_v25  ;;  %v856_v11 = vadd.f32 %v3407_v26, %v3351_v15  ;;  %v886_v4 = vmul.f32 0.7978846, %v854_v17  ;;  %v830_v51 = vmul.f32 %v798_v23, %v3420_v24 }
 0x1a7   : > { %v772_v41 = vmul.f32 0.044715, %v3462_v29  ;;  %v3471_v42 = vadd.f32 %v707_v33, %v3217_v57  ;;  %v770_v10 = vmul.f32 0.044715, %v3458_v59  ;;  %v803_v61 = vmul.f32 %v771_v28, %v3453_v34 }
 0x1a8   : > { %v1005_v32 = vpack.c.bf16 %v981_v43, %v979_v56  ;;  %v888_v22 = vmul.f32 0.7978846, %v856_v11  ;;  %2656 = vtanh.f32 %v886_v4  ;;  %v859_v57 = vadd.f32 %v827_v3, %v3384_v31 }
 0x1a9   : > { %v773_v54 = vmul.f32 0.044715, %v3471_v42  ;;  %v2649_v16 = vpop.eup %2648  ;;  %v831_v25 = vmul.f32 %v799_v18, %v3426_v47  ;;  %v832_v63 = vmul.f32 %v800_v6, %v3431_v58  ;;  %v804_v26 = vmul.f32 %v772_v41, %v3462_v29 }
 0x1aa   : > { %v861_v49 = vadd.f32 %v829_v14, %v3391_v39  ;;  %v833_v1 = vmul.f32 %v801_v36, %v3434_v60  ;;  %1280 = vmatprep.mubr.bf16.mxu1 %v1005_v32  ;;  %v946_v50 = vadd.f32 1.0, %v2649_v16  ;;  %2658 = vtanh.f32 %v888_v22 }
 0x1ab   : > { %v891_v30 = vmul.f32 0.7978846, %v859_v57  ;;  %v2651_v8 = vpop.eup %2650  ;;  %v805_v9 = vmul.f32 %v773_v54, %v3471_v42  ;;  %v858_v3 = vadd.f32 %v3416_v44, %v3363_v37  ;;  %v860_v38 = vadd.f32 %v828_v13, %v3388_v40 }
 0x1ac   : > { %v893_v48 = vmul.f32 0.7978846, %v861_v49  ;;  %v802_v12 = vmul.f32 %v770_v10, %v3458_v59  ;;  %v835_v46 = vmul.f32 %v803_v61, %v3453_v34  ;;  %v948_v19 = vadd.f32 1.0, %v2651_v8 }
 0x1ad   : > { %2660 = vtanh.f32 %v891_v30  ;;  %v836_v14 = vmul.f32 %v804_v26, %v3462_v29  ;;  %v890_v20 = vmul.f32 0.7978846, %v858_v3  ;;  %v892_v21 = vmul.f32 0.7978846, %v860_v38 }
 0x1ae   : > { %2662 = vtanh.f32 %v893_v48  ;;  %v978_v62 = vmul.f32 %v946_v50, %v3423_v45  ;;  %v980_v5 = vmul.f32 %v948_v19, %v3442_v35  ;;  %v863_v23 = vadd.f32 %v831_v25, %v3426_v47 }
 0x1af   : > { %v865_v44 = vadd.f32 %v833_v1, %v3434_v60  ;;  %v837_v28 = vmul.f32 %v805_v9, %v3471_v42  ;;  %2664 = vtanh.f32 %v890_v20  ;;  %v862_v18 = vadd.f32 %v830_v51, %v3420_v24 }
 0x1b0   : > { %v2653_v13 = vpop.eup %2652  ;;  %v864_v33 = vadd.f32 %v832_v63, %v3431_v58  ;;  %v1004_v2 = vpack.c.bf16 %v980_v5, %v978_v62  ;;  %2666 = vtanh.f32 %v892_v21  ;;  %v895_v6 = vmul.f32 0.7978846, %v863_v23 }
 0x1b1   : > { %v951_v17 = vadd.f32 1.0, %v2653_v13  ;;  %v2655_v36 = vpop.eup %2654  ;;  %v897_v45 = vmul.f32 0.7978846, %v865_v44  ;;  %v894_v41 = vmul.f32 0.7978846, %v862_v18  ;;  %v867_v56 = vadd.f32 %v835_v46, %v3453_v34 }
 0x1b2   : > { %v896_v35 = vmul.f32 0.7978846, %v864_v33  ;;  %v834_v43 = vmul.f32 %v802_v12, %v3458_v59  ;;  %1281 = vmatmul.mubr.bf16.gmra.mxu1 %v1004_v2  ;;  %v729_v11 = vmul.f32 0.5, %v3357_v27  ;;  %v953_v4 = vadd.f32 1.0, %v2655_v36 }
 0x1b3   : > { %2668 = vtanh.f32 %v895_v6  ;;  %v869_v51 = vadd.f32 %v837_v28, %v3471_v42  ;;  %v899_v10 = vmul.f32 0.7978846, %v867_v56  ;;  %v983_v61 = vmul.f32 %v951_v17, %v3445_v7 }
 0x1b4   : > { %2670 = vtanh.f32 %v897_v45  ;;  %v985_v54 = vmul.f32 %v953_v4, %v729_v11  ;;  %v868_v57 = vadd.f32 %v836_v14, %v3462_v29  ;;  %v866_v27 = vadd.f32 %v834_v43, %v3458_v59 }
 0x1b5   : > { %2672 = vtanh.f32 %v894_v41  ;;  %v2657_v32 = vpop.eup %2656  ;;  %v901_v22 = vmul.f32 0.7978846, %v869_v51  ;;  %v726_v26 = vmul.f32 0.5, %v3340_v0  ;;  %v728_v49 = vmul.f32 0.5, %v3351_v15 }
 0x1b6   : > { %2674 = vtanh.f32 %v896_v35  ;;  %v1007_v16 = vpack.c.bf16 %v985_v54, %v983_v61  ;;  %v950_v25 = vadd.f32 1.0, %v2657_v32  ;;  %v900_v1 = vmul.f32 0.7978846, %v868_v57 }
 0x1b7   : > { %2676 = vtanh.f32 %v899_v10  ;;  %v2659_v63 = vpop.eup %2658  ;;  %v898_v3 = vmul.f32 0.7978846, %v866_v27  ;;  %v731_v38 = vmul.f32 0.5, %v3384_v31  ;;  %v733_v12 = vmul.f32 0.5, %v3391_v39 }
 0x1b8   : > { %2678 = vtanh.f32 %v901_v22  ;;  %1290 = vmatprep.mubr.bf16.mxu1 %v1007_v16  ;;  %v952_v7 = vadd.f32 1.0, %v2659_v63  ;;  %v982_v8 = vmul.f32 %v950_v25, %v726_v26  ;;  %v732_v15 = vmul.f32 0.5, %v3388_v40 }
 0x1b9   : > { %2680 = vtanh.f32 %v900_v1  ;;  %v730_v31 = vmul.f32 0.5, %v3363_v37  ;;  %v735_v33 = vmul.f32 0.5, %v3426_v47  ;;  %v737_v2 = vmul.f32 0.5, %v3434_v60 }
 0x1ba   : > { %v2661_v50 = vpop.eup %2660  ;;  %v984_v9 = vmul.f32 %v952_v7, %v728_v49  ;;  %2682 = vtanh.f32 %v898_v3  ;;  %v741_v37 = vmul.f32 0.5, %v3471_v42  ;;  %v736_v10 = vmul.f32 0.5, %v3431_v58  ;;  %v2615_v3 = vld [vmem:[#allocation8 + $0x10] sm:$0xff]  }
 0x1bb   : > { %v2663_v30 = vpop.eup %2662  ;;  %v955_v48 = vadd.f32 1.0, %v2661_v50  ;;  %v739_v60 = vmul.f32 0.5, %v3453_v34  ;;  %v734_v54 = vmul.f32 0.5, %v3420_v24  ;;  %v740_v26 = vmul.f32 0.5, %v3462_v29  ;;  %v2607_v24 = vld [vmem:[#allocation8 + $0x30] sm:$0xff]   ;;  %v2608_v50 = vld [vmem:[#allocation8 + $0x68] sm:$0xff]  }
 0x1bc   : > { %v957_v46 = vadd.f32 1.0, %v2663_v30  ;;  %v2665_v19 = vpop.eup %2664  ;;  %v1006_v14 = vpack.c.bf16 %v984_v9, %v982_v8  ;;  %v738_v58 = vmul.f32 0.5, %v3458_v59  ;;  %2346 = vmatpush3.bf16.msra.mxu0 %v2607_v24  ;;  %2416 = vmatpush3.bf16.msra.mxu1 %v2607_v24  ;;  %v2609_v30 = vld [vmem:[#allocation8 + $0x28] sm:$0xff]   ;;  %v2610_v8 = vld [vmem:[#allocation8 + $0x60] sm:$0xff]   ;;  %v2612_v59 = vld [vmem:[#allocation8 + $0x58] sm:$0xff]  }
 0x1bd   : > { %v2667_v20 = vpop.eup %2666  ;;  %v987_v0 = vmul.f32 %v955_v48, %v731_v38  ;;  %v954_v62 = vadd.f32 1.0, %v2665_v19  ;;  %2347 = vmatprep.subr.bf16.mxu0 %v2608_v50  ;;  %2409 = vmatprep.subr.bf16.mxu1 %v2608_v50  ;;  %v2611_v29 = vld [vmem:[#allocation8 + $0x20] sm:$0xff]   ;;  %v2613_v9 = vld [vmem:[#allocation8 + $0x18] sm:$0xff]   ;;  %v2614_v48 = vld [vmem:[#allocation8 + $0x50] sm:$0xff]  }
 0x1be   : > { %v989_v21 = vmul.f32 %v957_v46, %v733_v12  ;;  %1291 = vmatmul.mubr.bf16.gmra.mxu1 %v1006_v14  ;;  %v956_v5 = vadd.f32 1.0, %v2667_v20  ;;  %v2616_v38 = vld [vmem:[#allocation8 + $0x48] sm:$0xff]   ;;  %v2618_v46 = vld [vmem:[#allocation8 + $0x40] sm:$0xff]  }
 0x1bf   : > { %v986_v36 = vmul.f32 %v954_v62, %v730_v31  ;;  %v2617_v12 = vld [vmem:[#allocation8 + $0x8] sm:$0xff]   ;;  %v2619_v19 = vld [vmem:[#allocation8] sm:$0xff]  }
 0x1c0   : > { %v2669_v23 = vpop.eup %2668  ;;  %v1009_v44 = vpack.c.bf16 %v989_v21, %v987_v0  ;;  %v988_v28 = vmul.f32 %v956_v5, %v732_v15  ;;  %2348 = vmatpush3.bf16.msra.mxu0 %v2609_v30  ;;  %2417 = vmatpush3.bf16.msra.mxu1 %v2609_v30  ;;  %v1046_v14 = vld [vmem:[%s3967_s4] sm:$0x3] }
 0x1c1   : > { %v2671_v13 = vpop.eup %2670  ;;  %v959_v39 = vadd.f32 1.0, %v2669_v23  ;;  %2349 = vmatprep.subr.bf16.mxu0 %v2610_v8  ;;  %2410 = vmatprep.subr.bf16.mxu1 %v2610_v8  ;;  %v3527_v20 = vrot.slane %v1046_v14, %v429_v53  ;;  %v3531_v0 = vrot.slane %v1046_v14, %v433_v55 }
 0x1c2   : > { %v2673_v18 = vpop.eup %2672  ;;  %1300 = vmatprep.mubr.bf16.mxu1 %v1009_v44  ;;  %v961_v17 = vadd.f32 1.0, %v2671_v13  ;;  %v1008_v56 = vpack.c.bf16 %v988_v28, %v986_v36 }
 0x1c3   : > { %v2675_v6 = vpop.eup %2674  ;;  %v991_v45 = vmul.f32 %v959_v39, %v735_v33  ;;  %v958_v47 = vadd.f32 1.0, %v2673_v18 }
 0x1c4   : > { %v2677_v40 = vpop.eup %2676  ;;  %v993_v41 = vmul.f32 %v961_v17, %v737_v2  ;;  %v960_v43 = vadd.f32 1.0, %v2675_v6  ;;  %2350 = vmatpush3.bf16.msra.mxu0 %v2611_v29  ;;  %2418 = vmatpush3.bf16.msra.mxu1 %v2611_v29 }
 0x1c5   : > { %v2679_v35 = vpop.eup %2678  ;;  %v963_v4 = vadd.f32 1.0, %v2677_v40  ;;  %v990_v16 = vmul.f32 %v958_v47, %v734_v54  ;;  %2351 = vmatprep.subr.bf16.mxu0 %v2612_v59  ;;  %2411 = vmatprep.subr.bf16.mxu1 %v2612_v59 }
 0x1c6   : > { %v1011_v11 = vpack.c.bf16 %v993_v41, %v991_v45  ;;  %v965_v51 = vadd.f32 1.0, %v2679_v35  ;;  %1301 = vmatmul.mubr.bf16.gmra.mxu1 %v1008_v56  ;;  %v992_v32 = vmul.f32 %v960_v43, %v736_v10  ;;  %v2681_v22 = vpop.eup %2680 }
 0x1c7   : > { %v995_v57 = vmul.f32 %v963_v4, %v739_v60  ;;  %v2683_v25 = vpop.eup %2682  ;;  %v964_v42 = vadd.f32 1.0, %v2681_v22 }
 0x1c8   : > { %1310 = vmatprep.mubr.bf16.mxu1 %v1011_v11  ;;  %v997_v61 = vmul.f32 %v965_v51, %v741_v37  ;;  %v1010_v63 = vpack.c.bf16 %v992_v32, %v990_v16  ;;  %v962_v49 = vadd.f32 1.0, %v2683_v25  ;;  %2352 = vmatpush3.bf16.msra.mxu0 %v2613_v9 }
 0x1c9   : > { %v996_v7 = vmul.f32 %v964_v42, %v740_v26  ;;  %2419 = vmatpush3.bf16.msra.mxu1 %v2613_v9  ;;  %2353 = vmatprep.subr.bf16.mxu0 %v2614_v48 }
 0x1ca   : > { %v1013_v27 = vpack.c.bf16 %v997_v61, %v995_v57  ;;  %v994_v34 = vmul.f32 %v962_v49, %v738_v58  ;;  %2412 = vmatprep.subr.bf16.mxu1 %v2614_v48 }
 0x1cc   : > { %v1012_v1 = vpack.c.bf16 %v996_v7, %v994_v34  ;;  %2354 = vmatpush3.bf16.msra.mxu0 %v2615_v3 }
 0x1cd   : > { %2420 = vmatpush3.bf16.msra.mxu1 %v2615_v3  ;;  %2355 = vmatprep.subr.bf16.mxu0 %v2616_v38 }
 0x1ce   : > { %1311 = vmatmul.mubr.bf16.gmra.mxu1 %v1010_v63  ;;  %2413 = vmatprep.subr.bf16.mxu1 %v2616_v38 }
 0x1cf   : > { %1320 = vmatprep.mubr.bf16.mxu1 %v1013_v27 }
 0x1d0   : > { %2356 = vmatpush3.bf16.msra.mxu0 %v2617_v12 }
 0x1d1   : > { %2421 = vmatpush3.bf16.msra.mxu1 %v2617_v12  ;;  %2357 = vmatprep.subr.bf16.mxu0 %v2618_v46 }
 0x1d2   : > { %2414 = vmatprep.subr.bf16.mxu1 %v2618_v46 }
 0x1d4   : > { %2358 = vmatpush3.bf16.msra.mxu0 %v2619_v19 }
 0x1d5   : > { %2422 = vmatpush3.bf16.msra.mxu1 %v2619_v19 }
 0x1d6   : > { %1321 = vmatmul.mubr.bf16.gmra.mxu1 %v1012_v1 }
 0x251   : > { %v1252_v21 = vpop.f32.mrf.mxu1 }
 0x252   : > { %v3534_v15 = vadd.f32 %v1252_v21, %v3527_v20 }
 0x253   : > { %v1254_v62 = vpop.f32.mrf.mxu1 }
 0x254   : > { %v1363_v5 = vmul.f32 0.044715, %v3534_v15  ;;  %v3538_v23 = vadd.f32 %v1254_v62, %v3531_v0 }
 0x255   : > { %v1256_v44 = vpop.f32.mrf.mxu1 }
 0x256   : > { %v1395_v13 = vmul.f32 %v1363_v5, %v3534_v15  ;;  %v1364_v53 = vmul.f32 0.044715, %v3538_v23  ;;  %v3543_v31 = vadd.f32 %v1256_v44, %v3527_v20 }
 0x257   : > { %v1258_v52 = vpop.f32.mrf.mxu1 }
 0x258   : > { %v1427_v55 = vmul.f32 %v1395_v13, %v3534_v15  ;;  %v1396_v28 = vmul.f32 %v1364_v53, %v3538_v23  ;;  %v1365_v39 = vmul.f32 0.044715, %v3543_v31  ;;  %v3549_v18 = vadd.f32 %v1258_v52, %v3531_v0 }
 0x259   : > { %v1262_v33 = vpop.f32.mrf.mxu1 }
 0x25a   : > { %v1459_v2 = vadd.f32 %v1427_v55, %v3534_v15  ;;  %v1428_v17 = vmul.f32 %v1396_v28, %v3538_v23  ;;  %v1397_v6 = vmul.f32 %v1365_v39, %v3543_v31  ;;  %v3555_v36 = vadd.f32 %v1262_v33, %v3527_v20 }
 0x25b   : > { %v1366_v40 = vmul.f32 0.044715, %v3549_v18  ;;  %v1264_v45 = vpop.f32.mrf.mxu1 }
 0x25c   : > { %v1491_v41 = vmul.f32 0.7978846, %v1459_v2  ;;  %v1429_v35 = vmul.f32 %v1397_v6, %v3543_v31  ;;  %v1367_v56 = vmul.f32 0.044715, %v3555_v36  ;;  %v3561_v43 = vadd.f32 %v1264_v45, %v3531_v0 }
 0x25d   : > { %v1398_v11 = vmul.f32 %v1366_v40, %v3549_v18  ;;  %v1266_v37 = vpop.f32.mrf.mxu1  ;;  %v1460_v4 = vadd.f32 %v1428_v17, %v3538_v23 }
 0x25e   : > { %v1461_v51 = vadd.f32 %v1429_v35, %v3543_v31  ;;  %v1399_v10 = vmul.f32 %v1367_v56, %v3555_v36  ;;  %v1368_v47 = vmul.f32 0.044715, %v3561_v43  ;;  %2684 = vtanh.f32 %v1491_v41 }
 0x25f   : > { %v1430_v60 = vmul.f32 %v1398_v11, %v3549_v18  ;;  %v3570_v61 = vadd.f32 %v1266_v37, %v3527_v20  ;;  %v1268_v54 = vpop.f32.mrf.mxu1  ;;  %v1492_v32 = vmul.f32 0.7978846, %v1460_v4  ;;  %v1332_v56 = vmul.f32 0.5, %v3538_v23 }
 0x260   : > { %v1493_v22 = vmul.f32 0.7978846, %v1461_v51  ;;  %v1431_v57 = vmul.f32 %v1399_v10, %v3555_v36  ;;  %v1400_v16 = vmul.f32 %v1368_v47, %v3561_v43  ;;  %v3575_v25 = vadd.f32 %v1268_v54, %v3531_v0 }
 0x261   : > { %v1369_v27 = vmul.f32 0.044715, %v3570_v61  ;;  %v1462_v63 = vadd.f32 %v1430_v60, %v3549_v18  ;;  %2686 = vtanh.f32 %v1492_v32  ;;  %v1333_v54 = vmul.f32 0.5, %v3543_v31 }
 0x262   : > { %2688 = vtanh.f32 %v1493_v22  ;;  %v1432_v42 = vmul.f32 %v1400_v16, %v3561_v43  ;;  %v1370_v26 = vmul.f32 0.044715, %v3575_v25  ;;  %v1463_v7 = vadd.f32 %v1431_v57, %v3555_v36  ;;  %v1272_v1 = vpop.f32.mrf.mxu1 }
 0x263   : > { %v1401_v49 = vmul.f32 %v1369_v27, %v3570_v61  ;;  %v1494_v58 = vmul.f32 0.7978846, %v1462_v63  ;;  %v3587_v30 = vadd.f32 %v1272_v1, %v3527_v20  ;;  %v1334_v32 = vmul.f32 0.5, %v3549_v18 }
 0x264   : > { %v1402_v34 = vmul.f32 %v1370_v26, %v3575_v25  ;;  %v1464_v24 = vadd.f32 %v1432_v42, %v3561_v43  ;;  %v1274_v29 = vpop.f32.mrf.mxu1  ;;  %v1495_v9 = vmul.f32 0.7978846, %v1463_v7  ;;  %v1331_v27 = vmul.f32 0.5, %v3534_v15 }
 0x265   : > { %v1433_v50 = vmul.f32 %v1401_v49, %v3570_v61  ;;  %2690 = vtanh.f32 %v1494_v58  ;;  %v1371_v48 = vmul.f32 0.044715, %v3587_v30  ;;  %v3592_v3 = vadd.f32 %v1274_v29, %v3531_v0 }
 0x266   : > { %v1434_v8 = vmul.f32 %v1402_v34, %v3575_v25  ;;  %v1496_v59 = vmul.f32 0.7978846, %v1464_v24  ;;  %v1276_v12 = vpop.f32.mrf.mxu1 }
 0x267   : > { %v1465_v38 = vadd.f32 %v1433_v50, %v3570_v61  ;;  %v1403_v19 = vmul.f32 %v1371_v48, %v3587_v30  ;;  %v1372_v14 = vmul.f32 0.044715, %v3592_v3  ;;  %v3599_v21 = vadd.f32 %v1276_v12, %v3527_v20 }
 0x268   : > { %v1466_v46 = vadd.f32 %v1434_v8, %v3575_v25  ;;  %2692 = vtanh.f32 %v1496_v59  ;;  %v1278_v5 = vpop.f32.mrf.mxu1 }
 0x269   : > { %v1497_v62 = vmul.f32 0.7978846, %v1465_v38  ;;  %2694 = vtanh.f32 %v1495_v9  ;;  %v1435_v13 = vmul.f32 %v1403_v19, %v3587_v30  ;;  %v1404_v53 = vmul.f32 %v1372_v14, %v3592_v3 }
 0x26a   : > { %v1498_v44 = vmul.f32 0.7978846, %v1466_v46  ;;  %v1373_v52 = vmul.f32 0.044715, %v3599_v21  ;;  %v3605_v55 = vadd.f32 %v1278_v5, %v3531_v0  ;;  %v1335_v46 = vmul.f32 0.5, %v3555_v36 }
 0x26b   : > { %v2685_v28 = vpop.eup %2684  ;;  %v1436_v39 = vmul.f32 %v1404_v53, %v3592_v3  ;;  %v1467_v6 = vadd.f32 %v1435_v13, %v3587_v30  ;;  %v1338_v5 = vmul.f32 0.5, %v3575_v25 }
 0x26c   : > { %2696 = vtanh.f32 %v1498_v44  ;;  %v1405_v33 = vmul.f32 %v1373_v52, %v3599_v21  ;;  %v1374_v2 = vmul.f32 0.044715, %v3605_v55  ;;  %v1555_v22 = vadd.f32 1.0, %v2685_v28 }
 0x26d   : > { %2698 = vtanh.f32 %v1497_v62  ;;  %v1468_v35 = vadd.f32 %v1436_v39, %v3592_v3  ;;  %v1499_v37 = vmul.f32 0.7978846, %v1467_v6  ;;  %v1336_v62 = vmul.f32 0.5, %v3561_v43 }
 0x26e   : > { %v2687_v17 = vpop.eup %2686  ;;  %v1437_v45 = vmul.f32 %v1405_v33, %v3599_v21  ;;  %v1406_v41 = vmul.f32 %v1374_v2, %v3605_v55  ;;  %v1587_v18 = vmul.f32 %v1555_v22, %v1331_v27  ;;  %v1337_v2 = vmul.f32 0.5, %v3570_v61 }
 0x26f   : > { %v2689_v40 = vpop.eup %2688  ;;  %v1556_v51 = vadd.f32 1.0, %v2687_v17  ;;  %v1500_v10 = vmul.f32 0.7978846, %v1468_v35  ;;  %2700 = vtanh.f32 %v1499_v37 }
 0x270   : > { %v1557_v11 = vadd.f32 1.0, %v2689_v40  ;;  %v1438_v4 = vmul.f32 %v1406_v41, %v3605_v55  ;;  %v1469_v47 = vadd.f32 %v1437_v45, %v3599_v21 }
 0x271   : > { %2702 = vtanh.f32 %v1500_v10  ;;  %v1588_v58 = vmul.f32 %v1556_v51, %v1332_v56 }
 0x272   : > { %v2691_v60 = vpop.eup %2690  ;;  %v1470_v16 = vadd.f32 %v1438_v4, %v3605_v55  ;;  %v1501_v23 = vmul.f32 0.7978846, %v1469_v47  ;;  %v1282_v63 = vpop.f32.mrf.mxu1  ;;  %v1589_v42 = vmul.f32 %v1557_v11, %v1333_v54 }
 0x273   : > { %v1558_v57 = vadd.f32 1.0, %v2691_v60  ;;  %v3622_v49 = vadd.f32 %v1282_v63, %v3527_v20 }
 0x274   : > { %v1502_v31 = vmul.f32 0.7978846, %v1470_v16  ;;  %v1284_v34 = vpop.f32.mrf.mxu1  ;;  %2704 = vtanh.f32 %v1501_v23  ;;  %v1619_v29 = vpack.c.bf16 %v1589_v42, %v1587_v18  ;;  %v1340_v16 = vmul.f32 0.5, %v3592_v3 }
 0x275   : > { %v2693_v26 = vpop.eup %2692  ;;  %v1590_v7 = vmul.f32 %v1558_v57, %v1334_v32  ;;  %v1375_v24 = vmul.f32 0.044715, %v3622_v49  ;;  %v3626_v50 = vadd.f32 %v1284_v34, %v3531_v0  ;;  %v1339_v32 = vmul.f32 0.5, %v3587_v30 }
 0x276   : > { %v2695_v1 = vpop.eup %2694  ;;  %v1286_v15 = vpop.f32.mrf.mxu1  ;;  %v1560_v59 = vadd.f32 1.0, %v2693_v26  ;;  %2706 = vtanh.f32 %v1502_v31 }
 0x277   : > { %v1620_v8 = vpack.c.bf16 %v1590_v7, %v1588_v58  ;;  %v1407_v48 = vmul.f32 %v1375_v24, %v3622_v49  ;;  %v1376_v38 = vmul.f32 0.044715, %v3626_v50  ;;  %v3631_v12 = vadd.f32 %v1286_v15, %v3527_v20 }
 0x278   : > { %v1288_v14 = vpop.f32.mrf.mxu1  ;;  %v1559_v13 = vadd.f32 1.0, %v2695_v1  ;;  %v1592_v33 = vmul.f32 %v1560_v59, %v1336_v62  ;;  %v1341_v7 = vmul.f32 0.5, %v3599_v21  ;;  %v1342_v15 = vmul.f32 0.5, %v3605_v55 }
 0x279   : > { %v2697_v9 = vpop.eup %2696  ;;  %1802 = vmatprep.mubr.bf16.mxu0 %v1620_v8  ;;  %v1439_v53 = vmul.f32 %v1407_v48, %v3622_v49  ;;  %v1408_v52 = vmul.f32 %v1376_v38, %v3626_v50  ;;  %v1377_v28 = vmul.f32 0.044715, %v3631_v12  ;;  %v3640_v39 = vadd.f32 %v1288_v14, %v3531_v0 }
 0x27a   : > { %v2699_v19 = vpop.eup %2698  ;;  %1803 = vmatmul.mubr.bf16.vlgmr.msra.gmra.mxu0 %v1619_v29  ;;  %v1562_v44 = vadd.f32 1.0, %v2697_v9  ;;  %v1591_v45 = vmul.f32 %v1559_v13, %v1335_v46 }
 0x27b   : > { %v1561_v17 = vadd.f32 1.0, %v2699_v19  ;;  %v1440_v43 = vmul.f32 %v1408_v52, %v3626_v50  ;;  %v1409_v25 = vmul.f32 %v1377_v28, %v3631_v12  ;;  %v1378_v6 = vmul.f32 0.044715, %v3640_v39 }
 0x27c   : > { %v1594_v36 = vmul.f32 %v1562_v44, %v1338_v5  ;;  %v1471_v35 = vadd.f32 %v1439_v53, %v3622_v49  ;;  %v2701_v56 = vpop.eup %2700 }
 0x27d   : > { %v1593_v41 = vmul.f32 %v1561_v17, %v1337_v2  ;;  %v1441_v11 = vmul.f32 %v1409_v25, %v3631_v12  ;;  %v1410_v37 = vmul.f32 %v1378_v6, %v3640_v39  ;;  %v1472_v4 = vadd.f32 %v1440_v43, %v3626_v50 }
 0x27e   : > { %v1622_v40 = vpack.c.bf16 %v1594_v36, %v1592_v33  ;;  %v2703_v61 = vpop.eup %2702  ;;  %v1292_v51 = vpop.f32.mrf.mxu1  ;;  %v1503_v47 = vmul.f32 0.7978846, %v1471_v35  ;;  %v1563_v23 = vadd.f32 1.0, %v2701_v56 }
 0x27f   : > { %v1621_v10 = vpack.c.bf16 %v1593_v41, %v1591_v45  ;;  %v1442_v60 = vmul.f32 %v1410_v37, %v3640_v39  ;;  %v3652_v54 = vadd.f32 %v1292_v51, %v3527_v20  ;;  %v1504_v22 = vmul.f32 0.7978846, %v1472_v4 }
 0x280   : > { %1810 = vmatprep.mubr.bf16.mxu0 %v1622_v40  ;;  %v1294_v57 = vpop.f32.mrf.mxu1  ;;  %v1473_v27 = vadd.f32 %v1441_v11, %v3631_v12  ;;  %2708 = vtanh.f32 %v1503_v47  ;;  %v1564_v58 = vadd.f32 1.0, %v2703_v61  ;;  %v1595_v9 = vmul.f32 %v1563_v23, %v1339_v32 }
 0x281   : > { %v2705_v63 = vpop.eup %2704  ;;  %v1379_v42 = vmul.f32 0.044715, %v3652_v54  ;;  %v3659_v26 = vadd.f32 %v1294_v57, %v3531_v0  ;;  %v1474_v34 = vadd.f32 %v1442_v60, %v3640_v39  ;;  %2710 = vtanh.f32 %v1504_v22 }
 0x282   : > { %1811 = vmatmul.mubr.bf16.gmra.mxu0 %v1621_v10  ;;  %v1296_v31 = vpop.f32.mrf.mxu1  ;;  %v1565_v30 = vadd.f32 1.0, %v2705_v63  ;;  %v1505_v18 = vmul.f32 0.7978846, %v1473_v27  ;;  %v1596_v5 = vmul.f32 %v1564_v58, %v1340_v16  ;;  %v1343_v45 = vmul.f32 0.5, %v3622_v49 }
 0x283   : > { %v2707_v3 = vpop.eup %2706  ;;  %v1411_v1 = vmul.f32 %v1379_v42, %v3652_v54  ;;  %v1380_v24 = vmul.f32 0.044715, %v3659_v26  ;;  %v3666_v8 = vadd.f32 %v1296_v31, %v3527_v20  ;;  %v1506_v21 = vmul.f32 0.7978846, %v1474_v34 }
 0x284   : > { %v1298_v29 = vpop.f32.mrf.mxu1  ;;  %v1566_v59 = vadd.f32 1.0, %v2707_v3  ;;  %2712 = vtanh.f32 %v1505_v18  ;;  %v1597_v19 = vmul.f32 %v1565_v30, %v1341_v7  ;;  %v1344_v37 = vmul.f32 0.5, %v3626_v50 }
 0x285   : > { %v1443_v48 = vmul.f32 %v1411_v1, %v3652_v54  ;;  %v1412_v38 = vmul.f32 %v1380_v24, %v3659_v26  ;;  %v1381_v46 = vmul.f32 0.044715, %v3666_v8  ;;  %v3673_v14 = vadd.f32 %v1298_v29, %v3531_v0 }
 0x286   : > { %v1302_v62 = vpop.f32.mrf.mxu1  ;;  %v1598_v44 = vmul.f32 %v1566_v59, %v1342_v15  ;;  %2714 = vtanh.f32 %v1506_v21  ;;  %v1623_v25 = vpack.c.bf16 %v1597_v19, %v1595_v9  ;;  %v1345_v22 = vmul.f32 0.5, %v3631_v12 }
 0x287   : > { %v1475_v55 = vadd.f32 %v1443_v48, %v3652_v54  ;;  %v1444_v13 = vmul.f32 %v1412_v38, %v3659_v26  ;;  %v1413_v53 = vmul.f32 %v1381_v46, %v3666_v8  ;;  %v3679_v52 = vadd.f32 %v1302_v62, %v3527_v20 }
 0x288   : > { %v1382_v28 = vmul.f32 0.044715, %v3673_v14  ;;  %v1304_v33 = vpop.f32.mrf.mxu1  ;;  %v1624_v36 = vpack.c.bf16 %v1598_v44, %v1596_v5  ;;  %v1346_v16 = vmul.f32 0.5, %v3640_v39  ;;  %v3706_v63 = vmul.f32 0.5, %v3652_v54 }
 0x289   : > { %v1507_v2 = vmul.f32 0.7978846, %v1475_v55  ;;  %v1445_v17 = vmul.f32 %v1413_v53, %v3666_v8  ;;  %v3684_v43 = vadd.f32 %v1304_v33, %v3531_v0  ;;  %v1476_v41 = vadd.f32 %v1444_v13, %v3659_v26 }
 0x28a   : > { %v1414_v6 = vmul.f32 %v1382_v28, %v3673_v14  ;;  %v1306_v40 = vpop.f32.mrf.mxu1  ;;  %1818 = vmatprep.mubr.bf16.mxu0 %v1624_v36  ;;  %v1383_v56 = vmul.f32 0.044715, %v3679_v52  ;;  %v3710_v58 = vmul.f32 0.5, %v3659_v26  ;;  %v3723_v26 = vmul.f32 0.5, %v3666_v8 }
 0x28b   : > { %v1477_v35 = vadd.f32 %v1445_v17, %v3666_v8  ;;  %v1384_v11 = vmul.f32 0.044715, %v3684_v43  ;;  %1819 = vmatmul.mubr.bf16.gmra.mxu0 %v1623_v25  ;;  %2716 = vtanh.f32 %v1507_v2  ;;  %v3695_v61 = vadd.f32 %v1306_v40, %v3527_v20 }
 0x28c   : > { %v1446_v4 = vmul.f32 %v1414_v6, %v3673_v14  ;;  %v1308_v51 = vpop.f32.mrf.mxu1  ;;  %v1508_v10 = vmul.f32 0.7978846, %v1476_v41  ;;  %v1415_v12 = vmul.f32 %v1383_v56, %v3679_v52  ;;  %v3731_v38 = vmul.f32 0.5, %v3673_v14 }
 0x28d   : > { %v2709_v49 = vpop.eup %2708  ;;  %v1509_v47 = vmul.f32 0.7978846, %v1477_v35  ;;  %v1416_v60 = vmul.f32 %v1384_v11, %v3684_v43  ;;  %v3699_v32 = vadd.f32 %v1308_v51, %v3531_v0  ;;  %v1385_v57 = vmul.f32 0.044715, %v3695_v61 }
 0x28e   : > { %v1312_v50 = vpop.f32.mrf.mxu1  ;;  %v1478_v23 = vadd.f32 %v1446_v4, %v3673_v14  ;;  %2718 = vtanh.f32 %v1508_v10  ;;  %v2711_v27 = vpop.eup %2710  ;;  %v1567_v30 = vadd.f32 1.0, %v2709_v49  ;;  %v1447_v46 = vmul.f32 %v1415_v12, %v3679_v52 }
 0x28f   : > { %2720 = vtanh.f32 %v1509_v47  ;;  %v1386_v42 = vmul.f32 0.044715, %v3699_v32  ;;  %v1448_v7 = vmul.f32 %v1416_v60, %v3684_v43  ;;  %v1417_v18 = vmul.f32 %v1385_v57, %v3695_v61 }
 0x290   : > { %v1314_v31 = vpop.f32.mrf.mxu1  ;;  %v1510_v39 = vmul.f32 0.7978846, %v1478_v23  ;;  %v3717_v54 = vadd.f32 %v1312_v50, %v3527_v20  ;;  %v1568_v15 = vadd.f32 1.0, %v2711_v27  ;;  %v1599_v62 = vmul.f32 %v1567_v30, %v1343_v45 }
 0x291   : > { %v2713_v34 = vpop.eup %2712  ;;  %v1418_v3 = vmul.f32 %v1386_v42, %v3699_v32  ;;  %v3720_v1 = vadd.f32 %v1314_v31, %v3531_v0  ;;  %v1480_v5 = vadd.f32 %v1448_v7, %v3684_v43  ;;  %v1449_v44 = vmul.f32 %v1417_v18, %v3695_v61 }
 0x292   : > { %v1316_v24 = vpop.f32.mrf.mxu1  ;;  %v1569_v29 = vadd.f32 1.0, %v2713_v34  ;;  %2722 = vtanh.f32 %v1510_v39  ;;  %v1387_v55 = vmul.f32 0.044715, %v3717_v54  ;;  %v1600_v33 = vmul.f32 %v1568_v15, %v1344_v37 }
 0x293   : > { %v2715_v59 = vpop.eup %2714  ;;  %v1450_v9 = vmul.f32 %v1418_v3, %v3699_v32  ;;  %v1388_v21 = vmul.f32 0.044715, %v3720_v1  ;;  %v3728_v48 = vadd.f32 %v1316_v24, %v3527_v20  ;;  %v1512_v2 = vmul.f32 0.7978846, %v1480_v5 }
 0x294   : > { %v1318_v19 = vpop.f32.mrf.mxu1  ;;  %v1570_v8 = vadd.f32 1.0, %v2715_v59  ;;  %v1601_v53 = vmul.f32 %v1569_v29, %v1345_v22  ;;  %v1479_v56 = vadd.f32 %v1447_v46, %v3679_v52  ;;  %v1419_v49 = vmul.f32 %v1387_v55, %v3717_v54 }
 0x295   : > { %v3738_v13 = vadd.f32 %v1318_v19, %v3531_v0  ;;  %v1482_v14 = vadd.f32 %v1450_v9, %v3699_v32  ;;  %v1420_v17 = vmul.f32 %v1388_v21, %v3720_v1  ;;  %v1389_v25 = vmul.f32 0.044715, %v3728_v48 }
 0x296   : > { %v1322_v28 = vpop.f32.mrf.mxu1  ;;  %v1602_v36 = vmul.f32 %v1570_v8, %v1346_v16  ;;  %2724 = vtanh.f32 %v1512_v2  ;;  %v1625_v10 = vpack.c.bf16 %v1601_v53, %v1599_v62  ;;  %v1481_v60 = vadd.f32 %v1449_v44, %v3695_v61 }
 0x297   : > { %v1390_v6 = vmul.f32 0.044715, %v3738_v13  ;;  %v3745_v40 = vadd.f32 %v1322_v28, %v3527_v20  ;;  %v1514_v35 = vmul.f32 0.7978846, %v1482_v14  ;;  %v1511_v22 = vmul.f32 0.7978846, %v1479_v56 }
 0x298   : > { %v1324_v45 = vpop.f32.mrf.mxu1  ;;  %v1626_v41 = vpack.c.bf16 %v1602_v36, %v1600_v33  ;;  %v2717_v11 = vpop.eup %2716  ;;  %v1452_v50 = vmul.f32 %v1420_v17, %v3720_v1  ;;  %v1421_v16 = vmul.f32 %v1389_v25, %v3728_v48  ;;  %v1513_v30 = vmul.f32 0.7978846, %v1481_v60 }
 0x299   : > { %v1422_v37 = vmul.f32 %v1390_v6, %v3738_v13  ;;  %v1391_v4 = vmul.f32 0.044715, %v3745_v40  ;;  %v3751_v51 = vadd.f32 %v1324_v45, %v3531_v0  ;;  %2726 = vtanh.f32 %v1514_v35 }
 0x29a   : > { %v1326_v47 = vpop.f32.mrf.mxu1  ;;  %1826 = vmatprep.mubr.bf16.mxu0 %v1626_v41  ;;  %v1571_v31 = vadd.f32 1.0, %v2717_v11  ;;  %2728 = vtanh.f32 %v1511_v22  ;;  %v1453_v59 = vmul.f32 %v1421_v16, %v3728_v48 }
 0x29b   : > { %v2719_v57 = vpop.eup %2718  ;;  %v1392_v23 = vmul.f32 0.044715, %v3751_v51  ;;  %v3759_v27 = vadd.f32 %v1326_v47, %v3527_v20  ;;  %1827 = vmatmul.mubr.bf16.gmra.mxu0 %v1625_v10  ;;  %v1454_v12 = vmul.f32 %v1422_v37, %v3738_v13  ;;  %v1423_v39 = vmul.f32 %v1391_v4, %v3745_v40 }
 0x29c   : > { %v2721_v42 = vpop.eup %2720  ;;  %v1328_v7 = vpop.f32.mrf.mxu1  ;;  %v1451_v20 = vmul.f32 %v1419_v49, %v3717_v54  ;;  %v1572_v24 = vadd.f32 1.0, %v2719_v57  ;;  %2730 = vtanh.f32 %v1513_v30  ;;  %v1603_v55 = vmul.f32 %v1571_v31, %v3706_v63 }
 0x29d   : > { %v1424_v34 = vmul.f32 %v1392_v23, %v3751_v51  ;;  %v1393_v18 = vmul.f32 0.044715, %v3759_v27  ;;  %v3766_v3 = vadd.f32 %v1328_v7, %v3531_v0  ;;  %v1573_v15 = vadd.f32 1.0, %v2721_v42 }
 0x29e   : > { %v1484_v0 = vadd.f32 %v1452_v50, %v3720_v1  ;;  %v1486_v62 = vadd.f32 %v1454_v12, %v3738_v13  ;;  %v1455_v5 = vmul.f32 %v1423_v39, %v3745_v40  ;;  %v1604_v53 = vmul.f32 %v1572_v24, %v3710_v58 }
 0x29f   : > { %v2723_v29 = vpop.eup %2722  ;;  %v1456_v9 = vmul.f32 %v1424_v34, %v3751_v51  ;;  %v1425_v21 = vmul.f32 %v1393_v18, %v3759_v27  ;;  %v1394_v46 = vmul.f32 0.044715, %v3766_v3  ;;  %v1605_v8 = vmul.f32 %v1573_v15, %v3723_v26 }
 0x2a0   : > { %v1574_v19 = vadd.f32 1.0, %v2723_v29  ;;  %v1516_v33 = vmul.f32 0.7978846, %v1484_v0  ;;  %v1518_v36 = vmul.f32 0.7978846, %v1486_v62  ;;  %v1483_v2 = vadd.f32 %v1451_v20, %v3717_v54 }
 0x2a1   : > { %v1426_v44 = vmul.f32 %v1394_v46, %v3766_v3  ;;  %v1457_v14 = vmul.f32 %v1425_v21, %v3759_v27  ;;  %v1485_v17 = vadd.f32 %v1453_v59, %v3728_v48  ;;  %v1627_v6 = vpack.c.bf16 %v1605_v8, %v1603_v55 }
 0x2a2   : > { %v1606_v28 = vmul.f32 %v1574_v19, %v3731_v38  ;;  %2732 = vtanh.f32 %v1516_v33  ;;  %v1488_v45 = vadd.f32 %v1456_v9, %v3751_v51  ;;  %v1515_v58 = vmul.f32 0.7978846, %v1483_v2 }
 0x2a3   : > { %v1458_v26 = vmul.f32 %v1426_v44, %v3766_v3  ;;  %v2725_v63 = vpop.eup %2724  ;;  %2734 = vtanh.f32 %v1518_v36  ;;  %v1517_v41 = vmul.f32 0.7978846, %v1485_v17  ;;  %v1487_v4 = vadd.f32 %v1455_v5, %v3745_v40 }
 0x2a4   : > { %v1628_v25 = vpack.c.bf16 %v1606_v28, %v1604_v53  ;;  %v1576_v35 = vadd.f32 1.0, %v2725_v63  ;;  %v1520_v56 = vmul.f32 0.7978846, %v1488_v45  ;;  %2736 = vtanh.f32 %v1515_v58 }
 0x2a5   : > { %v1490_v38 = vadd.f32 %v1458_v26, %v3766_v3  ;;  %v1489_v10 = vadd.f32 %v1457_v14, %v3759_v27  ;;  %v1352_v49 = vmul.f32 0.5, %v3684_v43  ;;  %v1354_v47 = vmul.f32 0.5, %v3699_v32 }
 0x2a6   : > { %1834 = vmatprep.mubr.bf16.mxu1 %v1628_v25  ;;  %v2727_v11 = vpop.eup %2726  ;;  %2738 = vtanh.f32 %v1517_v41  ;;  %v1519_v57 = vmul.f32 0.7978846, %v1487_v4  ;;  %v1351_v7 = vmul.f32 0.5, %v3679_v52  ;;  %v1353_v30 = vmul.f32 0.5, %v3695_v61 }
 0x2a7   : > { %1835 = vmatmul.mubr.bf16.vlgmr.msra.gmra.mxu1 %v1627_v6  ;;  %v1522_v37 = vmul.f32 0.7978846, %v1490_v38  ;;  %v1578_v60 = vadd.f32 1.0, %v2727_v11  ;;  %v2729_v22 = vpop.eup %2728  ;;  %2740 = vtanh.f32 %v1520_v56  ;;  %v1521_v50 = vmul.f32 0.7978846, %v1489_v10 }
 0x2a8   : > { %v1608_v16 = vmul.f32 %v1576_v35, %v1352_v49  ;;  %v1575_v42 = vadd.f32 1.0, %v2729_v22  ;;  %v1356_v15 = vmul.f32 0.5, %v3720_v1  ;;  %v1358_v29 = vmul.f32 0.5, %v3738_v13  ;;  %v3804_v38 = vld [vmem:[%s3969_s6] ss:$0 sm:$0xff] }
 0x2a9   : > { %v1610_v23 = vmul.f32 %v1578_v60, %v1354_v47  ;;  %2742 = vtanh.f32 %v1522_v37  ;;  %v2731_v12 = vpop.eup %2730  ;;  %v1355_v8 = vmul.f32 0.5, %v3717_v54  ;;  %v1357_v0 = vmul.f32 0.5, %v3728_v48 }
 0x2aa   : > { %2744 = vtanh.f32 %v1519_v57  ;;  %v1577_v43 = vadd.f32 1.0, %v2731_v12  ;;  %v1607_v32 = vmul.f32 %v1575_v42, %v1351_v7  ;;  %v1360_v55 = vmul.f32 0.5, %v3751_v51 }
 0x2ab   : > { %v1630_v31 = vpack.c.bf16 %v1610_v23, %v1608_v16  ;;  %2746 = vtanh.f32 %v1521_v50  ;;  %v1362_v33 = vmul.f32 0.5, %v3766_v3  ;;  %v1361_v25 = vmul.f32 0.5, %v3759_v27 }
 0x2ac   : > { %v1609_v39 = vmul.f32 %v1577_v43, %v1353_v30  ;;  %v1359_v51 = vmul.f32 0.5, %v3745_v40 }
 0x2ad   : > { %1842 = vmatprep.mubr.bf16.mxu1 %v1630_v31 }
 0x2ae   : > { %v1629_v34 = vpack.c.bf16 %v1609_v39, %v1607_v32 }
 0x2af   : > { %v2733_v18 = vpop.eup %2732 }
 0x2b0   : > { %v2735_v20 = vpop.eup %2734  ;;  %1843 = vmatmul.mubr.bf16.gmra.mxu1 %v1629_v34  ;;  %v1580_v24 = vadd.f32 1.0, %v2733_v18 }
 0x2b1   : > { %v1582_v59 = vadd.f32 1.0, %v2735_v20  ;;  %v2737_v52 = vpop.eup %2736 }
 0x2b2   : > { %v1612_v21 = vmul.f32 %v1580_v24, %v1356_v15  ;;  %v1579_v61 = vadd.f32 1.0, %v2737_v52 }
 0x2b3   : > { %v2739_v9 = vpop.eup %2738  ;;  %v1614_v46 = vmul.f32 %v1582_v59, %v1358_v29 }
 0x2b4   : > { %v2741_v19 = vpop.eup %2740  ;;  %v1581_v62 = vadd.f32 1.0, %v2739_v9  ;;  %v1611_v28 = vmul.f32 %v1579_v61, %v1355_v8 }
 0x2b5   : > { %v1632_v44 = vpack.c.bf16 %v1614_v46, %v1612_v21  ;;  %v1584_v53 = vadd.f32 1.0, %v2741_v19 }
 0x2b6   : > { %v2743_v5 = vpop.eup %2742  ;;  %v1613_v13 = vmul.f32 %v1581_v62, %v1357_v0 }
 0x2b7   : > { %v2745_v1 = vpop.eup %2744  ;;  %v1586_v36 = vadd.f32 1.0, %v2743_v5  ;;  %1850 = vmatprep.mubr.bf16.mxu1 %v1632_v44  ;;  %v1616_v2 = vmul.f32 %v1584_v53, %v1360_v55 }
 0x2b8   : > { %v2747_v14 = vpop.eup %2746  ;;  %v1631_v26 = vpack.c.bf16 %v1613_v13, %v1611_v28  ;;  %v1583_v6 = vadd.f32 1.0, %v2745_v1 }
 0x2b9   : > { %v1618_v17 = vmul.f32 %v1586_v36, %v1362_v33  ;;  %v1585_v54 = vadd.f32 1.0, %v2747_v14 }
 0x2ba   : > { %1851 = vmatmul.mubr.bf16.gmra.mxu1 %v1631_v26  ;;  %v1615_v63 = vmul.f32 %v1583_v6, %v1359_v51 }
 0x2bb   : > { %v1634_v48 = vpack.c.bf16 %v1618_v17, %v1616_v2  ;;  %v1617_v45 = vmul.f32 %v1585_v54, %v1361_v25 }
 0x2bd   : > { %1858 = vmatprep.mubr.bf16.mxu1 %v1634_v48  ;;  %v1633_v58 = vpack.c.bf16 %v1617_v45, %v1615_v63 }
 0x2c2   : > { %1859 = vmatmul.mubr.bf16.gmra.mxu1 %v1633_v58 }
 0x33a   : > { %v2359_v3 = vpop.f32.mrf.mxu0 }
 0x33c   : > { %v2360_v41 = vpop.f32.mrf.mxu0 }
 0x33d   : > { %v2361_v35 = vadd.f32 %v2360_v41, %v2359_v3 }
 0x33e   : > { %v2362_v56 = vpop.f32.mrf.mxu0 }
 0x33f   : > { %v3807_v11 = vadd.f32 %v2361_v35, %v3804_v38 }
 0x340   : > { %v2363_v27 = vpop.f32.mrf.mxu0 }
 0x341   : > { %v2364_v37 = vadd.f32 %v2363_v27, %v2362_v56  ;;  %v1867_v40 = vmul.f32 %v3807_v11, %v3807_v11 }
 0x342   : > { %v2365_v4 = vpop.f32.mrf.mxu0 }
 0x343   : > { %v3812_v10 = vadd.f32 %v2364_v37, %v3804_v38  ;;  %1883 = vadd.xlane.f32.xlu0 %v1867_v40 }
 0x344   : > { %v2366_v49 = vpop.f32.mrf.mxu0 }
 0x345   : > { %v2367_v47 = vadd.f32 %v2366_v49, %v2365_v4  ;;  %v1868_v60 = vmul.f32 %v3812_v10, %v3812_v10 }
 0x346   : > { %v2368_v22 = vpop.f32.mrf.mxu0 }
 0x347   : > { %1885 = vadd.xlane.f32.xlu0 %v1868_v60  ;;  %v3817_v57 = vadd.f32 %v2367_v47, %v3804_v38 }
 0x348   : > { %v2369_v50 = vpop.f32.mrf.mxu0 }
 0x349   : > { %v2370_v16 = vadd.f32 %v2369_v50, %v2368_v22  ;;  %v1869_v23 = vmul.f32 %v3817_v57, %v3817_v57 }
 0x34b   : > { %v3822_v42 = vadd.f32 %v2370_v16, %v3804_v38  ;;  %1887 = vadd.xlane.f32.xlu1 %v1869_v23  ;;  %v2371_v12 = vpop.f32.mrf.mxu0 }
 0x34d   : > { %v1870_v7 = vmul.f32 %v3822_v42, %v3822_v42  ;;  %v2372_v31 = vpop.f32.mrf.mxu0 }
 0x34e   : > { %v2373_v30 = vadd.f32 %v2372_v31, %v2371_v12 }
 0x34f   : > { %1889 = vadd.xlane.f32.xlu1 %v1870_v7  ;;  %v2374_v43 = vpop.f32.mrf.mxu0 }
 0x350   : > { %v3827_v32 = vadd.f32 %v2373_v30, %v3804_v38 }
 0x351   : > { %v2375_v39 = vpop.f32.mrf.mxu0 }
 0x352   : > { %v2376_v34 = vadd.f32 %v2375_v39, %v2374_v43  ;;  %v1871_v18 = vmul.f32 %v3827_v32, %v3827_v32 }
 0x354   : > { %v3832_v20 = vadd.f32 %v2376_v34, %v3804_v38  ;;  %1891 = vadd.xlane.f32.xlu0 %v1871_v18 }
 0x356   : > { %v1872_v24 = vmul.f32 %v3832_v20, %v3832_v20 }
 0x358   : > { %1893 = vadd.xlane.f32.xlu1 %v1872_v24 }
 0x35b   : > { %v2377_v15 = vpop.f32.mrf.mxu0 }
 0x35d   : > { %v2378_v29 = vpop.f32.mrf.mxu0 }
 0x35e   : > { %v2379_v59 = vadd.f32 %v2378_v29, %v2377_v15 }
 0x35f   : > { %v2380_v52 = vpop.f32.mrf.mxu0 }
 0x360   : > { %v3837_v9 = vadd.f32 %v2379_v59, %v3804_v38 }
 0x361   : > { %v2381_v21 = vpop.f32.mrf.mxu0 }
 0x362   : > { %v2382_v46 = vadd.f32 %v2381_v21, %v2380_v52  ;;  %v1873_v61 = vmul.f32 %v3837_v9, %v3837_v9 }
 0x364   : > { %v3842_v19 = vadd.f32 %v2382_v46, %v3804_v38  ;;  %1895 = vadd.xlane.f32.xlu0 %v1873_v61 }
 0x366   : > { %v1874_v8 = vmul.f32 %v3842_v19, %v3842_v19 }
 0x367   : > { %v2383_v0 = vpop.f32.mrf.mxu1 }
 0x368   : > { %1897 = vadd.xlane.f32.xlu1 %v1874_v8 }
 0x369   : > { %v2384_v62 = vpop.f32.mrf.mxu1 }
 0x36a   : > { %v2385_v5 = vadd.f32 %v2384_v62, %v2383_v0 }
 0x36b   : > { %v2386_v44 = vpop.f32.mrf.mxu1 }
 0x36c   : > { %v3847_v55 = vadd.f32 %v2385_v5, %v3804_v38 }
 0x36d   : > { %v2387_v53 = vpop.f32.mrf.mxu1 }
 0x36e   : > { %v2388_v1 = vadd.f32 %v2387_v53, %v2386_v44  ;;  %v1875_v28 = vmul.f32 %v3847_v55, %v3847_v55 }
 0x370   : > { %v3852_v13 = vadd.f32 %v2388_v1, %v3804_v38  ;;  %1899 = vadd.xlane.f32.xlu0 %v1875_v28  ;;  %v2389_v33 = vpop.f32.mrf.mxu1 }
 0x372   : > { %v1876_v36 = vmul.f32 %v3852_v13, %v3852_v13  ;;  %v2390_v14 = vpop.f32.mrf.mxu1 }
 0x373   : > { %v2391_v26 = vadd.f32 %v2390_v14, %v2389_v33 }
 0x374   : > { %1901 = vadd.xlane.f32.xlu1 %v1876_v36  ;;  %v2392_v2 = vpop.f32.mrf.mxu1 }
 0x375   : > { %v3857_v17 = vadd.f32 %v2391_v26, %v3804_v38 }
 0x376   : > { %v2393_v54 = vpop.f32.mrf.mxu1 }
 0x377   : > { %v2394_v48 = vadd.f32 %v2393_v54, %v2392_v2  ;;  %v1877_v25 = vmul.f32 %v3857_v17, %v3857_v17 }
 0x379   : > { %v3862_v6 = vadd.f32 %v2394_v48, %v3804_v38  ;;  %1903 = vadd.xlane.f32.xlu0 %v1877_v25 }
 0x37a   : > { %v2395_v51 = vpop.f32.mrf.mxu1 }
 0x37b   : > { %v1878_v45 = vmul.f32 %v3862_v6, %v3862_v6 }
 0x37c   : > { %v2396_v63 = vpop.f32.mrf.mxu1 }
 0x37d   : > { %v2397_v58 = vadd.f32 %v2396_v63, %v2395_v51  ;;  %1905 = vadd.xlane.f32.xlu1 %v1878_v45 }
 0x37e   : > { %v2398_v3 = vpop.f32.mrf.mxu1 }
 0x37f   : > { %v3867_v41 = vadd.f32 %v2397_v58, %v3804_v38 }
 0x380   : > { %v2399_v35 = vpop.f32.mrf.mxu1 }
 0x381   : > { %v2400_v56 = vadd.f32 %v2399_v35, %v2398_v3  ;;  %v1879_v27 = vmul.f32 %v3867_v41, %v3867_v41 }
 0x382   : > { %v2401_v37 = vpop.f32.mrf.mxu1 }
 0x383   : > { %v3872_v40 = vadd.f32 %v2400_v56, %v3804_v38  ;;  %1907 = vadd.xlane.f32.xlu0 %v1879_v27 }
 0x384   : > { %v2402_v4 = vpop.f32.mrf.mxu1 }
 0x385   : > { %v2403_v49 = vadd.f32 %v2402_v4, %v2401_v37  ;;  %v1880_v47 = vmul.f32 %v3872_v40, %v3872_v40 }
 0x386   : > { %v2404_v60 = vpop.f32.mrf.mxu1 }
 0x387   : > { %v3877_v22 = vadd.f32 %v2403_v49, %v3804_v38  ;;  %1909 = vadd.xlane.f32.xlu1 %v1880_v47 }
 0x388   : > { %v2405_v50 = vpop.f32.mrf.mxu1 }
 0x389   : > { %v2406_v16 = vadd.f32 %v2405_v50, %v2404_v60  ;;  %v1881_v23 = vmul.f32 %v3877_v22, %v3877_v22 }
 0x38b   : > { %v3882_v12 = vadd.f32 %v2406_v16, %v3804_v38  ;;  %1911 = vadd.xlane.f32.xlu0 %v1881_v23 }
 0x38d   : > { %v1882_v7 = vmul.f32 %v3882_v12, %v3882_v12 }
 0x38f   : > { %1913 = vadd.xlane.f32.xlu1 %v1882_v7 }
 0x3cc   : > { %v1884_v31 = vpop.xlane.xlu0 %1883 }
 0x3cd   : > { %v1915_v30 = vmax.f32 %v1884_v31, 1e-24 }
 0x3cf   : > { %2748 = vrsqrt.f32 %v1915_v30 }
 0x3d0   : > { %v1886_v43 = vpop.xlane.xlu0 %1885 }
 0x3d1   : > { %v1916_v39 = vmax.f32 %v1886_v43, 1e-24 }
 0x3d3   : > { %2750 = vrsqrt.f32 %v1916_v39 }
 0x3d4   : > { %v1888_v34 = vpop.xlane.xlu1 %1887 }
 0x3d5   : > { %v1917_v18 = vmax.f32 %v1888_v34, 1e-24 }
 0x3d7   : > { %2752 = vrsqrt.f32 %v1917_v18 }
 0x3d8   : > { %v1890_v24 = vpop.xlane.xlu1 %1889 }
 0x3d9   : > { %v1918_v15 = vmax.f32 %v1890_v24, 1e-24 }
 0x3db   : > { %2754 = vrsqrt.f32 %v1918_v15 }
 0x3dc   : > { %v2749_v38 = vpop.eup %2748 }
 0x3dd   : > { %v1892_v29 = vpop.xlane.xlu0 %1891  ;;  %v1947_v21 = vmul.f32 %v2749_v38, %v3807_v11 }
 0x3de   : > { %v1919_v52 = vmax.f32 %v1892_v29, 1e-24 }
 0x3e0   : > { %v2751_v59 = vpop.eup %2750  ;;  %2756 = vrsqrt.f32 %v1919_v52 }
 0x3e1   : > { %v1948_v46 = vmul.f32 %v2751_v59, %v3812_v10  ;;  %v1894_v8 = vpop.xlane.xlu1 %1893 }
 0x3e2   : > { %v1920_v0 = vmax.f32 %v1894_v8, 1e-24 }
 0x3e3   : > { %v2299_v61 = vpack.c.bf16 %v1948_v46, %v1947_v21 }
 0x3e4   : > { %v2753_v62 = vpop.eup %2752  ;;  %2758 = vrsqrt.f32 %v1920_v0 }
 0x3e5   : > { %2300 = vst [vmem:[%s3889_s11] sm:$0xff] %v2299_v61   ;;  %v1949_v44 = vmul.f32 %v2753_v62, %v3817_v57 }
 0x3e8   : > { %v2755_v5 = vpop.eup %2754 }
 0x3e9   : > { %v1950_v53 = vmul.f32 %v2755_v5, %v3822_v42 }
 0x3eb   : > { %v2304_v11 = vpack.c.bf16 %v1950_v53, %v1949_v44 }
 0x3ed   : > { %2336 = vst [vmem:[%s3889_s11 + $0x8] sm:$0xff] %v2304_v11   ;;  %v1896_v10 = vpop.xlane.xlu0 %1895  ;;  %v2757_v28 = vpop.eup %2756 }
 0x3ee   : > { %v1921_v1 = vmax.f32 %v1896_v10, 1e-24  ;;  %v1951_v14 = vmul.f32 %v2757_v28, %v3827_v32 }
 0x3f0   : > { %2760 = vrsqrt.f32 %v1921_v1 }
 0x3f1   : > { %v2759_v33 = vpop.eup %2758  ;;  %v1898_v36 = vpop.xlane.xlu1 %1897 }
 0x3f2   : > { %v1952_v26 = vmul.f32 %v2759_v33, %v3832_v20  ;;  %v1922_v2 = vmax.f32 %v1898_v36, 1e-24 }
 0x3f4   : > { %v2309_v54 = vpack.c.bf16 %v1952_v26, %v1951_v14  ;;  %2762 = vrsqrt.f32 %v1922_v2 }
 0x3f6   : > { %2337 = vst [vmem:[%s3889_s11 + $0x10] sm:$0xff] %v2309_v54  }
 0x3f9   : > { %v1900_v57 = vpop.xlane.xlu0 %1899 }
 0x3fa   : > { %v1923_v48 = vmax.f32 %v1900_v57, 1e-24 }
 0x3fc   : > { %2764 = vrsqrt.f32 %v1923_v48 }
 0x3fd   : > { %v1902_v42 = vpop.xlane.xlu1 %1901  ;;  %v2761_v51 = vpop.eup %2760 }
 0x3fe   : > { %v1924_v25 = vmax.f32 %v1902_v42, 1e-24  ;;  %v1953_v63 = vmul.f32 %v2761_v51, %v3837_v9 }
 0x400   : > { %2766 = vrsqrt.f32 %v1924_v25 }
 0x401   : > { %v2763_v45 = vpop.eup %2762 }
 0x402   : > { %v1954_v32 = vmul.f32 %v2763_v45, %v3842_v19  ;;  %v1904_v58 = vpop.xlane.xlu0 %1903 }
 0x403   : > { %v1925_v3 = vmax.f32 %v1904_v58, 1e-24 }
 0x404   : > { %v2314_v20 = vpack.c.bf16 %v1954_v32, %v1953_v63 }
 0x405   : > { %2768 = vrsqrt.f32 %v1925_v3 }
 0x406   : > { %2338 = vst [vmem:[%s3889_s11 + $0x18] sm:$0xff] %v2314_v20   ;;  %v1906_v35 = vpop.xlane.xlu1 %1905 }
 0x407   : > { %v1926_v56 = vmax.f32 %v1906_v35, 1e-24 }
 0x409   : > { %v2765_v27 = vpop.eup %2764  ;;  %2770 = vrsqrt.f32 %v1926_v56 }
 0x40a   : > { %v1955_v4 = vmul.f32 %v2765_v27, %v3847_v55 }
 0x40c   : > { %v1908_v47 = vpop.xlane.xlu0 %1907 }
 0x40d   : > { %v2767_v37 = vpop.eup %2766  ;;  %v1927_v60 = vmax.f32 %v1908_v47, 1e-24 }
 0x40e   : > { %v1956_v49 = vmul.f32 %v2767_v37, %v3852_v13 }
 0x40f   : > { %2772 = vrsqrt.f32 %v1927_v60 }
 0x410   : > { %v2319_v9 = vpack.c.bf16 %v1956_v49, %v1955_v4  ;;  %v1910_v19 = vpop.xlane.xlu1 %1909 }
 0x411   : > { %v1928_v50 = vmax.f32 %v1910_v19, 1e-24 }
 0x412   : > { %2339 = vst [vmem:[%s3889_s11 + $0x20] sm:$0xff] %v2319_v9   ;;  %v2769_v16 = vpop.eup %2768 }
 0x413   : > { %2774 = vrsqrt.f32 %v1928_v50  ;;  %v1957_v30 = vmul.f32 %v2769_v16, %v3857_v17 }
 0x414   : > { %v1912_v23 = vpop.xlane.xlu0 %1911 }
 0x415   : > { %v1929_v7 = vmax.f32 %v1912_v23, 1e-24 }
 0x416   : > { %v2771_v31 = vpop.eup %2770 }
 0x417   : > { %v1958_v55 = vmul.f32 %v2771_v31, %v3862_v6  ;;  %2776 = vrsqrt.f32 %v1929_v7 }
 0x418   : > { %v1914_v13 = vpop.xlane.xlu1 %1913 }
 0x419   : > { %v2324_v43 = vpack.c.bf16 %v1958_v55, %v1957_v30  ;;  %v1930_v39 = vmax.f32 %v1914_v13, 1e-24 }
 0x41b   : > { %2340 = vst [vmem:[%s3889_s11 + $0x28] sm:$0xff] %v2324_v43   ;;  %2778 = vrsqrt.f32 %v1930_v39 }
 0x41c   : > { %v2773_v34 = vpop.eup %2772 }
 0x41d   : > { %v1959_v24 = vmul.f32 %v2773_v34, %v3867_v41 }
 0x420   : > { %v2775_v18 = vpop.eup %2774 }
 0x421   : > { %v1960_v15 = vmul.f32 %v2775_v18, %v3872_v40 }
 0x423   : > { %v2329_v38 = vpack.c.bf16 %v1960_v15, %v1959_v24 }
 0x424   : > { %v2777_v17 = vpop.eup %2776 }
 0x425   : > { %2341 = vst [vmem:[%s3889_s11 + $0x30] sm:$0xff] %v2329_v38   ;;  %v1961_v29 = vmul.f32 %v2777_v17, %v3877_v22 }
 0x428   : > { %v2779_v6 = vpop.eup %2778 }
 0x429   : > { %v1962_v59 = vmul.f32 %v2779_v6, %v3882_v12 }
 0x42b   : > { %v2334_v41 = vpack.c.bf16 %v1962_v59, %v1961_v29 }
 0x42d   : > { %2342 = vst [vmem:[%s3889_s11 + $0x38] sm:$0xff] %v2334_v41  }
 0x42e   : > { %2899 = shalt.err (!%p2896_p9)
}
 0x42f   : > { %s2900_s13 = scalar_lea.hbm %s3917_s23, 1024  ;;  %s2904_s12 = scalar_lea.hbm %s3970_s7, 2048 }
 0x430   : > { %p2901_p1 = scmp.ne.s32.totalorder %s3917_s23, %s2900_s13  ;;  %p2905_p11 = scmp.lt.s32.totalorder %s3917_s23, %s3970_s7 }
 0x431   : > { %p2906_p13 = scmp.lt.s32.totalorder %s2904_s12, %s2900_s13 }
 0x432   : > { %p2902_p8 = pnand %p2901_p1, %p3990_p6 }
 0x433   : > { %p2907_p2 = por %p2906_p13, %p2905_p11 }
 0x434   : > { %p2903_p10 = pneg %p2902_p8 }
 0x436   : > { %p2908_p4 = pnand %p2907_p2, %p2903_p10 }
 0x438   : > { %2911 = shalt.err (!%p2908_p4)
}
 0x439   : > { %s2971_s22 = smov 64   ;;  %s2972_s1 = smov 4  }
 0x43a   : > { %2437 = dma.vmem_to_hbm [thread:$0]  (%p3990_p6), %s3919_s18, 1024, %s3917_s23, %s2044_s29, %s2971_s22, %s2971_s22, %s2972_s1  }
 0x43b PF: > { %s2072_s28 = sand.u32 1, %s2946_s24   ;;  %p3991_p12 = scmp.ne.s32.totalorder %s3977_s8, 0 }
 0x43c   : > { %p3992_p0 = scmp.ge.s32.totalorder %s2958_s27, 2  ;;  %s2073_s30 = scalar_lea.sflag [#allocation4], %s2072_s28 }
 0x43e   : > { %p2454_p5 = pnand %p3992_p0, %p3991_p12 }
 0x440   : > { %p2455_p3 = pneg %p2454_p5 }
 0x442   : > { %2941 = dma.done.wait (%p2455_p3), %s2073_s30, 1024  }
 0x443   : > { %2943 = vsyncadd (%p2455_p3), %s2073_s30, 4294966272  ;;  %p22_p7 = scmp.ge.s32.totalorder %s3093_s17, 4   ;;  %s3993_s24 = smov %s2950_s25 }
 0x444   : > { %s3994_s25 = smov %s2954_s26  ;;  %s3995_s26 = smov %s3103_s20 }
 0x445   : > { %s3996_s27 = smov %s3093_s17  ;;  %24 = sbr.rel (!%p22_p7) target bundleno = 9 (0x9), region = 105 }
 0x44a   :  { %2078 = vsyncpa [#allocation3], 1 }
 0x44b   :  { %2080 = vsyncpa [#allocation3 + $0x1], 1 }
 0x44c   :  { %2081 = vsyncpa [#allocation6], 1 }
 0x44d   :  { %2082 = vsyncpa [#allocation9], 1 }
 0x44e   :  { %2083 = vsyncpa [#allocation4], 1 }
 0x44f   :  { %2085 = vsyncpa [#allocation4 + $0x1], 1 }

</bundles_post_ra>
